<compile_context>
chip_gen: v6e
topology: v6e:2x2x1
jax: 0.10.0
libtpu: 0.0.40
codegen_flags: <defaults>
</compile_context>

<pallas_src>
import jax
import jax.numpy as jnp
from jax.experimental import pallas as pl
from jax.experimental.pallas import tpu as pltpu

HIDDEN = 512
OUT = 128
BN_EPS = 1e-5


def projector_head_kernel(x_ref, w1_ref, b1_ref, gamma_ref, beta_ref,
                          w2_ref, b2_ref, o_ref,
                          h_scr, sum_scr, sumsq_scr):
    i = pl.program_id(0)
    tile_n = x_ref.shape[0]
    inv_hw = jnp.float32(1.0 / x_ref.shape[2])

    @pl.when(i == 0)
    def _init():
        sum_scr[...] = jnp.zeros_like(sum_scr)
        sumsq_scr[...] = jnp.zeros_like(sumsq_scr)

    # AdaptiveAvgPool2d((1,1)): sum over the spatial (lane) axis, scale the
    # small (tile_n, C) result instead of the full x tile.
    pooled = jnp.sum(x_ref[...], axis=-1) * inv_hw                    # (tile_n, C)

    # Linear 1 (MXU), f32 accumulate.
    h = jnp.dot(pooled, w1_ref[...],
                preferred_element_type=jnp.float32) + b1_ref[...]     # (tile_n, 512)

    # Stash the h tile and fold BN batch statistics into the streaming pass.
    row0 = pl.multiple_of(i * tile_n, tile_n)
    h_scr[pl.ds(row0, tile_n), :] = h
    sum_scr[...] += jnp.sum(h, axis=0, keepdims=True)
    sumsq_scr[...] += jnp.sum(h * h, axis=0, keepdims=True)

    # Epilogue: BatchNorm over the full batch, ReLU, Linear 2.
    @pl.when(i == pl.num_programs(0) - 1)
    def _epilogue():
        inv_n = jnp.float32(1.0 / h_scr.shape[0])
        mu = sum_scr[...] * inv_n
        var = sumsq_scr[...] * inv_n - mu * mu          # biased (training) variance
        scale = gamma_ref[...] * jax.lax.rsqrt(var + BN_EPS)
        shift = beta_ref[...] - mu * scale
        h_relu = jnp.maximum(h_scr[...] * scale + shift, 0.0)
        o_ref[...] = (jnp.dot(h_relu, w2_ref[...],
                              preferred_element_type=jnp.float32) + b2_ref[...])


def _pick_tile_n(N, C, HW, x_budget_bytes=8 << 20):
    """Largest MXU-friendly tile dividing N whose double-buffered x fits budget."""
    per_row = C * HW * 4
    for t in (512, 256, 128, 64, 32, 16, 8, 4, 2, 1):
        if N % t == 0 and 2 * t * per_row <= x_budget_bytes:
            return t
    return 1


def projector_head(x_nchw, params, tile_n=None):
    """x_nchw: (N, C, H, W) float32.  Returns (N, 128) float32."""
    N, C, H, W = x_nchw.shape
    HW = H * W
    # Free, contiguous reshape (NO transpose / extra HBM copy of x).
    x = x_nchw.reshape(N, C, HW)

    if tile_n is None:
        tile_n = _pick_tile_n(N, C, HW)
    assert N % tile_n == 0, "batch must be divisible by tile_n"
    grid = (N // tile_n,)

    w1, b1 = params["w1"], params["b1"]
    gamma, beta = params["gamma"], params["beta"]
    w2, b2 = params["w2"], params["b2"]

    # VMEM budgeting (double-buffered x tile + resident weights + scratch + out).
    x_tile_bytes = tile_n * C * HW * 4
    weights_bytes = (C * HIDDEN + 3 * HIDDEN + HIDDEN * OUT + OUT) * 4
    scratch_bytes = (N * HIDDEN + 2 * HIDDEN) * 4
    out_bytes = N * OUT * 4
    needed = (2 * x_tile_bytes + 2 * weights_bytes + scratch_bytes
              + 2 * out_bytes + (4 << 20))
    vmem_limit = int(min(max(needed, 16 << 20), 48 << 20))

    cost = pl.CostEstimate(
        flops=2 * N * C * HIDDEN + 2 * N * HIDDEN * OUT + N * C * HW,
        transcendentals=HIDDEN,
        bytes_accessed=4 * (N * C * HW + C * HIDDEN + 3 * HIDDEN
                            + HIDDEN * OUT + OUT + N * OUT),
    )

    grid_spec = pltpu.PrefetchScalarGridSpec(
        num_scalar_prefetch=0,
        grid=grid,
        in_specs=[
            pl.BlockSpec((tile_n, C, HW), lambda i: (i, 0, 0)),   # streamed x tiles
            pl.BlockSpec((C, HIDDEN), lambda i: (0, 0)),          # resident w1
            pl.BlockSpec((1, HIDDEN), lambda i: (0, 0)),          # b1
            pl.BlockSpec((1, HIDDEN), lambda i: (0, 0)),          # gamma
            pl.BlockSpec((1, HIDDEN), lambda i: (0, 0)),          # beta
            pl.BlockSpec((HIDDEN, OUT), lambda i: (0, 0)),        # w2
            pl.BlockSpec((1, OUT), lambda i: (0, 0)),             # b2
        ],
        out_specs=pl.BlockSpec((N, OUT), lambda i: (0, 0)),       # resident output
        scratch_shapes=[
            pltpu.VMEM((N, HIDDEN), jnp.float32),                 # h (Linear1 out)
            pltpu.VMEM((1, HIDDEN), jnp.float32),                 # sum(h)
            pltpu.VMEM((1, HIDDEN), jnp.float32),                 # sum(h^2)
        ],
    )

    return pl.pallas_call(
        projector_head_kernel,
        out_shape=jax.ShapeDtypeStruct((N, OUT), jnp.float32),
        grid_spec=grid_spec,
        compiler_params=pltpu.CompilerParams(
            # BN stats + resident output accumulate across the batch tiles,
            # so this axis must be "arbitrary" (cannot be core-parallel).
            dimension_semantics=("arbitrary",),
            vmem_limit_bytes=vmem_limit,
        ),
        cost_estimate=cost,
    )(x, w1, b1, gamma, beta, w2, b2)


def init_params(key, in_channels):
    k1, k2, k3, k4 = jax.random.split(key, 4)
    lim1 = 1.0 / jnp.sqrt(in_channels)
    lim2 = 1.0 / jnp.sqrt(HIDDEN)
    return {
        "w1": jax.random.uniform(k1, (in_channels, HIDDEN), jnp.float32, -lim1, lim1),
        "b1": jax.random.uniform(k2, (1, HIDDEN), jnp.float32, -lim1, lim1),
        "gamma": jnp.ones((1, HIDDEN), jnp.float32),   # BatchNorm weight
        "beta": jnp.zeros((1, HIDDEN), jnp.float32),   # BatchNorm bias
        "w2": jax.random.uniform(k3, (HIDDEN, OUT), jnp.float32, -lim2, lim2),
        "b2": jax.random.uniform(k4, (1, OUT), jnp.float32, -lim2, lim2),
    }


def reference_forward(x_nchw, params):
    pooled = jnp.mean(x_nchw, axis=(2, 3))                     # (N, C)
    h = pooled @ params["w1"] + params["b1"]
    mu = jnp.mean(h, axis=0, keepdims=True)
    var = jnp.mean((h - mu) ** 2, axis=0, keepdims=True)
    h = params["gamma"] * (h - mu) / jnp.sqrt(var + BN_EPS) + params["beta"]
    h = jnp.maximum(h, 0.0)
    return h @ params["w2"] + params["b2"]


# TODO(synk): training-mode BatchNorm1d also updates running_mean/running_var;
# only the forward output is reproduced here (stated scope).

if __name__ == "__main__":
    # Small synthetic "feats5"-style feature map; tile_n=8 -> grid of 2 steps
    # so the streamed-BN-stats + epilogue path is exercised.
    N, C, H, W = 16, 256, 8, 8
    key = jax.random.PRNGKey(0)
    kx, kp = jax.random.split(key)
    x = jax.random.normal(kx, (N, C, H, W), dtype=jnp.float32)
    params = init_params(kp, C)

    out = projector_head(x, params, tile_n=8)
    out = jax.block_until_ready(out)

    ref = reference_forward(x, params)
    assert out.shape == (N, OUT)
    assert jnp.allclose(out, ref, atol=1e-4, rtol=1e-4), "mismatch vs reference"
    print("KERNEL_OK")
</pallas_src>

<mosaic_0001>
module attributes {stable_mosaic.version = 11 : i64} {
  func.func @projector_head_kernel(%arg0: i32, %arg1: memref<8x256x64xf32, #tpu.memory_space<vmem>>, %arg2: memref<256x512xf32, #tpu.memory_space<vmem>>, %arg3: memref<1x512xf32, #tpu.memory_space<vmem>>, %arg4: memref<1x512xf32, #tpu.memory_space<vmem>>, %arg5: memref<1x512xf32, #tpu.memory_space<vmem>>, %arg6: memref<512x128xf32, #tpu.memory_space<vmem>>, %arg7: memref<1x128xf32, #tpu.memory_space<vmem>>, %arg8: memref<16x128xf32, #tpu.memory_space<vmem>>, %arg9: memref<16x512xf32, #tpu.memory_space<vmem>>, %arg10: memref<1x512xf32, #tpu.memory_space<vmem>>, %arg11: memref<1x512xf32, #tpu.memory_space<vmem>>) attributes {dimension_semantics = [#tpu.dimension_semantics<arbitrary>], iteration_bounds = array<i64: 2>, scalar_prefetch = 0 : i64, scratch_operands = 3 : i64, tpu.core_type = #tpu.core_type<tc>, window_params = [{transform_indices = @transform_0, window_bounds = array<i64: 8, 256, 64>}, {pipeline_mode = #tpu.pipeline_mode<synchronous>, transform_indices = @transform_1, window_bounds = array<i64: 256, 512>}, {pipeline_mode = #tpu.pipeline_mode<synchronous>, transform_indices = @transform_2, window_bounds = array<i64: 1, 512>}, {pipeline_mode = #tpu.pipeline_mode<synchronous>, transform_indices = @transform_3, window_bounds = array<i64: 1, 512>}, {pipeline_mode = #tpu.pipeline_mode<synchronous>, transform_indices = @transform_4, window_bounds = array<i64: 1, 512>}, {pipeline_mode = #tpu.pipeline_mode<synchronous>, transform_indices = @transform_5, window_bounds = array<i64: 512, 128>}, {pipeline_mode = #tpu.pipeline_mode<synchronous>, transform_indices = @transform_6, window_bounds = array<i64: 1, 128>}, {pipeline_mode = #tpu.pipeline_mode<synchronous>, transform_indices = @transform_7, window_bounds = array<i64: 16, 128>}]} {
    %c0_i32 = arith.constant 0 : i32
    %0 = arith.cmpi eq, %arg0, %c0_i32 : i32
    %1 = arith.extui %0 : i1 to i32
    %c0_i32_0 = arith.constant 0 : i32
    %2 = arith.cmpi ne, %1, %c0_i32_0 : i32
    scf.if %2 {
      %cst_21 = arith.constant 0.000000e+00 : f32
      %30 = vector.broadcast %cst_21 : f32 to vector<1x512xf32>
      %c0_22 = arith.constant 0 : index
      %c0_23 = arith.constant 0 : index
      %31 = vector.load %arg10[%c0_22, %c0_23] : memref<1x512xf32, #tpu.memory_space<vmem>>, vector<1x512xf32>
      tpu.vector_store %arg10[%c0_22, %c0_23], %30 {strides = array<i32>} : memref<1x512xf32, #tpu.memory_space<vmem>>, vector<1x512xf32>,
      %cst_24 = arith.constant 0.000000e+00 : f32
      %32 = vector.broadcast %cst_24 : f32 to vector<1x512xf32>
      %c0_25 = arith.constant 0 : index
      %c0_26 = arith.constant 0 : index
      %33 = vector.load %arg11[%c0_25, %c0_26] : memref<1x512xf32, #tpu.memory_space<vmem>>, vector<1x512xf32>
      tpu.vector_store %arg11[%c0_25, %c0_26], %32 {strides = array<i32>} : memref<1x512xf32, #tpu.memory_space<vmem>>, vector<1x512xf32>,
    } else {
    }
    %c0 = arith.constant 0 : index
    %c0_1 = arith.constant 0 : index
    %c0_2 = arith.constant 0 : index
    %3 = vector.load %arg1[%c0, %c0_1, %c0_2] : memref<8x256x64xf32, #tpu.memory_space<vmem>>, vector<8x256x64xf32>
    %cst = arith.constant dense<0.000000e+00> : vector<8x256xf32>
    %4 = vector.multi_reduction <add>, %3, %cst [2] : vector<8x256x64xf32> to vector<8x256xf32>
    %cst_3 = arith.constant 1.562500e-02 : f32
    %5 = vector.broadcast %cst_3 : f32 to vector<8x256xf32>
    %6 = arith.mulf %4, %5 : vector<8x256xf32>
    %c0_4 = arith.constant 0 : index
    %c0_5 = arith.constant 0 : index
    %7 = vector.load %arg2[%c0_4, %c0_5] : memref<256x512xf32, #tpu.memory_space<vmem>>, vector<256x512xf32>
    %cst_6 = arith.constant dense<0.000000e+00> : vector<8x512xf32>
    %8 = tpu.matmul %6, %7, %cst_6 {dimension_numbers = #tpu.dot_dimension_numbers<[1], [0], [0], [1], [0, 0, 1, 1], [], []>} : vector<8x256xf32>, vector<256x512xf32>, vector<8x512xf32> -> vector<8x512xf32>
    %c0_7 = arith.constant 0 : index
    %c0_8 = arith.constant 0 : index
    %9 = vector.load %arg3[%c0_7, %c0_8] : memref<1x512xf32, #tpu.memory_space<vmem>>, vector<1x512xf32>
    %10 = vector.broadcast %9 : vector<1x512xf32> to vector<8x512xf32>
    %11 = arith.addf %8, %10 : vector<8x512xf32>
    %c8_i32 = arith.constant 8 : i32
    %12 = arith.muli %arg0, %c8_i32 : i32
    %13 = tpu.assume_multiple %12, 8 : i32
    %14 = arith.index_cast %13 : i32 to index
    %c0_9 = arith.constant 0 : index
    %15 = vector.load %arg9[%14, %c0_9] : memref<16x512xf32, #tpu.memory_space<vmem>>, vector<8x512xf32>
    tpu.vector_store %arg9[%14, %c0_9], %11 {strides = array<i32>} : memref<16x512xf32, #tpu.memory_space<vmem>>, vector<8x512xf32>,
    %c0_10 = arith.constant 0 : index
    %c0_11 = arith.constant 0 : index
    %16 = vector.load %arg10[%c0_10, %c0_11] : memref<1x512xf32, #tpu.memory_space<vmem>>, vector<1x512xf32>
    %cst_12 = arith.constant dense<0.000000e+00> : vector<512xf32>
    %17 = vector.multi_reduction <add>, %11, %cst_12 [0] : vector<8x512xf32> to vector<512xf32>
    %18 = vector.shape_cast %17 : vector<512xf32> to vector<1x512xf32>
    %19 = arith.addf %16, %18 : vector<1x512xf32>
    %c0_13 = arith.constant 0 : index
    %c0_14 = arith.constant 0 : index
    %20 = vector.load %arg10[%c0_13, %c0_14] : memref<1x512xf32, #tpu.memory_space<vmem>>, vector<1x512xf32>
    tpu.vector_store %arg10[%c0_13, %c0_14], %19 {strides = array<i32>} : memref<1x512xf32, #tpu.memory_space<vmem>>, vector<1x512xf32>,
    %c0_15 = arith.constant 0 : index
    %c0_16 = arith.constant 0 : index
    %21 = vector.load %arg11[%c0_15, %c0_16] : memref<1x512xf32, #tpu.memory_space<vmem>>, vector<1x512xf32>
    %22 = arith.mulf %11, %11 : vector<8x512xf32>
    %cst_17 = arith.constant dense<0.000000e+00> : vector<512xf32>
    %23 = vector.multi_reduction <add>, %22, %cst_17 [0] : vector<8x512xf32> to vector<512xf32>
    %24 = vector.shape_cast %23 : vector<512xf32> to vector<1x512xf32>
    %25 = arith.addf %21, %24 : vector<1x512xf32>
    %c0_18 = arith.constant 0 : index
    %c0_19 = arith.constant 0 : index
    %26 = vector.load %arg11[%c0_18, %c0_19] : memref<1x512xf32, #tpu.memory_space<vmem>>, vector<1x512xf32>
    tpu.vector_store %arg11[%c0_18, %c0_19], %25 {strides = array<i32>} : memref<1x512xf32, #tpu.memory_space<vmem>>, vector<1x512xf32>,
    %c1_i32 = arith.constant 1 : i32
    %27 = arith.cmpi eq, %arg0, %c1_i32 : i32
    %28 = arith.extui %27 : i1 to i32
    %c0_i32_20 = arith.constant 0 : i32
    %29 = arith.cmpi ne, %28, %c0_i32_20 : i32
    scf.if %29 {
      %c0_21 = arith.constant 0 : index
      %c0_22 = arith.constant 0 : index
      %30 = vector.load %arg10[%c0_21, %c0_22] : memref<1x512xf32, #tpu.memory_space<vmem>>, vector<1x512xf32>
      %cst_23 = arith.constant 6.250000e-02 : f32
      %31 = vector.broadcast %cst_23 : f32 to vector<1x512xf32>
      %32 = arith.mulf %30, %31 : vector<1x512xf32>
      %c0_24 = arith.constant 0 : index
      %c0_25 = arith.constant 0 : index
      %33 = vector.load %arg11[%c0_24, %c0_25] : memref<1x512xf32, #tpu.memory_space<vmem>>, vector<1x512xf32>
      %cst_26 = arith.constant 6.250000e-02 : f32
      %34 = vector.broadcast %cst_26 : f32 to vector<1x512xf32>
      %35 = arith.mulf %33, %34 : vector<1x512xf32>
      %36 = arith.mulf %32, %32 : vector<1x512xf32>
      %37 = arith.subf %35, %36 : vector<1x512xf32>
      %c0_27 = arith.constant 0 : index
      %c0_28 = arith.constant 0 : index
      %38 = vector.load %arg4[%c0_27, %c0_28] : memref<1x512xf32, #tpu.memory_space<vmem>>, vector<1x512xf32>
      %cst_29 = arith.constant 9.99999974E-6 : f32
      %39 = vector.broadcast %cst_29 : f32 to vector<1x512xf32>
      %40 = arith.addf %37, %39 : vector<1x512xf32>
      %41 = math.rsqrt %40 : vector<1x512xf32>
      %42 = arith.mulf %38, %41 : vector<1x512xf32>
      %c0_30 = arith.constant 0 : index
      %c0_31 = arith.constant 0 : index
      %43 = vector.load %arg5[%c0_30, %c0_31] : memref<1x512xf32, #tpu.memory_space<vmem>>, vector<1x512xf32>
      %44 = arith.mulf %32, %42 : vector<1x512xf32>
      %45 = arith.subf %43, %44 : vector<1x512xf32>
      %c0_32 = arith.constant 0 : index
      %c0_33 = arith.constant 0 : index
      %46 = vector.load %arg9[%c0_32, %c0_33] : memref<16x512xf32, #tpu.memory_space<vmem>>, vector<16x512xf32>
      %47 = vector.broadcast %42 : vector<1x512xf32> to vector<16x512xf32>
      %48 = arith.mulf %46, %47 : vector<16x512xf32>
      %49 = vector.broadcast %45 : vector<1x512xf32> to vector<16x512xf32>
      %50 = arith.addf %48, %49 : vector<16x512xf32>
      %cst_34 = arith.constant 0.000000e+00 : f32
      %51 = vector.broadcast %cst_34 : f32 to vector<16x512xf32>
      %52 = arith.maximumf %50, %51 : vector<16x512xf32>
      %c0_35 = arith.constant 0 : index
      %c0_36 = arith.constant 0 : index
      %53 = vector.load %arg6[%c0_35, %c0_36] : memref<512x128xf32, #tpu.memory_space<vmem>>, vector<512x128xf32>
      %cst_37 = arith.constant dense<0.000000e+00> : vector<16x128xf32>
      %54 = tpu.matmul %52, %53, %cst_37 {dimension_numbers = #tpu.dot_dimension_numbers<[1], [0], [0], [1], [0, 0, 1, 1], [], []>} : vector<16x512xf32>, vector<512x128xf32>, vector<16x128xf32> -> vector<16x128xf32>
      %c0_38 = arith.constant 0 : index
      %c0_39 = arith.constant 0 : index
      %55 = vector.load %arg7[%c0_38, %c0_39] : memref<1x128xf32, #tpu.memory_space<vmem>>, vector<1x128xf32>
      %56 = vector.broadcast %55 : vector<1x128xf32> to vector<16x128xf32>
      %57 = arith.addf %54, %56 : vector<16x128xf32>
      %c0_40 = arith.constant 0 : index
      %c0_41 = arith.constant 0 : index
      %58 = vector.load %arg8[%c0_40, %c0_41] : memref<16x128xf32, #tpu.memory_space<vmem>>, vector<16x128xf32>
      tpu.vector_store %arg8[%c0_40, %c0_41], %57 {strides = array<i32>} : memref<16x128xf32, #tpu.memory_space<vmem>>, vector<16x128xf32>,
    } else {
    }
    return
  }
  func.func @transform_0(%arg0: i32) -> (i32, i32, i32) {
    %c0_i32 = arith.constant 0 : i32
    %c0_i32_0 = arith.constant 0 : i32
    %c0_i32_1 = arith.constant 0 : i32
    return %arg0, %c0_i32, %c0_i32_0 : i32, i32, i32
  }
  func.func @transform_1(%arg0: i32) -> (i32, i32) {
    %c0_i32 = arith.constant 0 : i32
    %c0_i32_0 = arith.constant 0 : i32
    %c0_i32_1 = arith.constant 0 : i32
    return %c0_i32, %c0_i32_0 : i32, i32
  }
  func.func @transform_2(%arg0: i32) -> (i32, i32) {
    %c0_i32 = arith.constant 0 : i32
    %c0_i32_0 = arith.constant 0 : i32
    %c0_i32_1 = arith.constant 0 : i32
    return %c0_i32, %c0_i32_0 : i32, i32
  }
  func.func @transform_3(%arg0: i32) -> (i32, i32) {
    %c0_i32 = arith.constant 0 : i32
    %c0_i32_0 = arith.constant 0 : i32
    %c0_i32_1 = arith.constant 0 : i32
    return %c0_i32, %c0_i32_0 : i32, i32
  }
  func.func @transform_4(%arg0: i32) -> (i32, i32) {
    %c0_i32 = arith.constant 0 : i32
    %c0_i32_0 = arith.constant 0 : i32
    %c0_i32_1 = arith.constant 0 : i32
    return %c0_i32, %c0_i32_0 : i32, i32
  }
  func.func @transform_5(%arg0: i32) -> (i32, i32) {
    %c0_i32 = arith.constant 0 : i32
    %c0_i32_0 = arith.constant 0 : i32
    %c0_i32_1 = arith.constant 0 : i32
    return %c0_i32, %c0_i32_0 : i32, i32
  }
  func.func @transform_6(%arg0: i32) -> (i32, i32) {
    %c0_i32 = arith.constant 0 : i32
    %c0_i32_0 = arith.constant 0 : i32
    %c0_i32_1 = arith.constant 0 : i32
    return %c0_i32, %c0_i32_0 : i32, i32
  }
  func.func @transform_7(%arg0: i32) -> (i32, i32) {
    %c0_i32 = arith.constant 0 : i32
    %c0_i32_0 = arith.constant 0 : i32
    %c0_i32_1 = arith.constant 0 : i32
    return %c0_i32, %c0_i32_0 : i32, i32
  }
}

</mosaic_0001>

<bundles_post_ra>
// kernel: tpu_custom_call.1
= control target key start
LH: loop header
LB: loop body
LE: loop exit
PB: predicated region body
PF: predicated region fallthrough
CT: control target
= control target key end

     0   :  { %12 = vsyncpa [#allocation6], 0  ;;  %s4119_s24 = smov 0   ;;  %s6146_s0 = inlined_call_operand.vmem [shape: f32[16,256,64], index: 0, kind: input, shape index: {}]   ;;  %s6147_s1 = inlined_call_operand.vmem [shape: f32[256,512], index: 1, kind: input, shape index: {}]   ;;  %s6148_s2 = inlined_call_operand.vmem [shape: f32[1,512], index: 2, kind: input, shape index: {}]   ;;  %s6149_s3 = inlined_call_operand.vmem [shape: f32[1,512], index: 3, kind: input, shape index: {}]   ;;  %s6150_s4 = inlined_call_operand.vmem [shape: f32[1,512], index: 4, kind: input, shape index: {}]   ;;  %s6151_s5 = inlined_call_operand.vmem [shape: f32[512,128], index: 5, kind: input, shape index: {}]   ;;  %s6152_s6 = inlined_call_operand.vmem [shape: f32[1,128], index: 6, kind: input, shape index: {}]   ;;  %s6153_s7 = inlined_call_operand.hbm [shape: f32[16,128], index: 7, kind: output, shape index: {}]  }
   0x1 LB: > { %s4125_s25 = sadd.s32 4294967295, %s4072_s24   ;;  %p3925_p0 = scmp.ge.s32.totalorder %s4072_s24, 1  ;;  %s4072_s24 = sphi %s4119_s24, %s18_s24  }
   0x2   : > { %p235_p1 = scmp.lt.s32.totalorder %s4072_s24, 3 }
   0x4   : > { %p236_p2 = pnand %p3925_p0, %p235_p1 }
   0x5   : > { %s4130_s26 = sshll.u32 (!%p236_p2), %s4125_s25, 3  ;;  %p3929_p4 = scmp.ne.s32.totalorder (!%p236_p2), %s4125_s25, 0 }
   0x6   : > { %239 = sbr.rel (%p236_p2) target bundleno = 1173 (0x495), region = 48  ;;  %p264_p3 = scmp.lt.s32.totalorder (!%p236_p2), %s4130_s26, 15 }
   0xb   : > { %s265_s27 = scalar_select %p264_p3, %s4130_s26, 15 }
   0xc   : > { %273 = sbr.rel (%p3929_p4) target bundleno = 21 (0x15), region = 52 }
   0xd   : > { %s3939_s28 = sshll.u32 %s265_s27, 8 }
   0xe   : > { %s4137_s8 = scalar_lea.vmem %s6146_s0, %s3939_s28 }
  0x11   : > { %v274_v0 = vlaneseq  ;;  %v4074_v1 = vmov 0.0  }
  0x13   : > { %vm276_vm0 = vcmp.lt.s32.totalorder %v274_v0, 512 }
  0x14   : > { %278 = vst.msk [vmem:[#allocation3] sm:$0xf] %vm276_vm0, %v4074_v1  ;;  %279 = vst.msk [vmem:[#allocation4] sm:$0xf] %vm276_vm0, %v4074_v1 }
  0x15 PF: > { %v282_v2 = vld [vmem:[%s4137_s8 + $0x10] sm:$0xff]  ;;  %vm536_vm1 = vcmask 523264   ;;  %v280_v3 = vld [vmem:[%s4137_s8] sm:$0xff]  ;;  %v283_v4 = vld [vmem:[%s4137_s8 + $0x18] sm:$0xff]  ;;  %vm1978_vm2 = vcmask 130112   ;;  %vm1985_vm3 = vcmask 195712  }
  0x16   : > { %v543_v5 = vsel %vm536_vm1, %v282_v2, 0.0  ;;  %v537_v6 = vsel %vm536_vm1, %v280_v3, 0.0  ;;  %v281_v7 = vld [vmem:[%s4137_s8 + $0x8] sm:$0xff]  ;;  %v546_v8 = vsel %vm536_vm1, %v283_v4, 0.0  ;;  %v284_v11 = vld [vmem:[%s4137_s8 + $0x20] sm:$0xff]  ;;  %v287_v14 = vld [vmem:[%s4137_s8 + $0x38] sm:$0xff] }
  0x17   : > { %544 = vadd.xlane.f32.xlu1 %v543_v5  ;;  %538 = vadd.xlane.f32.xlu0 %v537_v6  ;;  %v540_v9 = vsel %vm536_vm1, %v281_v7, 0.0  ;;  %v285_v10 = vld [vmem:[%s4137_s8 + $0x28] sm:$0xff]  ;;  %v549_v13 = vsel %vm536_vm1, %v284_v11, 0.0  ;;  %v286_v15 = vld [vmem:[%s4137_s8 + $0x30] sm:$0xff]  ;;  %v558_v16 = vsel %vm536_vm1, %v287_v14, 0.0  ;;  %v288_v19 = vld [vmem:[%s4137_s8 + $0x40] sm:$0xff] }
  0x18   : > { %v552_v12 = vsel %vm536_vm1, %v285_v10, 0.0  ;;  %v555_v17 = vsel %vm536_vm1, %v286_v15, 0.0  ;;  %v289_v18 = vld [vmem:[%s4137_s8 + $0x48] sm:$0xff]  ;;  %v561_v21 = vsel %vm536_vm1, %v288_v19, 0.0  ;;  %v291_v22 = vld [vmem:[%s4137_s8 + $0x58] sm:$0xff]  ;;  %v290_v23 = vld [vmem:[%s4137_s8 + $0x50] sm:$0xff] }
  0x19   : > { %v564_v20 = vsel %vm536_vm1, %v289_v18, 0.0  ;;  %v570_v24 = vsel %vm536_vm1, %v291_v22, 0.0  ;;  %v567_v25 = vsel %vm536_vm1, %v290_v23, 0.0  ;;  %v293_v26 = vld [vmem:[%s4137_s8 + $0x68] sm:$0xff]  ;;  %v292_v27 = vld [vmem:[%s4137_s8 + $0x60] sm:$0xff]  ;;  %v295_v30 = vld [vmem:[%s4137_s8 + $0x78] sm:$0xff] }
  0x1a   : > { %v576_v28 = vsel %vm536_vm1, %v293_v26, 0.0  ;;  %v573_v29 = vsel %vm536_vm1, %v292_v27, 0.0  ;;  %v294_v31 = vld [vmem:[%s4137_s8 + $0x70] sm:$0xff]  ;;  %v582_v32 = vsel %vm536_vm1, %v295_v30, 0.0  ;;  %v297_v34 = vld [vmem:[%s4137_s8 + $0x88] sm:$0xff]  ;;  %v296_v35 = vld [vmem:[%s4137_s8 + $0x80] sm:$0xff] }
  0x1b   : > { %547 = vadd.xlane.f32.xlu1 %v546_v8  ;;  %541 = vadd.xlane.f32.xlu0 %v540_v9  ;;  %v579_v33 = vsel %vm536_vm1, %v294_v31, 0.0  ;;  %v588_v36 = vsel %vm536_vm1, %v297_v34, 0.0  ;;  %v585_v37 = vsel %vm536_vm1, %v296_v35, 0.0  ;;  %v299_v38 = vld [vmem:[%s4137_s8 + $0x98] sm:$0xff]  ;;  %v298_v39 = vld [vmem:[%s4137_s8 + $0x90] sm:$0xff]  ;;  %v301_v42 = vld [vmem:[%s4137_s8 + $0xa8] sm:$0xff] }
  0x1c   : > { %v594_v40 = vsel %vm536_vm1, %v299_v38, 0.0  ;;  %v591_v41 = vsel %vm536_vm1, %v298_v39, 0.0  ;;  %v300_v43 = vld [vmem:[%s4137_s8 + $0xa0] sm:$0xff]  ;;  %v600_v44 = vsel %vm536_vm1, %v301_v42, 0.0  ;;  %v303_v46 = vld [vmem:[%s4137_s8 + $0xb8] sm:$0xff]  ;;  %v302_v47 = vld [vmem:[%s4137_s8 + $0xb0] sm:$0xff] }
  0x1d   : > { %v597_v45 = vsel %vm536_vm1, %v300_v43, 0.0  ;;  %v606_v48 = vsel %vm536_vm1, %v303_v46, 0.0  ;;  %v603_v49 = vsel %vm536_vm1, %v302_v47, 0.0  ;;  %v305_v50 = vld [vmem:[%s4137_s8 + $0xc8] sm:$0xff]  ;;  %v304_v51 = vld [vmem:[%s4137_s8 + $0xc0] sm:$0xff]  ;;  %v307_v54 = vld [vmem:[%s4137_s8 + $0xd8] sm:$0xff] }
  0x1e   : > { %v612_v52 = vsel %vm536_vm1, %v305_v50, 0.0  ;;  %v609_v53 = vsel %vm536_vm1, %v304_v51, 0.0  ;;  %v306_v55 = vld [vmem:[%s4137_s8 + $0xd0] sm:$0xff]  ;;  %v618_v56 = vsel %vm536_vm1, %v307_v54, 0.0  ;;  %v309_v58 = vld [vmem:[%s4137_s8 + $0xe8] sm:$0xff]  ;;  %v308_v59 = vld [vmem:[%s4137_s8 + $0xe0] sm:$0xff] }
  0x1f   : > { %553 = vadd.xlane.f32.xlu1 %v552_v12  ;;  %550 = vadd.xlane.f32.xlu0 %v549_v13  ;;  %v615_v57 = vsel %vm536_vm1, %v306_v55, 0.0  ;;  %v624_v60 = vsel %vm536_vm1, %v309_v58, 0.0  ;;  %v621_v61 = vsel %vm536_vm1, %v308_v59, 0.0  ;;  %v311_v62 = vld [vmem:[%s4137_s8 + $0xf8] sm:$0xff]  ;;  %v310_v63 = vld [vmem:[%s4137_s8 + $0xf0] sm:$0xff]  ;;  %v313_v2 = vld [vmem:[%s4137_s8 + $0x108] sm:$0xff] }
  0x20   : > { %v630_v0 = vsel %vm536_vm1, %v311_v62, 0.0  ;;  %v627_v1 = vsel %vm536_vm1, %v310_v63, 0.0  ;;  %v312_v3 = vld [vmem:[%s4137_s8 + $0x100] sm:$0xff]  ;;  %v636_v4 = vsel %vm536_vm1, %v313_v2, 0.0  ;;  %v315_v6 = vld [vmem:[%s4137_s8 + $0x118] sm:$0xff]  ;;  %v314_v7 = vld [vmem:[%s4137_s8 + $0x110] sm:$0xff] }
  0x21   : > { %v633_v5 = vsel %vm536_vm1, %v312_v3, 0.0  ;;  %v642_v8 = vsel %vm536_vm1, %v315_v6, 0.0  ;;  %v639_v9 = vsel %vm536_vm1, %v314_v7, 0.0  ;;  %v317_v10 = vld [vmem:[%s4137_s8 + $0x128] sm:$0xff]  ;;  %v316_v11 = vld [vmem:[%s4137_s8 + $0x120] sm:$0xff]  ;;  %v319_v14 = vld [vmem:[%s4137_s8 + $0x138] sm:$0xff] }
  0x22   : > { %v648_v12 = vsel %vm536_vm1, %v317_v10, 0.0  ;;  %v645_v13 = vsel %vm536_vm1, %v316_v11, 0.0  ;;  %v318_v15 = vld [vmem:[%s4137_s8 + $0x130] sm:$0xff]  ;;  %v321_v18 = vld [vmem:[%s4137_s8 + $0x148] sm:$0xff]  ;;  %v320_v19 = vld [vmem:[%s4137_s8 + $0x140] sm:$0xff]  ;;  %v1691_v10 = vlaneseq  ;;  %vm1992_vm4 = vcmask 261312  }
  0x23   : > { %559 = vadd.xlane.f32.xlu1 %v558_v16  ;;  %556 = vadd.xlane.f32.xlu0 %v555_v17  ;;  %v654_v16 = vsel %vm536_vm1, %v319_v14, 0.0  ;;  %v651_v17 = vsel %vm536_vm1, %v318_v15, 0.0  ;;  %v323_v22 = vld [vmem:[%s4137_s8 + $0x158] sm:$0xff]  ;;  %v322_v23 = vld [vmem:[%s4137_s8 + $0x150] sm:$0xff]  ;;  %v325_v26 = vld [vmem:[%s4137_s8 + $0x168] sm:$0xff]  ;;  %vm1999_vm5 = vcmask 326912  }
  0x24   : > { %v324_v27 = vld [vmem:[%s4137_s8 + $0x160] sm:$0xff]  ;;  %v327_v30 = vld [vmem:[%s4137_s8 + $0x178] sm:$0xff]  ;;  %v326_v31 = vld [vmem:[%s4137_s8 + $0x170] sm:$0xff]  ;;  %v4281_v15 = vand.u32 127, %v1691_v10  ;;  %vm2006_vm6 = vcmask 392512   ;;  %vm2013_vm7 = vcmask 458112  }
  0x25   : > { %v329_v34 = vld [vmem:[%s4137_s8 + $0x188] sm:$0xff]  ;;  %v328_v35 = vld [vmem:[%s4137_s8 + $0x180] sm:$0xff]  ;;  %v331_v38 = vld [vmem:[%s4137_s8 + $0x198] sm:$0xff]  ;;  %vm2020_vm8 = vcmask 523712   ;;  %vm2027_vm9 = vcmask 589312   ;;  %vm6155_vm10 = vcmask 654912  }
  0x26   : > { %v330_v39 = vld [vmem:[%s4137_s8 + $0x190] sm:$0xff]  ;;  %v333_v42 = vld [vmem:[%s4137_s8 + $0x1a8] sm:$0xff]  ;;  %v332_v43 = vld [vmem:[%s4137_s8 + $0x1a0] sm:$0xff]  ;;  %vm2041_vm11 = vcmask 720512   ;;  %vm6154_vm12 = vcmask 786112   ;;  %vm2055_vm13 = vcmask 851712  }
  0x27   : > { %565 = vadd.xlane.f32.xlu1 %v564_v20  ;;  %562 = vadd.xlane.f32.xlu0 %v561_v21  ;;  %v660_v20 = vsel %vm536_vm1, %v321_v18, 0.0  ;;  %v657_v21 = vsel %vm536_vm1, %v320_v19, 0.0  ;;  %v335_v46 = vld [vmem:[%s4137_s8 + $0x1b8] sm:$0xff]  ;;  %v334_v47 = vld [vmem:[%s4137_s8 + $0x1b0] sm:$0xff]  ;;  %v337_v50 = vld [vmem:[%s4137_s8 + $0x1c8] sm:$0xff]  ;;  %v4286_v18 = vshrl.u32 %v1691_v10, 7 }
  0x28   : > { %v336_v51 = vld [vmem:[%s4137_s8 + $0x1c0] sm:$0xff]  ;;  %v339_v54 = vld [vmem:[%s4137_s8 + $0x1d8] sm:$0xff]  ;;  %v338_v55 = vld [vmem:[%s4137_s8 + $0x1d0] sm:$0xff]  ;;  %v1987_v19 = vadd.s32 4294967272, %v4281_v15  ;;  %vm2062_vm14 = vcmask 917312   ;;  %vm2069_vm15 = vcmask 982912  }
  0x29   : > { %v341_v58 = vld [vmem:[%s4137_s8 + $0x1e8] sm:$0xff]  ;;  %v340_v59 = vld [vmem:[%s4137_s8 + $0x1e0] sm:$0xff]  ;;  %v343_v62 = vld [vmem:[%s4137_s8 + $0x1f8] sm:$0xff]  ;;  %vm2076_vm0 = vcmask 1048512   ;;  %s3429_s14 = sshra.s32 %s4130_s26, 3  ;;  %p3933_p5 = scmp.ne.s32.totalorder %s4125_s25, 1 }
  0x2a   : > { %v342_v63 = vld [vmem:[%s4137_s8 + $0x1f0] sm:$0xff]  ;;  %v345_v2 = vld [vmem:[%s4137_s8 + $0x208] sm:$0xff]  ;;  %v344_v3 = vld [vmem:[%s4137_s8 + $0x200] sm:$0xff]  ;;  %s3940_s15 = sshll.u32 %s3429_s14, 5 }
  0x2b   : > { %571 = vadd.xlane.f32.xlu1 %v570_v24  ;;  %568 = vadd.xlane.f32.xlu0 %v567_v25  ;;  %v666_v24 = vsel %vm536_vm1, %v323_v22, 0.0  ;;  %v663_v25 = vsel %vm536_vm1, %v322_v23, 0.0  ;;  %v347_v6 = vld [vmem:[%s4137_s8 + $0x218] sm:$0xff]  ;;  %v346_v7 = vld [vmem:[%s4137_s8 + $0x210] sm:$0xff]  ;;  %v349_v11 = vld [vmem:[%s4137_s8 + $0x228] sm:$0xff]  ;;  %s3433_s26 = scalar_lea.vmem [#allocation2], %s3940_s15 }
  0x2f   : > { %577 = vadd.xlane.f32.xlu1 %v576_v28  ;;  %574 = vadd.xlane.f32.xlu0 %v573_v29  ;;  %v672_v28 = vsel %vm536_vm1, %v325_v26, 0.0  ;;  %v669_v29 = vsel %vm536_vm1, %v324_v27, 0.0  ;;  %v353_v26 = vld [vmem:[%s4137_s8 + $0x248] sm:$0xff]  ;;  %v352_v27 = vld [vmem:[%s4137_s8 + $0x240] sm:$0xff] }
  0x33   : > { %583 = vadd.xlane.f32.xlu1 %v582_v32  ;;  %580 = vadd.xlane.f32.xlu0 %v579_v33  ;;  %v678_v32 = vsel %vm536_vm1, %v327_v30, 0.0  ;;  %v675_v33 = vsel %vm536_vm1, %v326_v31, 0.0  ;;  %v4299_v30 = vsub.s32 %v4281_v15, %v4286_v18 }
  0x37   : > { %589 = vadd.xlane.f32.xlu1 %v588_v36  ;;  %586 = vadd.xlane.f32.xlu0 %v585_v37  ;;  %v684_v36 = vsel %vm536_vm1, %v329_v34, 0.0  ;;  %v681_v37 = vsel %vm536_vm1, %v328_v35, 0.0 }
  0x3b   : > { %595 = vadd.xlane.f32.xlu1 %v594_v40  ;;  %592 = vadd.xlane.f32.xlu0 %v591_v41  ;;  %v690_v40 = vsel %vm536_vm1, %v331_v38, 0.0  ;;  %v687_v41 = vsel %vm536_vm1, %v330_v39, 0.0  ;;  %v756_v38 = vsel %vm536_vm1, %v353_v26, 0.0  ;;  %v753_v39 = vsel %vm536_vm1, %v352_v27, 0.0 }
  0x3f   : > { %601 = vadd.xlane.f32.xlu1 %v600_v44  ;;  %598 = vadd.xlane.f32.xlu0 %v597_v45  ;;  %v696_v44 = vsel %vm536_vm1, %v333_v42, 0.0  ;;  %v693_v45 = vsel %vm536_vm1, %v332_v43, 0.0  ;;  %v355_v42 = vld [vmem:[%s4137_s8 + $0x258] sm:$0xff]  ;;  %v354_v43 = vld [vmem:[%s4137_s8 + $0x250] sm:$0xff] }
  0x43   : > { %607 = vadd.xlane.f32.xlu1 %v606_v48  ;;  %604 = vadd.xlane.f32.xlu0 %v603_v49  ;;  %v702_v48 = vsel %vm536_vm1, %v335_v46, 0.0  ;;  %v699_v49 = vsel %vm536_vm1, %v334_v47, 0.0  ;;  %v2015_v46 = vadd.s32 4294967240, %v4281_v15  ;;  %v2008_v47 = vadd.s32 4294967248, %v4281_v15 }
  0x47   : > { %613 = vadd.xlane.f32.xlu1 %v612_v52  ;;  %610 = vadd.xlane.f32.xlu0 %v609_v53  ;;  %v708_v52 = vsel %vm536_vm1, %v337_v50, 0.0  ;;  %v705_v53 = vsel %vm536_vm1, %v336_v51, 0.0 }
  0x4b   : > { %619 = vadd.xlane.f32.xlu1 %v618_v56  ;;  %616 = vadd.xlane.f32.xlu0 %v615_v57  ;;  %v714_v56 = vsel %vm536_vm1, %v339_v54, 0.0  ;;  %v711_v57 = vsel %vm536_vm1, %v338_v55, 0.0  ;;  %v762_v54 = vsel %vm536_vm1, %v355_v42, 0.0  ;;  %v759_v55 = vsel %vm536_vm1, %v354_v43, 0.0 }
  0x4c   : > { %v2050_v43 = vadd.s32 4294967200, %v4281_v15 }
  0x4f   : > { %625 = vadd.xlane.f32.xlu1 %v624_v60  ;;  %622 = vadd.xlane.f32.xlu0 %v621_v61  ;;  %v720_v60 = vsel %vm536_vm1, %v341_v58, 0.0  ;;  %v717_v61 = vsel %vm536_vm1, %v340_v59, 0.0  ;;  %v357_v59 = vld [vmem:[%s4137_s8 + $0x268] sm:$0xff] }
  0x53   : > { %631 = vadd.xlane.f32.xlu1 %v630_v0  ;;  %628 = vadd.xlane.f32.xlu0 %v627_v1  ;;  %v726_v0 = vsel %vm536_vm1, %v343_v62, 0.0  ;;  %v723_v1 = vsel %vm536_vm1, %v342_v63, 0.0  ;;  %v4333_v62 = vsub.s32 %v2015_v46, %v4286_v18  ;;  %v4336_v63 = vsub.s32 %v2008_v47, %v4286_v18 }
  0x57   : > { %637 = vadd.xlane.f32.xlu1 %v636_v4  ;;  %634 = vadd.xlane.f32.xlu0 %v633_v5  ;;  %v732_v4 = vsel %vm536_vm1, %v345_v2, 0.0  ;;  %v729_v5 = vsel %vm536_vm1, %v344_v3, 0.0 }
  0x5b   : > { %643 = vadd.xlane.f32.xlu1 %v642_v8  ;;  %640 = vadd.xlane.f32.xlu0 %v639_v9  ;;  %v738_v8 = vsel %vm536_vm1, %v347_v6, 0.0  ;;  %v735_v9 = vsel %vm536_vm1, %v346_v7, 0.0  ;;  %v768_v7 = vsel %vm536_vm1, %v357_v59, 0.0 }
  0x5f   : > { %649 = vadd.xlane.f32.xlu1 %v648_v12  ;;  %646 = vadd.xlane.f32.xlu0 %v645_v13  ;;  %v348_v12 = vld [vmem:[%s4137_s8 + $0x220] sm:$0xff]  ;;  %v744_v13 = vsel %vm536_vm1, %v349_v11, 0.0 }
  0x60   : > { %v741_v14 = vsel %vm536_vm1, %v348_v12, 0.0 }
  0x63   : > { %655 = vadd.xlane.f32.xlu1 %v654_v16  ;;  %652 = vadd.xlane.f32.xlu0 %v651_v17  ;;  %v351_v16 = vld [vmem:[%s4137_s8 + $0x238] sm:$0xff]  ;;  %v350_v17 = vld [vmem:[%s4137_s8 + $0x230] sm:$0xff] }
  0x67   : > { %661 = vadd.xlane.f32.xlu1 %v660_v20  ;;  %658 = vadd.xlane.f32.xlu0 %v657_v21  ;;  %v1973_v20 = vadd.s32 4294967288, %v4281_v15  ;;  %v1980_v21 = vadd.s32 4294967280, %v4281_v15 }
  0x69   : > { %v4308_v34 = vsub.s32 %v1980_v21, %v4286_v18 }
  0x6b   : > { %667 = vadd.xlane.f32.xlu1 %v666_v24  ;;  %664 = vadd.xlane.f32.xlu0 %v663_v25  ;;  %v750_v24 = vsel %vm536_vm1, %v351_v16, 0.0  ;;  %v747_v25 = vsel %vm536_vm1, %v350_v17, 0.0 }
  0x6f   : > { %673 = vadd.xlane.f32.xlu1 %v672_v28  ;;  %670 = vadd.xlane.f32.xlu0 %v669_v29  ;;  %v2001_v28 = vadd.s32 4294967256, %v4281_v15  ;;  %v1994_v29 = vadd.s32 4294967264, %v4281_v15 }
  0x73   : > { %679 = vadd.xlane.f32.xlu1 %v678_v32  ;;  %676 = vadd.xlane.f32.xlu0 %v675_v33  ;;  %v4302_v32 = vsub.s32 %v1987_v19, %v4286_v18  ;;  %v4305_v33 = vsub.s32 %v1973_v20, %v4286_v18  ;;  %v2043_v19 = vadd.s32 4294967208, %v4281_v15 }
  0x77   : > { %685 = vadd.xlane.f32.xlu1 %v684_v36  ;;  %682 = vadd.xlane.f32.xlu0 %v681_v37 }
  0x7b   : > { %691 = vadd.xlane.f32.xlu1 %v690_v40  ;;  %688 = vadd.xlane.f32.xlu0 %v687_v41 }
  0x7f   : > { %697 = vadd.xlane.f32.xlu1 %v696_v44  ;;  %694 = vadd.xlane.f32.xlu0 %v693_v45  ;;  %v4315_v44 = vsub.s32 %v2001_v28, %v4286_v18  ;;  %v4318_v45 = vsub.s32 %v1994_v29, %v4286_v18 }
  0x83   : > { %703 = vadd.xlane.f32.xlu1 %v702_v48  ;;  %700 = vadd.xlane.f32.xlu0 %v699_v49 }
  0x87   : > { %709 = vadd.xlane.f32.xlu1 %v708_v52  ;;  %706 = vadd.xlane.f32.xlu0 %v705_v53 }
  0x8b   : > { %715 = vadd.xlane.f32.xlu1 %v714_v56  ;;  %712 = vadd.xlane.f32.xlu0 %v711_v57 }
  0x8f   : > { %721 = vadd.xlane.f32.xlu1 %v720_v60  ;;  %718 = vadd.xlane.f32.xlu0 %v717_v61  ;;  %v356_v60 = vld [vmem:[%s4137_s8 + $0x260] sm:$0xff] }
  0x93   : > { %727 = vadd.xlane.f32.xlu1 %v726_v0  ;;  %724 = vadd.xlane.f32.xlu0 %v723_v1  ;;  %v2029_v0 = vadd.s32 4294967224, %v4281_v15 }
  0x95   : > { %v4350_v17 = vsub.s32 %v2029_v0, %v4286_v18 }
  0x97   : > { %733 = vadd.xlane.f32.xlu1 %v732_v4  ;;  %730 = vadd.xlane.f32.xlu0 %v729_v5  ;;  %v2022_v4 = vadd.s32 4294967232, %v4281_v15 }
  0x9b   : > { %739 = vadd.xlane.f32.xlu1 %v738_v8  ;;  %736 = vadd.xlane.f32.xlu0 %v735_v9  ;;  %v765_v8 = vsel %vm536_vm1, %v356_v60, 0.0  ;;  %v4388_v60 = vsub.s32 %v2050_v43, %v4286_v18  ;;  %v369_v43 = vld [vmem:[%s4137_s8 + $0x2c8] sm:$0xff] }
  0x9f   : > { %745 = vadd.xlane.f32.xlu1 %v744_v13  ;;  %742 = vadd.xlane.f32.xlu0 %v741_v14  ;;  %v359_v13 = vld [vmem:[%s4137_s8 + $0x278] sm:$0xff]  ;;  %v358_v14 = vld [vmem:[%s4137_s8 + $0x270] sm:$0xff] }
  0xa0   : > { %v545_v22 = vpop.xlane.xlu1 %544  ;;  %v539_v23 = vpop.xlane.xlu0 %538  ;;  %v774_v26 = vsel %vm536_vm1, %v359_v13, 0.0  ;;  %v771_v27 = vsel %vm536_vm1, %v358_v14, 0.0 }
  0xa1   : > { %v1305_v31 = vmul.f32 0.015625, %v539_v23  ;;  %v1307_v35 = vmul.f32 0.015625, %v545_v22  ;;  %v4356_v22 = vsub.s32 %v2022_v4, %v4286_v18  ;;  %v2036_v23 = vadd.s32 4294967216, %v4281_v15 }
  0xa3   : > { %751 = vadd.xlane.f32.xlu1 %v750_v24  ;;  %748 = vadd.xlane.f32.xlu0 %v747_v25  ;;  %v1972_v48 = vrot.slane %v1305_v31, %v4299_v30  ;;  %v1984_v51 = vrot.slane %v1307_v35, %v4308_v34  ;;  %v361_v35 = vld [vmem:[%s4137_s8 + $0x288] sm:$0xff]  ;;  %v4372_v42 = vsub.s32 %v2036_v23, %v4286_v18 }
  0xa4   : > { %v548_v36 = vpop.xlane.xlu1 %547  ;;  %v542_v37 = vpop.xlane.xlu0 %541 }
  0xa5   : > { %v1308_v40 = vmul.f32 0.015625, %v548_v36  ;;  %v1306_v41 = vmul.f32 0.015625, %v542_v37  ;;  %v360_v36 = vld [vmem:[%s4137_s8 + $0x280] sm:$0xff] }
  0xa7   : > { %v1991_v49 = vrot.slane %v1308_v40, %v4302_v32  ;;  %v1977_v50 = vrot.slane %v1306_v41, %v4305_v33  ;;  %757 = vadd.xlane.f32.xlu1 %v756_v38  ;;  %754 = vadd.xlane.f32.xlu0 %v753_v39  ;;  %v4366_v38 = vsub.s32 %v2043_v19, %v4286_v18  ;;  %v2057_v39 = vadd.s32 4294967192, %v4281_v15 }
  0xa8   : > { %v554_v52 = vpop.xlane.xlu1 %553  ;;  %v551_v53 = vpop.xlane.xlu0 %550 }
  0xa9   : > { %v1979_v56 = vsel %vm1978_vm2, %v1977_v50, %v1972_v48  ;;  %v1310_v57 = vmul.f32 0.015625, %v554_v52  ;;  %v1309_v58 = vmul.f32 0.015625, %v551_v53  ;;  %v780_v48 = vsel %vm536_vm1, %v361_v35, 0.0  ;;  %v363_v53 = vld [vmem:[%s4137_s8 + $0x298] sm:$0xff] }
  0xaa   : > { %v1986_v61 = vsel %vm1985_vm3, %v1984_v51, %v1979_v56  ;;  %v4382_v56 = vsub.s32 %v2057_v39, %v4286_v18 }
  0xab   : > { %v2005_v1 = vrot.slane %v1310_v57, %v4315_v44  ;;  %v1993_v2 = vsel %vm1992_vm4, %v1991_v49, %v1986_v61  ;;  %v1998_v3 = vrot.slane %v1309_v58, %v4318_v45  ;;  %763 = vadd.xlane.f32.xlu1 %v762_v54  ;;  %760 = vadd.xlane.f32.xlu0 %v759_v55  ;;  %v777_v49 = vsel %vm536_vm1, %v360_v36, 0.0  ;;  %v362_v54 = vld [vmem:[%s4137_s8 + $0x290] sm:$0xff] }
  0xac   : > { %v560_v5 = vpop.xlane.xlu1 %559  ;;  %v557_v6 = vpop.xlane.xlu0 %556  ;;  %v2064_v57 = vadd.s32 4294967184, %v4281_v15  ;;  %v2071_v61 = vadd.s32 4294967176, %v4281_v15 }
  0xad   : > { %v2000_v9 = vsel %vm1999_vm5, %v1998_v3, %v1993_v2  ;;  %v1312_v11 = vmul.f32 0.015625, %v560_v5  ;;  %v1311_v12 = vmul.f32 0.015625, %v557_v6  ;;  %v786_v2 = vsel %vm536_vm1, %v363_v53, 0.0 }
  0xae   : > { %v2007_v16 = vsel %vm2006_vm6, %v2005_v1, %v2000_v9  ;;  %v783_v3 = vsel %vm536_vm1, %v362_v54, 0.0  ;;  %v4403_v13 = vsub.s32 %v2071_v61, %v4286_v18 }
  0xaf   : > { %v2019_v20 = vrot.slane %v1312_v11, %v4333_v62  ;;  %v2012_v21 = vrot.slane %v1311_v12, %v4336_v63  ;;  %769 = vadd.xlane.f32.xlu1 %v768_v7  ;;  %766 = vadd.xlane.f32.xlu0 %v765_v8  ;;  %v365_v7 = vld [vmem:[%s4137_s8 + $0x2a8] sm:$0xff]  ;;  %v364_v8 = vld [vmem:[%s4137_s8 + $0x2a0] sm:$0xff]  ;;  %v4398_v11 = vsub.s32 %v2064_v57, %v4286_v18 }
  0xb0   : > { %v566_v24 = vpop.xlane.xlu1 %565  ;;  %v563_v25 = vpop.xlane.xlu0 %562  ;;  %v792_v19 = vsel %vm536_vm1, %v365_v7, 0.0 }
  0xb1   : > { %v2014_v28 = vsel %vm2013_vm7, %v2012_v21, %v2007_v16  ;;  %v1314_v29 = vmul.f32 0.015625, %v566_v24  ;;  %v1313_v31 = vmul.f32 0.015625, %v563_v25  ;;  %v367_v25 = vld [vmem:[%s4137_s8 + $0x2b8] sm:$0xff] }
  0xb2   : > { %v2021_v37 = vsel %vm2020_vm8, %v2019_v20, %v2014_v28  ;;  %v789_v20 = vsel %vm536_vm1, %v364_v8, 0.0  ;;  %v798_v36 = vsel %vm536_vm1, %v367_v25, 0.0  ;;  %v373_v8 = vld [vmem:[%s4137_s8 + $0x2e8] sm:$0xff] }
  0xb3   : > { %v2033_v40 = vrot.slane %v1314_v29, %v4350_v17  ;;  %v2026_v41 = vrot.slane %v1313_v31, %v4356_v22  ;;  %775 = vadd.xlane.f32.xlu1 %v774_v26  ;;  %772 = vadd.xlane.f32.xlu0 %v771_v27  ;;  %v366_v26 = vld [vmem:[%s4137_s8 + $0x2b0] sm:$0xff] }
  0xb4   : > { %v572_v46 = vpop.xlane.xlu1 %571  ;;  %v569_v47 = vpop.xlane.xlu0 %568 }
  0xb5   : > { %v2028_v50 = vsel %vm2027_vm9, %v2026_v41, %v2021_v37  ;;  %v1316_v51 = vmul.f32 0.015625, %v572_v46  ;;  %v1315_v52 = vmul.f32 0.015625, %v569_v47  ;;  %v795_v37 = vsel %vm536_vm1, %v366_v26, 0.0  ;;  %v368_v46 = vld [vmem:[%s4137_s8 + $0x2c0] sm:$0xff]  ;;  %v375_v26 = vld [vmem:[%s4137_s8 + $0x2f8] sm:$0xff] }
  0xb6   : > { %v2035_v55 = vsel %vm6155_vm10, %v2033_v40, %v2028_v50  ;;  %v801_v53 = vsel %vm536_vm1, %v368_v46, 0.0  ;;  %v377_v46 = vld [vmem:[%s4137_s8 + $0x308] sm:$0xff] }
  0xb7   : > { %v2047_v58 = vrot.slane %v1316_v51, %v4366_v38  ;;  %v2040_v59 = vrot.slane %v1315_v52, %v4372_v42  ;;  %781 = vadd.xlane.f32.xlu1 %v780_v48  ;;  %778 = vadd.xlane.f32.xlu0 %v777_v49  ;;  %v804_v52 = vsel %vm536_vm1, %v369_v43, 0.0 }
  0xb8   : > { %v578_v0 = vpop.xlane.xlu1 %577  ;;  %v575_v1 = vpop.xlane.xlu0 %574 }
  0xb9   : > { %v2042_v4 = vsel %vm2041_vm11, %v2040_v59, %v2035_v55  ;;  %v1318_v5 = vmul.f32 0.015625, %v578_v0  ;;  %v1317_v6 = vmul.f32 0.015625, %v575_v1  ;;  %v370_v59 = vld [vmem:[%s4137_s8 + $0x2d0] sm:$0xff] }
  0xba   : > { %v2049_v9 = vsel %vm6154_vm12, %v2047_v58, %v2042_v4  ;;  %v371_v58 = vld [vmem:[%s4137_s8 + $0x2d8] sm:$0xff]  ;;  %v807_v4 = vsel %vm536_vm1, %v370_v59, 0.0 }
  0xbb   : > { %v2061_v15 = vrot.slane %v1318_v5, %v4382_v56  ;;  %v2054_v12 = vrot.slane %v1317_v6, %v4388_v60  ;;  %787 = vadd.xlane.f32.xlu1 %v786_v2  ;;  %784 = vadd.xlane.f32.xlu0 %v783_v3  ;;  %v810_v3 = vsel %vm536_vm1, %v371_v58, 0.0 }
  0xbc   : > { %v584_v14 = vpop.xlane.xlu1 %583  ;;  %v581_v16 = vpop.xlane.xlu0 %580 }
  0xbd   : > { %v2056_v21 = vsel %vm2055_vm13, %v2054_v12, %v2049_v9  ;;  %v1320_v23 = vmul.f32 0.015625, %v584_v14  ;;  %v1319_v24 = vmul.f32 0.015625, %v581_v16  ;;  %v372_v9 = vld [vmem:[%s4137_s8 + $0x2e0] sm:$0xff] }
  0xbe   : > { %v2063_v27 = vsel %vm2062_vm14, %v2061_v15, %v2056_v21  ;;  %v813_v21 = vsel %vm536_vm1, %v372_v9, 0.0 }
  0xbf   : > { %v2075_v28 = vrot.slane %v1320_v23, %v4403_v13  ;;  %v2068_v29 = vrot.slane %v1319_v24, %v4398_v11  ;;  %793 = vadd.xlane.f32.xlu1 %v792_v19  ;;  %790 = vadd.xlane.f32.xlu0 %v789_v20  ;;  %v816_v20 = vsel %vm536_vm1, %v373_v8, 0.0 }
  0xc0   : > { %v590_v31 = vpop.xlane.xlu1 %589  ;;  %v587_v35 = vpop.xlane.xlu0 %586 }
  0xc1   : > { %v2070_v39 = vsel %vm2069_vm15, %v2068_v29, %v2063_v27  ;;  %v1322_v40 = vmul.f32 0.015625, %v590_v31  ;;  %v1321_v41 = vmul.f32 0.015625, %v587_v35  ;;  %v374_v27 = vld [vmem:[%s4137_s8 + $0x2f0] sm:$0xff] }
  0xc2   : > { %v4419_v47 = vsel %vm2076_vm0, %v2075_v28, %v2070_v39  ;;  %v819_v39 = vsel %vm536_vm1, %v374_v27, 0.0 }
  0xc3   : > { %v2085_v48 = vrot.slane %v1322_v40, %v4305_v33  ;;  %v2081_v49 = vrot.slane %v1321_v41, %v4299_v30  ;;  %799 = vadd.xlane.f32.xlu1 %v798_v36  ;;  %796 = vadd.xlane.f32.xlu0 %v795_v37  ;;  %v822_v37 = vsel %vm536_vm1, %v375_v26, 0.0 }
  0xc4   : > { %v596_v50 = vpop.xlane.xlu1 %595  ;;  %v593_v51 = vpop.xlane.xlu0 %592 }
  0xc5   : > { %v2086_v54 = vsel %vm1978_vm2, %v2085_v48, %v2081_v49  ;;  %v1324_v55 = vmul.f32 0.015625, %v596_v50  ;;  %v1323_v57 = vmul.f32 0.015625, %v593_v51  ;;  %v376_v48 = vld [vmem:[%s4137_s8 + $0x300] sm:$0xff] }
  0xc7   : > { %v2095_v61 = vrot.slane %v1324_v55, %v4302_v32  ;;  %v2090_v0 = vrot.slane %v1323_v57, %v4308_v34  ;;  %805 = vadd.xlane.f32.xlu1 %v804_v52  ;;  %802 = vadd.xlane.f32.xlu0 %v801_v53  ;;  %v825_v55 = vsel %vm536_vm1, %v376_v48, 0.0 }
  0xc8   : > { %v602_v1 = vpop.xlane.xlu1 %601  ;;  %v599_v2 = vpop.xlane.xlu0 %598 }
  0xc9   : > { %v2091_v5 = vsel %vm1985_vm3, %v2090_v0, %v2086_v54  ;;  %v1326_v6 = vmul.f32 0.015625, %v602_v1  ;;  %v1325_v7 = vmul.f32 0.015625, %v599_v2  ;;  %v828_v54 = vsel %vm536_vm1, %v377_v46, 0.0  ;;  %v392_v0 = vld [vmem:[%s4137_s8 + $0x380] sm:$0xff] }
  0xca   : > { %v2096_v15 = vsel %vm1992_vm4, %v2095_v61, %v2091_v5  ;;  %v393_v61 = vld [vmem:[%s4137_s8 + $0x388] sm:$0xff] }
  0xcb   : > { %v2105_v12 = vrot.slane %v1326_v6, %v4315_v44  ;;  %v2100_v14 = vrot.slane %v1325_v7, %v4318_v45  ;;  %811 = vadd.xlane.f32.xlu1 %v810_v3  ;;  %808 = vadd.xlane.f32.xlu0 %v807_v4  ;;  %v876_v6 = vsel %vm536_vm1, %v393_v61, 0.0  ;;  %v873_v7 = vsel %vm536_vm1, %v392_v0, 0.0 }
  0xcc   : > { %v608_v16 = vpop.xlane.xlu1 %607  ;;  %v605_v19 = vpop.xlane.xlu0 %604 }
  0xcd   : > { %v2101_v23 = vsel %vm1999_vm5, %v2100_v14, %v2096_v15  ;;  %v1328_v24 = vmul.f32 0.015625, %v608_v16  ;;  %v1327_v25 = vmul.f32 0.015625, %v605_v19  ;;  %v394_v14 = vld [vmem:[%s4137_s8 + $0x390] sm:$0xff] }
  0xce   : > { %v2106_v28 = vsel %vm2006_vm6, %v2105_v12, %v2101_v23  ;;  %v424_v12 = vld [vmem:[%s4137_s8 + $0x480] sm:$0xff] }
  0xcf   : > { %v2115_v29 = vrot.slane %v1328_v24, %v4333_v62  ;;  %v2110_v31 = vrot.slane %v1327_v25, %v4336_v63  ;;  %817 = vadd.xlane.f32.xlu1 %v816_v20  ;;  %814 = vadd.xlane.f32.xlu0 %v813_v21  ;;  %v969_v24 = vsel %vm536_vm1, %v424_v12, 0.0  ;;  %v879_v25 = vsel %vm536_vm1, %v394_v14, 0.0 }
  0xd0   : > { %v614_v35 = vpop.xlane.xlu1 %613  ;;  %v611_v36 = vpop.xlane.xlu0 %610 }
  0xd1   : > { %v2111_v40 = vsel %vm2013_vm7, %v2110_v31, %v2106_v28  ;;  %v1330_v41 = vmul.f32 0.015625, %v614_v35  ;;  %v1329_v43 = vmul.f32 0.015625, %v611_v36  ;;  %v425_v31 = vld [vmem:[%s4137_s8 + $0x488] sm:$0xff] }
  0xd2   : > { %v2116_v49 = vsel %vm2020_vm8, %v2115_v29, %v2111_v40  ;;  %v378_v29 = vld [vmem:[%s4137_s8 + $0x310] sm:$0xff] }
  0xd3   : > { %v2125_v50 = vrot.slane %v1330_v41, %v4350_v17  ;;  %v2120_v51 = vrot.slane %v1329_v43, %v4356_v22  ;;  %823 = vadd.xlane.f32.xlu1 %v822_v37  ;;  %820 = vadd.xlane.f32.xlu0 %v819_v39  ;;  %v831_v41 = vsel %vm536_vm1, %v378_v29, 0.0  ;;  %v972_v43 = vsel %vm536_vm1, %v425_v31, 0.0 }
  0xd4   : > { %v620_v52 = vpop.xlane.xlu1 %619  ;;  %v617_v53 = vpop.xlane.xlu0 %616 }
  0xd5   : > { %v2121_v57 = vsel %vm2027_vm9, %v2120_v51, %v2116_v49  ;;  %v1332_v58 = vmul.f32 0.015625, %v620_v52  ;;  %v1331_v59 = vmul.f32 0.015625, %v617_v53  ;;  %v395_v51 = vld [vmem:[%s4137_s8 + $0x398] sm:$0xff] }
  0xd6   : > { %v2126_v1 = vsel %vm6155_vm10, %v2125_v50, %v2121_v57  ;;  %v408_v50 = vld [vmem:[%s4137_s8 + $0x400] sm:$0xff] }
  0xd7   : > { %v2135_v2 = vrot.slane %v1332_v58, %v4366_v38  ;;  %v2130_v3 = vrot.slane %v1331_v59, %v4372_v42  ;;  %829 = vadd.xlane.f32.xlu1 %v828_v54  ;;  %826 = vadd.xlane.f32.xlu0 %v825_v55  ;;  %v921_v58 = vsel %vm536_vm1, %v408_v50, 0.0  ;;  %v882_v59 = vsel %vm536_vm1, %v395_v51, 0.0 }
  0xd8   : > { %v626_v4 = vpop.xlane.xlu1 %625  ;;  %v623_v5 = vpop.xlane.xlu0 %622 }
  0xd9   : > { %v2131_v8 = vsel %vm2041_vm11, %v2130_v3, %v2126_v1  ;;  %v1334_v9 = vmul.f32 0.015625, %v626_v4  ;;  %v1333_v15 = vmul.f32 0.015625, %v623_v5  ;;  %v409_v3 = vld [vmem:[%s4137_s8 + $0x408] sm:$0xff] }
  0xda   : > { %v2136_v16 = vsel %vm6154_vm12, %v2135_v2, %v2131_v8  ;;  %v426_v2 = vld [vmem:[%s4137_s8 + $0x490] sm:$0xff] }
  0xdb   : > { %v2145_v19 = vrot.slane %v1334_v9, %v4382_v56  ;;  %v2140_v20 = vrot.slane %v1333_v15, %v4388_v60  ;;  %877 = vadd.xlane.f32.xlu1 %v876_v6  ;;  %874 = vadd.xlane.f32.xlu0 %v873_v7  ;;  %v975_v8 = vsel %vm536_vm1, %v426_v2, 0.0  ;;  %v924_v9 = vsel %vm536_vm1, %v409_v3, 0.0 }
  0xdc   : > { %v632_v21 = vpop.xlane.xlu1 %631  ;;  %v629_v23 = vpop.xlane.xlu0 %628 }
  0xdd   : > { %v2141_v26 = vsel %vm2055_vm13, %v2140_v20, %v2136_v16  ;;  %v1336_v27 = vmul.f32 0.015625, %v632_v21  ;;  %v1335_v28 = vmul.f32 0.015625, %v629_v23  ;;  %v457_v16 = vld [vmem:[%s4137_s8 + $0x588] sm:$0xff] }
  0xde   : > { %v2146_v35 = vsel %vm2062_vm14, %v2145_v19, %v2141_v26  ;;  %v456_v19 = vld [vmem:[%s4137_s8 + $0x580] sm:$0xff]  ;;  %v1068_v26 = vsel %vm536_vm1, %v457_v16, 0.0 }
  0xdf   : > { %v2155_v36 = vrot.slane %v1336_v27, %v4403_v13  ;;  %v2150_v37 = vrot.slane %v1335_v28, %v4398_v11  ;;  %970 = vadd.xlane.f32.xlu1 %v969_v24  ;;  %880 = vadd.xlane.f32.xlu0 %v879_v25  ;;  %v1065_v27 = vsel %vm536_vm1, %v456_v19, 0.0 }
  0xe0   : > { %v638_v39 = vpop.xlane.xlu1 %637  ;;  %v635_v40 = vpop.xlane.xlu0 %634 }
  0xe1   : > { %v2151_v46 = vsel %vm2069_vm15, %v2150_v37, %v2146_v35  ;;  %v1338_v48 = vmul.f32 0.015625, %v638_v39  ;;  %v1337_v49 = vmul.f32 0.015625, %v635_v40  ;;  %v396_v35 = vld [vmem:[%s4137_s8 + $0x3a0] sm:$0xff] }
  0xe2   : > { %v4484_v52 = vsel %vm2076_vm0, %v2155_v36, %v2151_v46  ;;  %v379_v36 = vld [vmem:[%s4137_s8 + $0x318] sm:$0xff]  ;;  %v885_v46 = vsel %vm536_vm1, %v396_v35, 0.0 }
  0xe3   : > { %v2164_v53 = vrot.slane %v1338_v48, %v4305_v33  ;;  %v2160_v54 = vrot.slane %v1337_v49, %v4299_v30  ;;  %832 = vadd.xlane.f32.xlu1 %v831_v41  ;;  %973 = vadd.xlane.f32.xlu0 %v972_v43  ;;  %v834_v48 = vsel %vm536_vm1, %v379_v36, 0.0 }
  0xe4   : > { %v644_v55 = vpop.xlane.xlu1 %643  ;;  %v641_v57 = vpop.xlane.xlu0 %640 }
  0xe5   : > { %v2165_v61 = vsel %vm1978_vm2, %v2164_v53, %v2160_v54  ;;  %v1340_v0 = vmul.f32 0.015625, %v644_v55  ;;  %v1339_v1 = vmul.f32 0.015625, %v641_v57  ;;  %v427_v53 = vld [vmem:[%s4137_s8 + $0x498] sm:$0xff]  ;;  %v410_v54 = vld [vmem:[%s4137_s8 + $0x410] sm:$0xff] }
  0xe7   : > { %v2174_v4 = vrot.slane %v1340_v0, %v4302_v32  ;;  %v2169_v5 = vrot.slane %v1339_v1, %v4308_v34  ;;  %922 = vadd.xlane.f32.xlu1 %v921_v58  ;;  %883 = vadd.xlane.f32.xlu0 %v882_v59  ;;  %v978_v0 = vsel %vm536_vm1, %v427_v53, 0.0  ;;  %v927_v1 = vsel %vm536_vm1, %v410_v54, 0.0 }
  0xe8   : > { %v650_v6 = vpop.xlane.xlu1 %649  ;;  %v647_v7 = vpop.xlane.xlu0 %646 }
  0xe9   : > { %v2170_v15 = vsel %vm1985_vm3, %v2169_v5, %v2165_v61  ;;  %v1342_v12 = vmul.f32 0.015625, %v650_v6  ;;  %v1341_v14 = vmul.f32 0.015625, %v647_v7  ;;  %v441_v5 = vld [vmem:[%s4137_s8 + $0x508] sm:$0xff]  ;;  %v440_v6 = vld [vmem:[%s4137_s8 + $0x500] sm:$0xff] }
  0xea   : > { %v2175_v20 = vsel %vm1992_vm4, %v2174_v4, %v2170_v15  ;;  %v1017_v16 = vsel %vm536_vm1, %v440_v6, 0.0 }
  0xeb   : > { %v2184_v21 = vrot.slane %v1342_v12, %v4315_v44  ;;  %v2179_v23 = vrot.slane %v1341_v14, %v4318_v45  ;;  %976 = vadd.xlane.f32.xlu1 %v975_v8  ;;  %925 = vadd.xlane.f32.xlu0 %v924_v9  ;;  %v1020_v14 = vsel %vm536_vm1, %v441_v5, 0.0 }
  0xec   : > { %v656_v24 = vpop.xlane.xlu1 %655  ;;  %v653_v25 = vpop.xlane.xlu0 %652 }
  0xed   : > { %v2180_v28 = vsel %vm1999_vm5, %v2179_v23, %v2175_v20  ;;  %v1344_v29 = vmul.f32 0.015625, %v656_v24  ;;  %v1343_v31 = vmul.f32 0.015625, %v653_v25  ;;  %v488_v23 = vld [vmem:[%s4137_s8 + $0x680] sm:$0xff]  ;;  %v458_v24 = vld [vmem:[%s4137_s8 + $0x590] sm:$0xff] }
  0xee   : > { %v2185_v37 = vsel %vm2006_vm6, %v2184_v21, %v2180_v28  ;;  %v1071_v35 = vsel %vm536_vm1, %v458_v24, 0.0 }
  0xef   : > { %v2194_v39 = vrot.slane %v1344_v29, %v4333_v62  ;;  %v2189_v40 = vrot.slane %v1343_v31, %v4336_v63  ;;  %1069 = vadd.xlane.f32.xlu1 %v1068_v26  ;;  %1066 = vadd.xlane.f32.xlu0 %v1065_v27  ;;  %v1161_v31 = vsel %vm536_vm1, %v488_v23, 0.0 }
  0xf0   : > { %v662_v41 = vpop.xlane.xlu1 %661  ;;  %v659_v43 = vpop.xlane.xlu0 %658 }
  0xf1   : > { %v2190_v49 = vsel %vm2013_vm7, %v2189_v40, %v2185_v37  ;;  %v1346_v50 = vmul.f32 0.015625, %v662_v41  ;;  %v1345_v51 = vmul.f32 0.015625, %v659_v43  ;;  %v380_v40 = vld [vmem:[%s4137_s8 + $0x320] sm:$0xff]  ;;  %v489_v41 = vld [vmem:[%s4137_s8 + $0x688] sm:$0xff] }
  0xf2   : > { %v2195_v55 = vsel %vm2020_vm8, %v2194_v39, %v2190_v49  ;;  %v1164_v53 = vsel %vm536_vm1, %v489_v41, 0.0 }
  0xf3   : > { %v2204_v57 = vrot.slane %v1346_v50, %v4350_v17  ;;  %v2199_v58 = vrot.slane %v1345_v51, %v4356_v22  ;;  %886 = vadd.xlane.f32.xlu1 %v885_v46  ;;  %835 = vadd.xlane.f32.xlu0 %v834_v48  ;;  %v837_v51 = vsel %vm536_vm1, %v380_v40, 0.0 }
  0xf4   : > { %v668_v59 = vpop.xlane.xlu1 %667  ;;  %v665_v61 = vpop.xlane.xlu0 %664 }
  0xf5   : > { %v2200_v2 = vsel %vm2027_vm9, %v2199_v58, %v2195_v55  ;;  %v1348_v3 = vmul.f32 0.015625, %v668_v59  ;;  %v1347_v4 = vmul.f32 0.015625, %v665_v61  ;;  %v411_v58 = vld [vmem:[%s4137_s8 + $0x418] sm:$0xff]  ;;  %v397_v59 = vld [vmem:[%s4137_s8 + $0x3a8] sm:$0xff] }
  0xf6   : > { %v2205_v7 = vsel %vm6155_vm10, %v2204_v57, %v2200_v2  ;;  %v930_v5 = vsel %vm536_vm1, %v411_v58, 0.0  ;;  %v888_v6 = vsel %vm536_vm1, %v397_v59, 0.0 }
  0xf7   : > { %v2214_v8 = vrot.slane %v1348_v3, %v4366_v38  ;;  %v2209_v9 = vrot.slane %v1347_v4, %v4372_v42  ;;  %979 = vadd.xlane.f32.xlu1 %v978_v0  ;;  %928 = vadd.xlane.f32.xlu0 %v927_v1 }
  0xf8   : > { %v674_v15 = vpop.xlane.xlu1 %673  ;;  %v671_v12 = vpop.xlane.xlu0 %670 }
  0xf9   : > { %v2210_v19 = vsel %vm2041_vm11, %v2209_v9, %v2205_v7  ;;  %v1350_v20 = vmul.f32 0.015625, %v674_v15  ;;  %v1349_v21 = vmul.f32 0.015625, %v671_v12  ;;  %v428_v15 = vld [vmem:[%s4137_s8 + $0x4a0] sm:$0xff] }
  0xfa   : > { %v2215_v25 = vsel %vm6154_vm12, %v2214_v8, %v2210_v19  ;;  %vm3263_vm12 = vcmask 1041409  }
  0xfb   : > { %v2224_v26 = vrot.slane %v1350_v20, %v4382_v56  ;;  %v2219_v27 = vrot.slane %v1349_v21, %v4388_v60  ;;  %1021 = vadd.xlane.f32.xlu1 %v1020_v14  ;;  %1018 = vadd.xlane.f32.xlu0 %v1017_v16  ;;  %v981_v21 = vsel %vm536_vm1, %v428_v15, 0.0 }
  0xfc   : > { %v680_v28 = vpop.xlane.xlu1 %679  ;;  %v677_v29 = vpop.xlane.xlu0 %676 }
  0xfd   : > { %v2220_v36 = vsel %vm2055_vm13, %v2219_v27, %v2215_v25  ;;  %v1352_v37 = vmul.f32 0.015625, %v680_v28  ;;  %v1351_v39 = vmul.f32 0.015625, %v677_v29  ;;  %v459_v27 = vld [vmem:[%s4137_s8 + $0x598] sm:$0xff] }
  0xfe   : > { %v2225_v43 = vsel %vm2062_vm14, %v2224_v26, %v2220_v36  ;;  %v472_v26 = vld [vmem:[%s4137_s8 + $0x600] sm:$0xff] }
  0xff   : > { %v2234_v46 = vrot.slane %v1352_v37, %v4403_v13  ;;  %v2229_v48 = vrot.slane %v1351_v39, %v4398_v11  ;;  %1162 = vadd.xlane.f32.xlu1 %v1161_v31  ;;  %1072 = vadd.xlane.f32.xlu0 %v1071_v35  ;;  %v1113_v37 = vsel %vm536_vm1, %v472_v26, 0.0  ;;  %v1074_v39 = vsel %vm536_vm1, %v459_v27, 0.0 }
 0x100   : > { %v686_v49 = vpop.xlane.xlu1 %685  ;;  %v683_v50 = vpop.xlane.xlu0 %682 }
 0x101   : > { %v2230_v54 = vsel %vm2069_vm15, %v2229_v48, %v2225_v43  ;;  %v1354_v55 = vmul.f32 0.015625, %v686_v49  ;;  %v1353_v57 = vmul.f32 0.015625, %v683_v50  ;;  %v473_v48 = vld [vmem:[%s4137_s8 + $0x608] sm:$0xff] }
 0x102   : > { %v2235_v61 = vsel %vm2076_vm0, %v2234_v46, %v2230_v54  ;;  %v490_v46 = vld [vmem:[%s4137_s8 + $0x690] sm:$0xff] }
 0x103   : > { %v4551_v0 = vsel %vm3263_vm12, %v2235_v61, %v4419_v47  ;;  %v2243_v1 = vrot.slane %v1354_v55, %v4305_v33  ;;  %v2239_v2 = vrot.slane %v1353_v57, %v4299_v30  ;;  %838 = vadd.xlane.f32.xlu1 %v837_v51  ;;  %1165 = vadd.xlane.f32.xlu0 %v1164_v53  ;;  %v442_v47 = vld [vmem:[%s4137_s8 + $0x510] sm:$0xff]  ;;  %v1167_v55 = vsel %vm536_vm1, %v490_v46, 0.0 }
 0x104   : > { %v692_v3 = vpop.xlane.xlu1 %691  ;;  %v689_v4 = vpop.xlane.xlu0 %688  ;;  %v1023_v20 = vsel %vm536_vm1, %v442_v47, 0.0  ;;  %v1116_v57 = vsel %vm536_vm1, %v473_v48, 0.0 }
 0x105   : > { %v2244_v7 = vsel %vm1978_vm2, %v2243_v1, %v2239_v2  ;;  %v1356_v8 = vmul.f32 0.015625, %v692_v3  ;;  %v1355_v9 = vmul.f32 0.015625, %v689_v4  ;;  %v521_v1 = vld [vmem:[%s4137_s8 + $0x788] sm:$0xff]  ;;  %v520_v2 = vld [vmem:[%s4137_s8 + $0x780] sm:$0xff] }
 0x107   : > { %v2253_v12 = vrot.slane %v1356_v8, %v4302_v32  ;;  %v2248_v14 = vrot.slane %v1355_v9, %v4308_v34  ;;  %931 = vadd.xlane.f32.xlu1 %v930_v5  ;;  %889 = vadd.xlane.f32.xlu0 %v888_v6  ;;  %v1260_v8 = vsel %vm536_vm1, %v521_v1, 0.0  ;;  %v1257_v9 = vsel %vm536_vm1, %v520_v2, 0.0 }
 0x108   : > { %v698_v16 = vpop.xlane.xlu1 %697  ;;  %v695_v19 = vpop.xlane.xlu0 %694 }
 0x109   : > { %v2249_v23 = vsel %vm1985_vm3, %v2248_v14, %v2244_v7  ;;  %v1358_v24 = vmul.f32 0.015625, %v698_v16  ;;  %v1357_v25 = vmul.f32 0.015625, %v695_v19  ;;  %v398_v14 = vld [vmem:[%s4137_s8 + $0x3b0] sm:$0xff]  ;;  %v381_v16 = vld [vmem:[%s4137_s8 + $0x328] sm:$0xff] }
 0x10a   : > { %v2254_v28 = vsel %vm1992_vm4, %v2253_v12, %v2249_v23  ;;  %v840_v26 = vsel %vm536_vm1, %v381_v16, 0.0 }
 0x10b   : > { %v2263_v29 = vrot.slane %v1358_v24, %v4315_v44  ;;  %v2258_v31 = vrot.slane %v1357_v25, %v4318_v45  ;;  %1024 = vadd.xlane.f32.xlu1 %v1023_v20  ;;  %982 = vadd.xlane.f32.xlu0 %v981_v21  ;;  %v891_v25 = vsel %vm536_vm1, %v398_v14, 0.0 }
 0x10c   : > { %v704_v35 = vpop.xlane.xlu1 %703  ;;  %v701_v36 = vpop.xlane.xlu0 %700 }
 0x10d   : > { %v2259_v40 = vsel %vm1999_vm5, %v2258_v31, %v2254_v28  ;;  %v1360_v41 = vmul.f32 0.015625, %v704_v35  ;;  %v1359_v43 = vmul.f32 0.015625, %v701_v36  ;;  %v429_v31 = vld [vmem:[%s4137_s8 + $0x4a8] sm:$0xff]  ;;  %v412_v35 = vld [vmem:[%s4137_s8 + $0x420] sm:$0xff] }
 0x10e   : > { %v2264_v49 = vsel %vm2006_vm6, %v2263_v29, %v2259_v40  ;;  %v933_v46 = vsel %vm536_vm1, %v412_v35, 0.0 }
 0x10f   : > { %v2273_v50 = vrot.slane %v1360_v41, %v4333_v62  ;;  %v2268_v51 = vrot.slane %v1359_v43, %v4336_v63  ;;  %1114 = vadd.xlane.f32.xlu1 %v1113_v37  ;;  %1075 = vadd.xlane.f32.xlu0 %v1074_v39  ;;  %v984_v43 = vsel %vm536_vm1, %v429_v31, 0.0 }
 0x110   : > { %v710_v53 = vpop.xlane.xlu1 %709  ;;  %v707_v54 = vpop.xlane.xlu0 %706 }
 0x111   : > { %v2269_v58 = vsel %vm2013_vm7, %v2268_v51, %v2264_v49  ;;  %v1362_v59 = vmul.f32 0.015625, %v710_v53  ;;  %v1361_v61 = vmul.f32 0.015625, %v707_v54  ;;  %v460_v51 = vld [vmem:[%s4137_s8 + $0x5a0] sm:$0xff]  ;;  %v443_v53 = vld [vmem:[%s4137_s8 + $0x518] sm:$0xff] }
 0x112   : > { %v2274_v3 = vsel %vm2020_vm8, %v2273_v50, %v2269_v58  ;;  %v1026_v1 = vsel %vm536_vm1, %v443_v53, 0.0 }
 0x113   : > { %v2283_v4 = vrot.slane %v1362_v59, %v4350_v17  ;;  %v2278_v5 = vrot.slane %v1361_v61, %v4356_v22  ;;  %1168 = vadd.xlane.f32.xlu1 %v1167_v55  ;;  %1117 = vadd.xlane.f32.xlu0 %v1116_v57  ;;  %v1077_v61 = vsel %vm536_vm1, %v460_v51, 0.0 }
 0x114   : > { %v716_v6 = vpop.xlane.xlu1 %715  ;;  %v713_v7 = vpop.xlane.xlu0 %712 }
 0x115   : > { %v2279_v47 = vsel %vm2027_vm9, %v2278_v5, %v2274_v3  ;;  %v1364_v15 = vmul.f32 0.015625, %v716_v6  ;;  %v1363_v12 = vmul.f32 0.015625, %v713_v7  ;;  %v491_v5 = vld [vmem:[%s4137_s8 + $0x698] sm:$0xff]  ;;  %v474_v6 = vld [vmem:[%s4137_s8 + $0x610] sm:$0xff] }
 0x116   : > { %v2284_v19 = vsel %vm6155_vm10, %v2283_v4, %v2279_v47  ;;  %vm6156_vm10 = vcmask 786112   ;;  %v1170_v14 = vsel %vm536_vm1, %v491_v5, 0.0  ;;  %v1119_v16 = vsel %vm536_vm1, %v474_v6, 0.0 }
 0x117   : > { %v2293_v20 = vrot.slane %v1364_v15, %v4366_v38  ;;  %v2288_v21 = vrot.slane %v1363_v12, %v4372_v42  ;;  %1261 = vadd.xlane.f32.xlu1 %v1260_v8  ;;  %1258 = vadd.xlane.f32.xlu0 %v1257_v9 }
 0x118   : > { %v722_v23 = vpop.xlane.xlu1 %721  ;;  %v719_v24 = vpop.xlane.xlu0 %718 }
 0x119   : > { %v2289_v27 = vsel %vm2041_vm11, %v2288_v21, %v2284_v19  ;;  %v1366_v28 = vmul.f32 0.015625, %v722_v23  ;;  %v1365_v29 = vmul.f32 0.015625, %v719_v24  ;;  %v504_v23 = vld [vmem:[%s4137_s8 + $0x700] sm:$0xff] }
 0x11a   : > { %v2294_v36 = vsel %vm6156_vm10, %v2293_v20, %v2289_v27  ;;  %vm6157_vm10 = vcmask 654912  }
 0x11b   : > { %v2303_v37 = vrot.slane %v1366_v28, %v4382_v56  ;;  %v2298_v39 = vrot.slane %v1365_v29, %v4388_v60  ;;  %892 = vadd.xlane.f32.xlu1 %v891_v25  ;;  %841 = vadd.xlane.f32.xlu0 %v840_v26  ;;  %v1209_v29 = vsel %vm536_vm1, %v504_v23, 0.0 }
 0x11c   : > { %v728_v40 = vpop.xlane.xlu1 %727  ;;  %v725_v41 = vpop.xlane.xlu0 %724 }
 0x11d   : > { %v2299_v48 = vsel %vm2055_vm13, %v2298_v39, %v2294_v36  ;;  %v1368_v49 = vmul.f32 0.015625, %v728_v40  ;;  %v1367_v50 = vmul.f32 0.015625, %v725_v41  ;;  %v522_v39 = vld [vmem:[%s4137_s8 + $0x790] sm:$0xff] }
 0x11e   : > { %v2304_v54 = vsel %vm2062_vm14, %v2303_v37, %v2299_v48  ;;  %v382_v37 = vld [vmem:[%s4137_s8 + $0x330] sm:$0xff] }
 0x11f   : > { %v2313_v55 = vrot.slane %v1368_v49, %v4403_v13  ;;  %v2308_v57 = vrot.slane %v1367_v50, %v4398_v11  ;;  %985 = vadd.xlane.f32.xlu1 %v984_v43  ;;  %934 = vadd.xlane.f32.xlu0 %v933_v46  ;;  %v843_v49 = vsel %vm536_vm1, %v382_v37, 0.0  ;;  %v1263_v50 = vsel %vm536_vm1, %v522_v39, 0.0 }
 0x120   : > { %v734_v58 = vpop.xlane.xlu1 %733  ;;  %v731_v59 = vpop.xlane.xlu0 %730 }
 0x121   : > { %v2309_v2 = vsel %vm2069_vm15, %v2308_v57, %v2304_v54  ;;  %v1370_v3 = vmul.f32 0.015625, %v734_v58  ;;  %v1369_v4 = vmul.f32 0.015625, %v731_v59  ;;  %v399_v57 = vld [vmem:[%s4137_s8 + $0x3b8] sm:$0xff] }
 0x122   : > { %v2314_v7 = vsel %vm2076_vm0, %v2313_v55, %v2309_v2  ;;  %v413_v55 = vld [vmem:[%s4137_s8 + $0x428] sm:$0xff] }
 0x123   : > { %v4618_v8 = vsel %vm3263_vm12, %v2314_v7, %v4484_v52  ;;  %v2322_v9 = vrot.slane %v1370_v3, %v4305_v33  ;;  %v2318_v47 = vrot.slane %v1369_v4, %v4299_v30  ;;  %1078 = vadd.xlane.f32.xlu1 %v1077_v61  ;;  %1027 = vadd.xlane.f32.xlu0 %v1026_v1  ;;  %v505_v52 = vld [vmem:[%s4137_s8 + $0x708] sm:$0xff]  ;;  %v936_v3 = vsel %vm536_vm1, %v413_v55, 0.0 }
 0x124   : > { %v740_v15 = vpop.xlane.xlu1 %739  ;;  %v737_v12 = vpop.xlane.xlu0 %736  ;;  %v1212_v28 = vsel %vm536_vm1, %v505_v52, 0.0  ;;  %v894_v4 = vsel %vm536_vm1, %v399_v57, 0.0  ;;  %vm6158_vm12 = vcmask 786112  }
 0x125   : > { %v2323_v19 = vsel %vm1978_vm2, %v2322_v9, %v2318_v47  ;;  %v1372_v20 = vmul.f32 0.015625, %v740_v15  ;;  %v1371_v21 = vmul.f32 0.015625, %v737_v12  ;;  %v444_v9 = vld [vmem:[%s4137_s8 + $0x520] sm:$0xff]  ;;  %v430_v47 = vld [vmem:[%s4137_s8 + $0x4b0] sm:$0xff] }
 0x127   : > { %v2332_v24 = vrot.slane %v1372_v20, %v4302_v32  ;;  %v2327_v25 = vrot.slane %v1371_v21, %v4308_v34  ;;  %1171 = vadd.xlane.f32.xlu1 %v1170_v14  ;;  %1120 = vadd.xlane.f32.xlu0 %v1119_v16  ;;  %v1029_v20 = vsel %vm536_vm1, %v444_v9, 0.0  ;;  %v987_v21 = vsel %vm536_vm1, %v430_v47, 0.0 }
 0x128   : > { %v746_v26 = vpop.xlane.xlu1 %745  ;;  %v743_v27 = vpop.xlane.xlu0 %742 }
 0x129   : > { %v2328_v31 = vsel %vm1985_vm3, %v2327_v25, %v2323_v19  ;;  %v1374_v35 = vmul.f32 0.015625, %v746_v26  ;;  %v1373_v36 = vmul.f32 0.015625, %v743_v27  ;;  %v475_v25 = vld [vmem:[%s4137_s8 + $0x618] sm:$0xff]  ;;  %v461_v26 = vld [vmem:[%s4137_s8 + $0x5a8] sm:$0xff] }
 0x12a   : > { %v2333_v40 = vsel %vm1992_vm4, %v2332_v24, %v2328_v31  ;;  %v1080_v37 = vsel %vm536_vm1, %v461_v26, 0.0 }
 0x12b   : > { %v2342_v41 = vrot.slane %v1374_v35, %v4315_v44  ;;  %v2337_v43 = vrot.slane %v1373_v36, %v4318_v45  ;;  %1213 = vadd.xlane.f32.xlu1 %v1212_v28  ;;  %1210 = vadd.xlane.f32.xlu0 %v1209_v29  ;;  %v1122_v36 = vsel %vm536_vm1, %v475_v25, 0.0 }
 0x12c   : > { %v752_v46 = vpop.xlane.xlu1 %751  ;;  %v749_v48 = vpop.xlane.xlu0 %748 }
 0x12d   : > { %v2338_v51 = vsel %vm1999_vm5, %v2337_v43, %v2333_v40  ;;  %v1376_v53 = vmul.f32 0.015625, %v752_v46  ;;  %v1375_v54 = vmul.f32 0.015625, %v749_v48  ;;  %v506_v43 = vld [vmem:[%s4137_s8 + $0x710] sm:$0xff]  ;;  %v492_v46 = vld [vmem:[%s4137_s8 + $0x6a0] sm:$0xff] }
 0x12e   : > { %v2343_v58 = vsel %vm2006_vm6, %v2342_v41, %v2338_v51  ;;  %v1173_v55 = vsel %vm536_vm1, %v492_v46, 0.0 }
 0x12f   : > { %v2352_v59 = vrot.slane %v1376_v53, %v4333_v62  ;;  %v2347_v61 = vrot.slane %v1375_v54, %v4336_v63  ;;  %844 = vadd.xlane.f32.xlu1 %v843_v49  ;;  %1264 = vadd.xlane.f32.xlu0 %v1263_v50  ;;  %v1215_v54 = vsel %vm536_vm1, %v506_v43, 0.0 }
 0x130   : > { %v758_v1 = vpop.xlane.xlu1 %757  ;;  %v755_v2 = vpop.xlane.xlu0 %754 }
 0x131   : > { %v2348_v5 = vsel %vm2013_vm7, %v2347_v61, %v2343_v58  ;;  %v1378_v6 = vmul.f32 0.015625, %v758_v1  ;;  %v1377_v7 = vmul.f32 0.015625, %v755_v2  ;;  %v383_v61 = vld [vmem:[%s4137_s8 + $0x338] sm:$0xff] }
 0x132   : > { %v2353_v15 = vsel %vm2020_vm8, %v2352_v59, %v2348_v5  ;;  %v523_v1 = vld [vmem:[%s4137_s8 + $0x798] sm:$0xff] }
 0x133   : > { %v2362_v12 = vrot.slane %v1378_v6, %v4350_v17  ;;  %v2357_v14 = vrot.slane %v1377_v7, %v4356_v22  ;;  %937 = vadd.xlane.f32.xlu1 %v936_v3  ;;  %895 = vadd.xlane.f32.xlu0 %v894_v4  ;;  %v846_v7 = vsel %vm536_vm1, %v383_v61, 0.0  ;;  %v1266_v9 = vsel %vm536_vm1, %v523_v1, 0.0 }
 0x134   : > { %v764_v16 = vpop.xlane.xlu1 %763  ;;  %v761_v19 = vpop.xlane.xlu0 %760 }
 0x135   : > { %v2358_v52 = vsel %vm2027_vm9, %v2357_v14, %v2353_v15  ;;  %v1380_v23 = vmul.f32 0.015625, %v764_v16  ;;  %v1379_v24 = vmul.f32 0.015625, %v761_v19  ;;  %v414_v14 = vld [vmem:[%s4137_s8 + $0x430] sm:$0xff]  ;;  %v400_v16 = vld [vmem:[%s4137_s8 + $0x3c0] sm:$0xff] }
 0x136   : > { %v2363_v27 = vsel %vm6157_vm10, %v2362_v12, %v2358_v52  ;;  %vm3265_vm10 = vcmask 1042434   ;;  %v939_v25 = vsel %vm536_vm1, %v414_v14, 0.0  ;;  %v897_v26 = vsel %vm536_vm1, %v400_v16, 0.0 }
 0x137   : > { %v2372_v28 = vrot.slane %v1380_v23, %v4366_v38  ;;  %v2367_v29 = vrot.slane %v1379_v24, %v4372_v42  ;;  %1030 = vadd.xlane.f32.xlu1 %v1029_v20  ;;  %988 = vadd.xlane.f32.xlu0 %v987_v21 }
 0x138   : > { %v770_v31 = vpop.xlane.xlu1 %769  ;;  %v767_v35 = vpop.xlane.xlu0 %766 }
 0x139   : > { %v2368_v39 = vsel %vm2041_vm11, %v2367_v29, %v2363_v27  ;;  %v1382_v40 = vmul.f32 0.015625, %v770_v31  ;;  %v1381_v41 = vmul.f32 0.015625, %v767_v35  ;;  %v445_v31 = vld [vmem:[%s4137_s8 + $0x528] sm:$0xff]  ;;  %v431_v35 = vld [vmem:[%s4137_s8 + $0x4b8] sm:$0xff] }
 0x13a   : > { %v2373_v48 = vsel %vm6158_vm12, %v2372_v28, %v2368_v39  ;;  %vm6159_vm12 = vcmask 654912  }
 0x13b   : > { %v2382_v49 = vrot.slane %v1382_v40, %v4382_v56  ;;  %v2377_v50 = vrot.slane %v1381_v41, %v4388_v60  ;;  %1123 = vadd.xlane.f32.xlu1 %v1122_v36  ;;  %1081 = vadd.xlane.f32.xlu0 %v1080_v37  ;;  %v1032_v40 = vsel %vm536_vm1, %v445_v31, 0.0  ;;  %v990_v41 = vsel %vm536_vm1, %v431_v35, 0.0 }
 0x13c   : > { %v776_v51 = vpop.xlane.xlu1 %775  ;;  %v773_v53 = vpop.xlane.xlu0 %772 }
 0x13d   : > { %v2378_v57 = vsel %vm2055_vm13, %v2377_v50, %v2373_v48  ;;  %v1384_v58 = vmul.f32 0.015625, %v776_v51  ;;  %v1383_v59 = vmul.f32 0.015625, %v773_v53  ;;  %v462_v50 = vld [vmem:[%s4137_s8 + $0x5b0] sm:$0xff] }
 0x13e   : > { %v2383_v2 = vsel %vm2062_vm14, %v2382_v49, %v2378_v57  ;;  %v476_v49 = vld [vmem:[%s4137_s8 + $0x620] sm:$0xff] }
 0x13f   : > { %v2392_v3 = vrot.slane %v1384_v58, %v4403_v13  ;;  %v2387_v4 = vrot.slane %v1383_v59, %v4398_v11  ;;  %1216 = vadd.xlane.f32.xlu1 %v1215_v54  ;;  %1174 = vadd.xlane.f32.xlu0 %v1173_v55  ;;  %v1125_v58 = vsel %vm536_vm1, %v476_v49, 0.0  ;;  %v1083_v59 = vsel %vm536_vm1, %v462_v50, 0.0 }
 0x140   : > { %v782_v5 = vpop.xlane.xlu1 %781  ;;  %v779_v6 = vpop.xlane.xlu0 %778 }
 0x141   : > { %v2388_v47 = vsel %vm2069_vm15, %v2387_v4, %v2383_v2  ;;  %v1386_v15 = vmul.f32 0.015625, %v782_v5  ;;  %v1385_v12 = vmul.f32 0.015625, %v779_v6  ;;  %v493_v4 = vld [vmem:[%s4137_s8 + $0x6a8] sm:$0xff] }
 0x142   : > { %v2393_v19 = vsel %vm2076_vm0, %v2392_v3, %v2388_v47  ;;  %v507_v3 = vld [vmem:[%s4137_s8 + $0x718] sm:$0xff] }
 0x143   : > { %v2401_v20 = vrot.slane %v1386_v15, %v4305_v33  ;;  %v2397_v21 = vrot.slane %v1385_v12, %v4299_v30  ;;  %847 = vadd.xlane.f32.xlu1 %v846_v7  ;;  %1267 = vadd.xlane.f32.xlu0 %v1266_v9  ;;  %v4687_v52 = vsel %vm3265_vm10, %v2393_v19, %v4551_v0  ;;  %v1218_v15 = vsel %vm536_vm1, %v507_v3, 0.0 }
 0x144   : > { %v788_v23 = vpop.xlane.xlu1 %787  ;;  %v785_v24 = vpop.xlane.xlu0 %784  ;;  %v1176_v12 = vsel %vm536_vm1, %v493_v4, 0.0 }
 0x145   : > { %v2402_v27 = vsel %vm1978_vm2, %v2401_v20, %v2397_v21  ;;  %v1388_v28 = vmul.f32 0.015625, %v788_v23  ;;  %v1387_v29 = vmul.f32 0.015625, %v785_v24  ;;  %v384_v20 = vld [vmem:[%s4137_s8 + $0x340] sm:$0xff] }
 0x146   : > { %v524_v21 = vld [vmem:[%s4137_s8 + $0x7a0] sm:$0xff] }
 0x147   : > { %v2411_v36 = vrot.slane %v1388_v28, %v4302_v32  ;;  %v2406_v37 = vrot.slane %v1387_v29, %v4308_v34  ;;  %940 = vadd.xlane.f32.xlu1 %v939_v25  ;;  %898 = vadd.xlane.f32.xlu0 %v897_v26  ;;  %v849_v28 = vsel %vm536_vm1, %v384_v20, 0.0  ;;  %v1269_v29 = vsel %vm536_vm1, %v524_v21, 0.0 }
 0x148   : > { %v794_v0 = vpop.xlane.xlu1 %793  ;;  %v791_v39 = vpop.xlane.xlu0 %790 }
 0x149   : > { %v2407_v43 = vsel %vm1985_vm3, %v2406_v37, %v2402_v27  ;;  %v1390_v46 = vmul.f32 0.015625, %v794_v0  ;;  %v1389_v48 = vmul.f32 0.015625, %v791_v39  ;;  %v415_v37 = vld [vmem:[%s4137_s8 + $0x438] sm:$0xff]  ;;  %v401_v0 = vld [vmem:[%s4137_s8 + $0x3c8] sm:$0xff] }
 0x14a   : > { %v2412_v51 = vsel %vm1992_vm4, %v2411_v36, %v2407_v43  ;;  %v900_v49 = vsel %vm536_vm1, %v401_v0, 0.0 }
 0x14b   : > { %v2421_v53 = vrot.slane %v1390_v46, %v4315_v44  ;;  %v2416_v54 = vrot.slane %v1389_v48, %v4318_v45  ;;  %1033 = vadd.xlane.f32.xlu1 %v1032_v40  ;;  %991 = vadd.xlane.f32.xlu0 %v990_v41  ;;  %v942_v48 = vsel %vm536_vm1, %v415_v37, 0.0 }
 0x14c   : > { %v800_v55 = vpop.xlane.xlu1 %799  ;;  %v797_v57 = vpop.xlane.xlu0 %796 }
 0x14d   : > { %v2417_v61 = vsel %vm1999_vm5, %v2416_v54, %v2412_v51  ;;  %v1392_v1 = vmul.f32 0.015625, %v800_v55  ;;  %v1391_v2 = vmul.f32 0.015625, %v797_v57  ;;  %v446_v54 = vld [vmem:[%s4137_s8 + $0x530] sm:$0xff]  ;;  %v432_v55 = vld [vmem:[%s4137_s8 + $0x4c0] sm:$0xff] }
 0x14e   : > { %v2422_v5 = vsel %vm2006_vm6, %v2421_v53, %v2417_v61  ;;  %v993_v3 = vsel %vm536_vm1, %v432_v55, 0.0 }
 0x14f   : > { %v2431_v6 = vrot.slane %v1392_v1, %v4333_v62  ;;  %v2426_v7 = vrot.slane %v1391_v2, %v4336_v63  ;;  %1126 = vadd.xlane.f32.xlu1 %v1125_v58  ;;  %1084 = vadd.xlane.f32.xlu0 %v1083_v59  ;;  %v1035_v2 = vsel %vm536_vm1, %v446_v54, 0.0 }
 0x150   : > { %v806_v9 = vpop.xlane.xlu1 %805  ;;  %v803_v47 = vpop.xlane.xlu0 %802 }
 0x151   : > { %v2427_v14 = vsel %vm2013_vm7, %v2426_v7, %v2422_v5  ;;  %v1394_v16 = vmul.f32 0.015625, %v806_v9  ;;  %v1393_v19 = vmul.f32 0.015625, %v803_v47  ;;  %v477_v7 = vld [vmem:[%s4137_s8 + $0x628] sm:$0xff]  ;;  %v463_v9 = vld [vmem:[%s4137_s8 + $0x5b8] sm:$0xff] }
 0x152   : > { %v2432_v23 = vsel %vm2020_vm8, %v2431_v6, %v2427_v14  ;;  %v1086_v20 = vsel %vm536_vm1, %v463_v9, 0.0  ;;  %v447_v9 = vld [vmem:[%s4137_s8 + $0x538] sm:$0xff] }
 0x153   : > { %v2441_v24 = vrot.slane %v1394_v16, %v4350_v17  ;;  %v2436_v25 = vrot.slane %v1393_v19, %v4356_v22  ;;  %1219 = vadd.xlane.f32.xlu1 %v1218_v15  ;;  %1177 = vadd.xlane.f32.xlu0 %v1176_v12  ;;  %v1128_v19 = vsel %vm536_vm1, %v477_v7, 0.0 }
 0x154   : > { %v812_v26 = vpop.xlane.xlu1 %811  ;;  %v809_v27 = vpop.xlane.xlu0 %808 }
 0x155   : > { %v2437_v31 = vsel %vm2027_vm9, %v2436_v25, %v2432_v23  ;;  %v1396_v35 = vmul.f32 0.015625, %v812_v26  ;;  %v1395_v36 = vmul.f32 0.015625, %v809_v27  ;;  %v508_v25 = vld [vmem:[%s4137_s8 + $0x720] sm:$0xff]  ;;  %v494_v26 = vld [vmem:[%s4137_s8 + $0x6b0] sm:$0xff] }
 0x156   : > { %v2442_v39 = vsel %vm6159_vm12, %v2441_v24, %v2437_v31  ;;  %vm6160_vm12 = vcmask 786112   ;;  %v1221_v37 = vsel %vm536_vm1, %v508_v25, 0.0  ;;  %v1179_v0 = vsel %vm536_vm1, %v494_v26, 0.0  ;;  %v478_v26 = vld [vmem:[%s4137_s8 + $0x630] sm:$0xff] }
 0x157   : > { %v2451_v40 = vrot.slane %v1396_v35, %v4366_v38  ;;  %v2446_v41 = vrot.slane %v1395_v36, %v4372_v42  ;;  %850 = vadd.xlane.f32.xlu1 %v849_v28  ;;  %1270 = vadd.xlane.f32.xlu0 %v1269_v29 }
 0x158   : > { %v818_v43 = vpop.xlane.xlu1 %817  ;;  %v815_v46 = vpop.xlane.xlu0 %814 }
 0x159   : > { %v2447_v50 = vsel %vm2041_vm11, %v2446_v41, %v2442_v39  ;;  %v1398_v51 = vmul.f32 0.015625, %v818_v43  ;;  %v1397_v53 = vmul.f32 0.015625, %v815_v46  ;;  %v385_v43 = vld [vmem:[%s4137_s8 + $0x348] sm:$0xff] }
 0x15a   : > { %v2452_v57 = vsel %vm6160_vm12, %v2451_v40, %v2447_v50  ;;  %v525_v46 = vld [vmem:[%s4137_s8 + $0x7a8] sm:$0xff] }
 0x15b   : > { %v2461_v58 = vrot.slane %v1398_v51, %v4382_v56  ;;  %v2456_v59 = vrot.slane %v1397_v53, %v4388_v60  ;;  %943 = vadd.xlane.f32.xlu1 %v942_v48  ;;  %901 = vadd.xlane.f32.xlu0 %v900_v49  ;;  %v852_v51 = vsel %vm536_vm1, %v385_v43, 0.0  ;;  %v1272_v53 = vsel %vm536_vm1, %v525_v46, 0.0  ;;  %v509_v43 = vld [vmem:[%s4137_s8 + $0x728] sm:$0xff]  ;;  %v495_v46 = vld [vmem:[%s4137_s8 + $0x6b8] sm:$0xff] }
 0x15c   : > { %v824_v61 = vpop.xlane.xlu1 %823  ;;  %v821_v1 = vpop.xlane.xlu0 %820 }
 0x15d   : > { %v2457_v4 = vsel %vm2055_vm13, %v2456_v59, %v2452_v57  ;;  %v1400_v5 = vmul.f32 0.015625, %v824_v61  ;;  %v1399_v6 = vmul.f32 0.015625, %v821_v1  ;;  %v416_v57 = vld [vmem:[%s4137_s8 + $0x440] sm:$0xff] }
 0x15e   : > { %v2462_v47 = vsel %vm2062_vm14, %v2461_v58, %v2457_v4  ;;  %v402_v58 = vld [vmem:[%s4137_s8 + $0x3d0] sm:$0xff] }
 0x15f   : > { %v2471_v15 = vrot.slane %v1400_v5, %v4403_v13  ;;  %v2466_v12 = vrot.slane %v1399_v6, %v4398_v11  ;;  %1036 = vadd.xlane.f32.xlu1 %v1035_v2  ;;  %994 = vadd.xlane.f32.xlu0 %v993_v3  ;;  %v945_v3 = vsel %vm536_vm1, %v416_v57, 0.0  ;;  %v903_v4 = vsel %vm536_vm1, %v402_v58, 0.0 }
 0x160   : > { %v830_v14 = vpop.xlane.xlu1 %829  ;;  %v827_v16 = vpop.xlane.xlu0 %826 }
 0x161   : > { %v2467_v21 = vsel %vm2069_vm15, %v2466_v12, %v2462_v47  ;;  %v1402_v23 = vmul.f32 0.015625, %v830_v14  ;;  %v1401_v24 = vmul.f32 0.015625, %v827_v16  ;;  %v433_v47 = vld [vmem:[%s4137_s8 + $0x4c8] sm:$0xff] }
 0x162   : > { %v2472_v27 = vsel %vm2076_vm0, %v2471_v15, %v2467_v21  ;;  %v996_v21 = vsel %vm536_vm1, %v433_v47, 0.0 }
 0x163   : > { %v2480_v28 = vrot.slane %v1402_v23, %v4305_v33  ;;  %v2476_v29 = vrot.slane %v1401_v24, %v4299_v30  ;;  %1129 = vadd.xlane.f32.xlu1 %v1128_v19  ;;  %1087 = vadd.xlane.f32.xlu0 %v1086_v20  ;;  %v4754_v31 = vsel %vm3265_vm10, %v2472_v27, %v4618_v8  ;;  %v1038_v20 = vsel %vm536_vm1, %v447_v9, 0.0  ;;  %v464_v27 = vld [vmem:[%s4137_s8 + $0x5c0] sm:$0xff] }
 0x164   : > { %v878_v35 = vpop.xlane.xlu1 %877  ;;  %v875_v36 = vpop.xlane.xlu0 %874 }
 0x165   : > { %v2481_v39 = vsel %vm1978_vm2, %v2480_v28, %v2476_v29  ;;  %v1418_v40 = vmul.f32 0.015625, %v878_v35  ;;  %v1417_v41 = vmul.f32 0.015625, %v875_v36 }
 0x167   : > { %v2559_v48 = vrot.slane %v1418_v40, %v4305_v33  ;;  %v2555_v49 = vrot.slane %v1417_v41, %v4299_v30  ;;  %1222 = vadd.xlane.f32.xlu1 %v1221_v37  ;;  %1180 = vadd.xlane.f32.xlu0 %v1179_v0  ;;  %v1131_v37 = vsel %vm536_vm1, %v478_v26, 0.0  ;;  %v1089_v0 = vsel %vm536_vm1, %v464_v27, 0.0 }
 0x168   : > { %v971_v8 = vpop.xlane.xlu1 %970  ;;  %v881_v50 = vpop.xlane.xlu0 %880 }
 0x169   : > { %v2560_v54 = vsel %vm1978_vm2, %v2559_v48, %v2555_v49  ;;  %v1419_v55 = vmul.f32 0.015625, %v881_v50  ;;  %v1449_v59 = vmul.f32 0.015625, %v971_v8 }
 0x16b   : > { %v2564_v61 = vrot.slane %v1419_v55, %v4308_v34  ;;  %853 = vadd.xlane.f32.xlu1 %v852_v51  ;;  %1273 = vadd.xlane.f32.xlu0 %v1272_v53  ;;  %v2713_v15 = vrot.slane %v1449_v59, %v4299_v30  ;;  %v1224_v53 = vsel %vm536_vm1, %v509_v43, 0.0 }
 0x16c   : > { %v833_v1 = vpop.xlane.xlu1 %832  ;;  %v974_v2 = vpop.xlane.xlu0 %973 }
 0x16d   : > { %v2565_v5 = vsel %vm1985_vm3, %v2564_v61, %v2560_v54  ;;  %v1403_v6 = vmul.f32 0.015625, %v833_v1  ;;  %v1450_v7 = vmul.f32 0.015625, %v974_v2  ;;  %v1182_v54 = vsel %vm536_vm1, %v495_v46, 0.0  ;;  %v386_v61 = vld [vmem:[%s4137_s8 + $0x350] sm:$0xff] }
 0x16e   : > { %v526_v1 = vld [vmem:[%s4137_s8 + $0x7b0] sm:$0xff] }
 0x16f   : > { %v2485_v12 = vrot.slane %v1403_v6, %v4308_v34  ;;  %v2717_v14 = vrot.slane %v1450_v7, %v4305_v33  ;;  %946 = vadd.xlane.f32.xlu1 %v945_v3  ;;  %904 = vadd.xlane.f32.xlu0 %v903_v4  ;;  %v855_v6 = vsel %vm536_vm1, %v386_v61, 0.0  ;;  %v1275_v7 = vsel %vm536_vm1, %v526_v1, 0.0  ;;  %v510_v1 = vld [vmem:[%s4137_s8 + $0x730] sm:$0xff] }
 0x170   : > { %v923_v16 = vpop.xlane.xlu1 %922  ;;  %v884_v19 = vpop.xlane.xlu0 %883 }
 0x171   : > { %v2486_v23 = vsel %vm1985_vm3, %v2485_v12, %v2481_v39  ;;  %v2718_v24 = vsel %vm1978_vm2, %v2717_v14, %v2713_v15  ;;  %v1420_v25 = vmul.f32 0.015625, %v884_v19  ;;  %v1433_v28 = vmul.f32 0.015625, %v923_v16  ;;  %v417_v12 = vld [vmem:[%s4137_s8 + $0x448] sm:$0xff]  ;;  %v403_v14 = vld [vmem:[%s4137_s8 + $0x3d8] sm:$0xff] }
 0x173   : > { %v2569_v29 = vrot.slane %v1420_v25, %v4302_v32  ;;  %1039 = vadd.xlane.f32.xlu1 %v1038_v20  ;;  %997 = vadd.xlane.f32.xlu0 %v996_v21  ;;  %v2634_v48 = vrot.slane %v1433_v28, %v4299_v30  ;;  %v906_v25 = vsel %vm536_vm1, %v403_v14, 0.0 }
 0x174   : > { %v977_v35 = vpop.xlane.xlu1 %976  ;;  %v926_v36 = vpop.xlane.xlu0 %925 }
 0x175   : > { %v2570_v39 = vsel %vm1992_vm4, %v2569_v29, %v2565_v5  ;;  %v1451_v40 = vmul.f32 0.015625, %v977_v35  ;;  %v1434_v41 = vmul.f32 0.015625, %v926_v36  ;;  %v448_v35 = vld [vmem:[%s4137_s8 + $0x540] sm:$0xff]  ;;  %v434_v36 = vld [vmem:[%s4137_s8 + $0x4d0] sm:$0xff] }
 0x176   : > { %v1041_v43 = vsel %vm536_vm1, %v448_v35, 0.0 }
 0x177   : > { %v2722_v49 = vrot.slane %v1451_v40, %v4308_v34  ;;  %v2638_v8 = vrot.slane %v1434_v41, %v4305_v33  ;;  %1132 = vadd.xlane.f32.xlu1 %v1131_v37  ;;  %1090 = vadd.xlane.f32.xlu0 %v1089_v0 }
 0x178   : > { %v1070_v50 = vpop.xlane.xlu1 %1069  ;;  %v1067_v51 = vpop.xlane.xlu0 %1066 }
 0x179   : > { %v2723_v55 = vsel %vm1985_vm3, %v2722_v49, %v2718_v24  ;;  %v2639_v57 = vsel %vm1978_vm2, %v2638_v8, %v2634_v48  ;;  %v1482_v58 = vmul.f32 0.015625, %v1070_v50  ;;  %v1481_v59 = vmul.f32 0.015625, %v1067_v51  ;;  %v479_v8 = vld [vmem:[%s4137_s8 + $0x638] sm:$0xff]  ;;  %v465_v50 = vld [vmem:[%s4137_s8 + $0x5c8] sm:$0xff] }
 0x17a   : > { %v948_v24 = vsel %vm536_vm1, %v417_v12, 0.0 }
 0x17b   : > { %v2875_v2 = vrot.slane %v1482_v58, %v4305_v33  ;;  %v2871_v3 = vrot.slane %v1481_v59, %v4299_v30  ;;  %1225 = vadd.xlane.f32.xlu1 %v1224_v53  ;;  %1183 = vadd.xlane.f32.xlu0 %v1182_v54  ;;  %v1134_v59 = vsel %vm536_vm1, %v479_v8, 0.0 }
 0x17c   : > { %v887_v4 = vpop.xlane.xlu1 %886  ;;  %v836_v5 = vpop.xlane.xlu0 %835 }
 0x17d   : > { %v2876_v9 = vsel %vm1978_vm2, %v2875_v2, %v2871_v3  ;;  %v1421_v47 = vmul.f32 0.015625, %v887_v4  ;;  %v1404_v15 = vmul.f32 0.015625, %v836_v5  ;;  %v496_v2 = vld [vmem:[%s4137_s8 + $0x6c0] sm:$0xff] }
 0x17f   : > { %v2574_v16 = vrot.slane %v1421_v47, %v4318_v45  ;;  %v2490_v19 = vrot.slane %v1404_v15, %v4302_v32  ;;  %856 = vadd.xlane.f32.xlu1 %v855_v6  ;;  %1276 = vadd.xlane.f32.xlu0 %v1275_v7  ;;  %v1227_v7 = vsel %vm536_vm1, %v510_v1, 0.0  ;;  %v1185_v47 = vsel %vm536_vm1, %v496_v2, 0.0 }
 0x180   : > { %v980_v20 = vpop.xlane.xlu1 %979  ;;  %v929_v21 = vpop.xlane.xlu0 %928 }
 0x181   : > { %v4810_v26 = vsel %vm1999_vm5, %v2574_v16, %v2570_v39  ;;  %v2491_v27 = vsel %vm1992_vm4, %v2490_v19, %v2486_v23  ;;  %v1452_v28 = vmul.f32 0.015625, %v980_v20  ;;  %v1435_v29 = vmul.f32 0.015625, %v929_v21  ;;  %v387_v16 = vld [vmem:[%s4137_s8 + $0x358] sm:$0xff] }
 0x182   : > { %v999_v39 = vsel %vm536_vm1, %v434_v36, 0.0  ;;  %v527_v19 = vld [vmem:[%s4137_s8 + $0x7b8] sm:$0xff] }
 0x183   : > { %v2727_v37 = vrot.slane %v1452_v28, %v4302_v32  ;;  %v2643_v0 = vrot.slane %v1435_v29, %v4308_v34  ;;  %949 = vadd.xlane.f32.xlu1 %v948_v24  ;;  %907 = vadd.xlane.f32.xlu0 %v906_v25  ;;  %v858_v29 = vsel %vm536_vm1, %v387_v16, 0.0 }
 0x184   : > { %v1022_v40 = vpop.xlane.xlu1 %1021  ;;  %v1019_v41 = vpop.xlane.xlu0 %1018 }
 0x185   : > { %v4820_v23 = vsel %vm1992_vm4, %v2727_v37, %v2723_v55  ;;  %v2644_v46 = vsel %vm1985_vm3, %v2643_v0, %v2639_v57  ;;  %v1466_v48 = vmul.f32 0.015625, %v1022_v40  ;;  %v1465_v49 = vmul.f32 0.015625, %v1019_v41  ;;  %v418_v40 = vld [vmem:[%s4137_s8 + $0x450] sm:$0xff]  ;;  %v404_v41 = vld [vmem:[%s4137_s8 + $0x3e0] sm:$0xff] }
 0x186   : > { %v1092_v55 = vsel %vm536_vm1, %v465_v50, 0.0  ;;  %v951_v8 = vsel %vm536_vm1, %v418_v40, 0.0 }
 0x187   : > { %v2796_v51 = vrot.slane %v1466_v48, %v4305_v33  ;;  %v2792_v53 = vrot.slane %v1465_v49, %v4299_v30  ;;  %1042 = vadd.xlane.f32.xlu1 %v1041_v43  ;;  %1000 = vadd.xlane.f32.xlu0 %v999_v39 }
 0x188   : > { %v1163_v54 = vpop.xlane.xlu1 %1162  ;;  %v1073_v58 = vpop.xlane.xlu0 %1072 }
 0x189   : > { %v2797_v57 = vsel %vm1978_vm2, %v2796_v51, %v2792_v53  ;;  %v1483_v61 = vmul.f32 0.015625, %v1073_v58  ;;  %v1513_v3 = vmul.f32 0.015625, %v1163_v54  ;;  %v449_v58 = vld [vmem:[%s4137_s8 + $0x548] sm:$0xff] }
 0x18b   : > { %v2880_v4 = vrot.slane %v1483_v61, %v4308_v34  ;;  %1135 = vadd.xlane.f32.xlu1 %v1134_v59  ;;  %1093 = vadd.xlane.f32.xlu0 %v1092_v55  ;;  %v3029_v20 = vrot.slane %v1513_v3, %v4299_v30  ;;  %v435_v59 = vld [vmem:[%s4137_s8 + $0x4d8] sm:$0xff] }
 0x18c   : > { %v839_v5 = vpop.xlane.xlu1 %838  ;;  %v1166_v6 = vpop.xlane.xlu0 %1165  ;;  %v1002_v3 = vsel %vm536_vm1, %v435_v59, 0.0 }
 0x18d   : > { %v2881_v15 = vsel %vm1985_vm3, %v2880_v4, %v2876_v9  ;;  %v1405_v12 = vmul.f32 0.015625, %v839_v5  ;;  %v1514_v14 = vmul.f32 0.015625, %v1166_v6  ;;  %v1278_v9 = vsel %vm536_vm1, %v527_v19, 0.0  ;;  %v480_v6 = vld [vmem:[%s4137_s8 + $0x640] sm:$0xff] }
 0x18e   : > { %v1137_v19 = vsel %vm536_vm1, %v480_v6, 0.0 }
 0x18f   : > { %v2495_v21 = vrot.slane %v1405_v12, %v4318_v45  ;;  %v3033_v24 = vrot.slane %v1514_v14, %v4305_v33  ;;  %1228 = vadd.xlane.f32.xlu1 %v1227_v7  ;;  %1186 = vadd.xlane.f32.xlu0 %v1185_v47  ;;  %v466_v7 = vld [vmem:[%s4137_s8 + $0x5d0] sm:$0xff] }
 0x190   : > { %v932_v25 = vpop.xlane.xlu1 %931  ;;  %v890_v28 = vpop.xlane.xlu0 %889 }
 0x191   : > { %v4844_v35 = vsel %vm1999_vm5, %v2495_v21, %v2491_v27  ;;  %v3034_v36 = vsel %vm1978_vm2, %v3033_v24, %v3029_v20  ;;  %v1436_v37 = vmul.f32 0.015625, %v932_v25  ;;  %v1422_v0 = vmul.f32 0.015625, %v890_v28  ;;  %v511_v24 = vld [vmem:[%s4137_s8 + $0x738] sm:$0xff]  ;;  %v497_v25 = vld [vmem:[%s4137_s8 + $0x6c8] sm:$0xff] }
 0x192   : > { %v909_v27 = vsel %vm536_vm1, %v404_v41, 0.0  ;;  %v1230_v40 = vsel %vm536_vm1, %v511_v24, 0.0 }
 0x193   : > { %v2648_v43 = vrot.slane %v1436_v37, %v4302_v32  ;;  %v2579_v39 = vrot.slane %v1422_v0, %v4315_v44  ;;  %859 = vadd.xlane.f32.xlu1 %v858_v29  ;;  %1279 = vadd.xlane.f32.xlu0 %v1278_v9 }
 0x194   : > { %v1025_v48 = vpop.xlane.xlu1 %1024  ;;  %v983_v49 = vpop.xlane.xlu0 %982 }
 0x195   : > { %v4854_v50 = vsel %vm1992_vm4, %v2648_v43, %v2644_v46  ;;  %v4858_v51 = vsel %vm2006_vm6, %v2579_v39, %v4810_v26  ;;  %v1467_v53 = vmul.f32 0.015625, %v1025_v48  ;;  %v1453_v54 = vmul.f32 0.015625, %v983_v49  ;;  %v388_v49 = vld [vmem:[%s4137_s8 + $0x360] sm:$0xff] }
 0x196   : > { %v1044_v46 = vsel %vm536_vm1, %v449_v58, 0.0 }
 0x197   : > { %v2801_v55 = vrot.slane %v1467_v53, %v4308_v34  ;;  %v2732_v61 = vrot.slane %v1453_v54, %v4318_v45  ;;  %952 = vadd.xlane.f32.xlu1 %v951_v8  ;;  %910 = vadd.xlane.f32.xlu0 %v909_v27  ;;  %v528_v8 = vld [vmem:[%s4137_s8 + $0x7c0] sm:$0xff] }
 0x198   : > { %v1115_v1 = vpop.xlane.xlu1 %1114  ;;  %v1076_v2 = vpop.xlane.xlu0 %1075  ;;  %v1281_v59 = vsel %vm536_vm1, %v528_v8, 0.0 }
 0x199   : > { %v4867_v26 = vsel %vm1985_vm3, %v2801_v55, %v2797_v57  ;;  %v4871_v4 = vsel %vm1999_vm5, %v2732_v61, %v4820_v23  ;;  %v1484_v5 = vmul.f32 0.015625, %v1076_v2  ;;  %v1497_v47 = vmul.f32 0.015625, %v1115_v1  ;;  %v419_v2 = vld [vmem:[%s4137_s8 + $0x458] sm:$0xff] }
 0x19a   : > { %v1095_v57 = vsel %vm536_vm1, %v466_v7, 0.0 }
 0x19b   : > { %v2885_v12 = vrot.slane %v1484_v5, %v4302_v32  ;;  %1045 = vadd.xlane.f32.xlu1 %v1044_v46  ;;  %1003 = vadd.xlane.f32.xlu0 %v1002_v3  ;;  %v2950_v28 = vrot.slane %v1497_v47, %v4299_v30  ;;  %v405_v46 = vld [vmem:[%s4137_s8 + $0x3e8] sm:$0xff]  ;;  %v954_v47 = vsel %vm536_vm1, %v419_v2, 0.0 }
 0x19c   : > { %v1169_v14 = vpop.xlane.xlu1 %1168  ;;  %v1118_v16 = vpop.xlane.xlu0 %1117 }
 0x19d   : > { %v4879_v20 = vsel %vm1992_vm4, %v2885_v12, %v2881_v15  ;;  %v1515_v23 = vmul.f32 0.015625, %v1169_v14  ;;  %v1498_v21 = vmul.f32 0.015625, %v1118_v16  ;;  %v1188_v15 = vsel %vm536_vm1, %v497_v25, 0.0 }
 0x19e   : > { %v912_v12 = vsel %vm536_vm1, %v405_v46, 0.0 }
 0x19f   : > { %v3038_v29 = vrot.slane %v1515_v23, %v4308_v34  ;;  %v2954_v9 = vrot.slane %v1498_v21, %v4305_v33  ;;  %1138 = vadd.xlane.f32.xlu1 %v1137_v19  ;;  %1096 = vadd.xlane.f32.xlu0 %v1095_v57  ;;  %v450_v23 = vld [vmem:[%s4137_s8 + $0x550] sm:$0xff]  ;;  %v436_v21 = vld [vmem:[%s4137_s8 + $0x4e0] sm:$0xff] }
 0x1a0   : > { %v1262_v37 = vpop.xlane.xlu1 %1261  ;;  %v1259_v0 = vpop.xlane.xlu0 %1258 }
 0x1a1   : > { %v4889_v41 = vsel %vm1985_vm3, %v3038_v29, %v3034_v36  ;;  %v4892_v43 = vsel %vm1978_vm2, %v2954_v9, %v2950_v28  ;;  %v1546_v39 = vmul.f32 0.015625, %v1262_v37  ;;  %v1545_v48 = vmul.f32 0.015625, %v1259_v0 }
 0x1a2   : > { %v861_v36 = vsel %vm536_vm1, %v388_v49, 0.0  ;;  %v1005_v9 = vsel %vm536_vm1, %v436_v21, 0.0 }
 0x1a3   : > { %v3191_v27 = vrot.slane %v1546_v39, %v4305_v33  ;;  %v3187_v53 = vrot.slane %v1545_v48, %v4299_v30  ;;  %1231 = vadd.xlane.f32.xlu1 %v1230_v40  ;;  %1189 = vadd.xlane.f32.xlu0 %v1188_v15  ;;  %v481_v15 = vld [vmem:[%s4137_s8 + $0x648] sm:$0xff]  ;;  %v467_v39 = vld [vmem:[%s4137_s8 + $0x5d8] sm:$0xff] }
 0x1a4   : > { %v893_v54 = vpop.xlane.xlu1 %892  ;;  %v842_v58 = vpop.xlane.xlu0 %841 }
 0x1a5   : > { %v4901_v55 = vsel %vm1978_vm2, %v3191_v27, %v3187_v53  ;;  %v1423_v61 = vmul.f32 0.015625, %v893_v54  ;;  %v1406_v1 = vmul.f32 0.015625, %v842_v58  ;;  %v1098_v53 = vsel %vm536_vm1, %v467_v39, 0.0 }
 0x1a7   : > { %v2584_v3 = vrot.slane %v1423_v61, %v4336_v63  ;;  %v2500_v5 = vrot.slane %v1406_v1, %v4315_v44  ;;  %862 = vadd.xlane.f32.xlu1 %v861_v36  ;;  %1282 = vadd.xlane.f32.xlu0 %v1281_v59  ;;  %v512_v59 = vld [vmem:[%s4137_s8 + $0x740] sm:$0xff]  ;;  %v498_v61 = vld [vmem:[%s4137_s8 + $0x6d0] sm:$0xff] }
 0x1a8   : > { %v986_v6 = vpop.xlane.xlu1 %985  ;;  %v935_v7 = vpop.xlane.xlu0 %934 }
 0x1a9   : > { %v4911_v14 = vsel %vm2013_vm7, %v2584_v3, %v4858_v51  ;;  %v4915_v16 = vsel %vm2006_vm6, %v2500_v5, %v4844_v35  ;;  %v1454_v19 = vmul.f32 0.015625, %v986_v6  ;;  %v1437_v57 = vmul.f32 0.015625, %v935_v7 }
 0x1aa   : > { %v1047_v51 = vsel %vm536_vm1, %v450_v23, 0.0  ;;  %v1191_v5 = vsel %vm536_vm1, %v498_v61, 0.0 }
 0x1ab   : > { %v2737_v24 = vrot.slane %v1454_v19, %v4315_v44  ;;  %v2653_v25 = vrot.slane %v1437_v57, %v4318_v45  ;;  %955 = vadd.xlane.f32.xlu1 %v954_v47  ;;  %913 = vadd.xlane.f32.xlu0 %v912_v12  ;;  %v389_v12 = vld [vmem:[%s4137_s8 + $0x368] sm:$0xff] }
 0x1ac   : > { %v1079_v28 = vpop.xlane.xlu1 %1078  ;;  %v1028_v29 = vpop.xlane.xlu0 %1027  ;;  %v529_v19 = vld [vmem:[%s4137_s8 + $0x7c8] sm:$0xff] }
 0x1ad   : > { %v4925_v35 = vsel %vm2006_vm6, %v2737_v24, %v4871_v4  ;;  %v4929_v37 = vsel %vm1999_vm5, %v2653_v25, %v4854_v50  ;;  %v1485_v0 = vmul.f32 0.015625, %v1079_v28  ;;  %v1468_v40 = vmul.f32 0.015625, %v1028_v29 }
 0x1ae   : > { %v1140_v4 = vsel %vm536_vm1, %v481_v15, 0.0  ;;  %v1284_v25 = vsel %vm536_vm1, %v529_v19, 0.0 }
 0x1af   : > { %v2890_v48 = vrot.slane %v1485_v0, %v4318_v45  ;;  %v2806_v49 = vrot.slane %v1468_v40, %v4302_v32  ;;  %1048 = vadd.xlane.f32.xlu1 %v1047_v51  ;;  %1006 = vadd.xlane.f32.xlu0 %v1005_v9  ;;  %v420_v51 = vld [vmem:[%s4137_s8 + $0x460] sm:$0xff]  ;;  %v406_v9 = vld [vmem:[%s4137_s8 + $0x3f0] sm:$0xff] }
 0x1b0   : > { %v1172_v8 = vpop.xlane.xlu1 %1171  ;;  %v1121_v27 = vpop.xlane.xlu0 %1120  ;;  %v957_v15 = vsel %vm536_vm1, %v420_v51, 0.0  ;;  %v915_v39 = vsel %vm536_vm1, %v406_v9, 0.0 }
 0x1b1   : > { %v4939_v50 = vsel %vm1999_vm5, %v2890_v48, %v4879_v20  ;;  %v4943_v54 = vsel %vm1992_vm4, %v2806_v49, %v4867_v26  ;;  %v1516_v58 = vmul.f32 0.015625, %v1172_v8  ;;  %v1499_v36 = vmul.f32 0.015625, %v1121_v27 }
 0x1b2   : > { %v1233_v20 = vsel %vm536_vm1, %v512_v59, 0.0 }
 0x1b3   : > { %v3043_v1 = vrot.slane %v1516_v58, %v4302_v32  ;;  %v2959_v2 = vrot.slane %v1499_v36, %v4308_v34  ;;  %1141 = vadd.xlane.f32.xlu1 %v1140_v4  ;;  %1099 = vadd.xlane.f32.xlu0 %v1098_v53  ;;  %v451_v4 = vld [vmem:[%s4137_s8 + $0x558] sm:$0xff]  ;;  %v437_v53 = vld [vmem:[%s4137_s8 + $0x4e8] sm:$0xff] }
 0x1b4   : > { %v1214_v46 = vpop.xlane.xlu1 %1213  ;;  %v1211_v3 = vpop.xlane.xlu0 %1210 }
 0x1b5   : > { %v4953_v26 = vsel %vm1992_vm4, %v3043_v1, %v4889_v41  ;;  %v4957_v6 = vsel %vm1985_vm3, %v2959_v2, %v4892_v43  ;;  %v1530_v7 = vmul.f32 0.015625, %v1214_v46  ;;  %v1529_v47 = vmul.f32 0.015625, %v1211_v3 }
 0x1b6   : > { %v864_v41 = vsel %vm536_vm1, %v389_v12, 0.0  ;;  %v1008_v1 = vsel %vm536_vm1, %v437_v53, 0.0 }
 0x1b7   : > { %v3112_v57 = vrot.slane %v1530_v7, %v4305_v33  ;;  %v3108_v23 = vrot.slane %v1529_v47, %v4299_v30  ;;  %1234 = vadd.xlane.f32.xlu1 %v1233_v20  ;;  %1192 = vadd.xlane.f32.xlu0 %v1191_v5  ;;  %v482_v20 = vld [vmem:[%s4137_s8 + $0x650] sm:$0xff]  ;;  %v468_v5 = vld [vmem:[%s4137_s8 + $0x5e0] sm:$0xff] }
 0x1b8   : > { %v845_v21 = vpop.xlane.xlu1 %844  ;;  %v1265_v24 = vpop.xlane.xlu0 %1264 }
 0x1b9   : > { %v4966_v43 = vsel %vm1978_vm2, %v3112_v57, %v3108_v23  ;;  %v1407_v28 = vmul.f32 0.015625, %v845_v21  ;;  %v1547_v29 = vmul.f32 0.015625, %v1265_v24  ;;  %v1101_v57 = vsel %vm536_vm1, %v468_v5, 0.0 }
 0x1ba   : > { %vm6161_vm2 = vcmask 654912  }
 0x1bb   : > { %v2505_v33 = vrot.slane %v1407_v28, %v4336_v63  ;;  %v3196_v30 = vrot.slane %v1547_v29, %v4308_v34  ;;  %865 = vadd.xlane.f32.xlu1 %v864_v41  ;;  %1285 = vadd.xlane.f32.xlu0 %v1284_v25  ;;  %v513_v41 = vld [vmem:[%s4137_s8 + $0x748] sm:$0xff]  ;;  %v499_v25 = vld [vmem:[%s4137_s8 + $0x6d8] sm:$0xff] }
 0x1bc   : > { %v938_v0 = vpop.xlane.xlu1 %937  ;;  %v896_v40 = vpop.xlane.xlu0 %895 }
 0x1bd   : > { %v4976_v48 = vsel %vm2013_vm7, %v2505_v33, %v4915_v16  ;;  %v4980_v49 = vsel %vm1985_vm3, %v3196_v30, %v4901_v55  ;;  %v1438_v8 = vmul.f32 0.015625, %v938_v0  ;;  %v1424_v27 = vmul.f32 0.015625, %v896_v40 }
 0x1be   : > { %v1050_v16 = vsel %vm536_vm1, %v451_v4, 0.0  ;;  %v1194_v33 = vsel %vm536_vm1, %v499_v25, 0.0 }
 0x1bf   : > { %v2658_v58 = vrot.slane %v1438_v8, %v4315_v44  ;;  %v2589_v36 = vrot.slane %v1424_v27, %v4333_v62  ;;  %958 = vadd.xlane.f32.xlu1 %v957_v15  ;;  %916 = vadd.xlane.f32.xlu0 %v915_v39  ;;  %v390_v15 = vld [vmem:[%s4137_s8 + $0x370] sm:$0xff] }
 0x1c0   : > { %v1031_v59 = vpop.xlane.xlu1 %1030  ;;  %v989_v61 = vpop.xlane.xlu0 %988  ;;  %v530_v39 = vld [vmem:[%s4137_s8 + $0x7d0] sm:$0xff] }
 0x1c1   : > { %v4990_v55 = vsel %vm2006_vm6, %v2658_v58, %v4929_v37  ;;  %v4994_v2 = vsel %vm2020_vm8, %v2589_v36, %v4911_v14  ;;  %v1469_v46 = vmul.f32 0.015625, %v1031_v59  ;;  %v1455_v3 = vmul.f32 0.015625, %v989_v61  ;;  %v421_v61 = vld [vmem:[%s4137_s8 + $0x468] sm:$0xff] }
 0x1c2   : > { %v1143_v37 = vsel %vm536_vm1, %v482_v20, 0.0  ;;  %v1287_v58 = vsel %vm536_vm1, %v530_v39, 0.0 }
 0x1c3   : > { %v2811_v7 = vrot.slane %v1469_v46, %v4318_v45  ;;  %v2742_v47 = vrot.slane %v1455_v3, %v4336_v63  ;;  %1051 = vadd.xlane.f32.xlu1 %v1050_v16  ;;  %1009 = vadd.xlane.f32.xlu0 %v1008_v1  ;;  %v407_v16 = vld [vmem:[%s4137_s8 + $0x3f8] sm:$0xff] }
 0x1c4   : > { %v1124_v12 = vpop.xlane.xlu1 %1123  ;;  %v1082_v19 = vpop.xlane.xlu0 %1081  ;;  %v918_v5 = vsel %vm536_vm1, %v407_v16, 0.0 }
 0x1c5   : > { %v5004_v14 = vsel %vm1999_vm5, %v2811_v7, %v4943_v54  ;;  %v5008_v23 = vsel %vm2013_vm7, %v2742_v47, %v4925_v35  ;;  %v1500_v21 = vmul.f32 0.015625, %v1124_v12  ;;  %v1486_v24 = vmul.f32 0.015625, %v1082_v19  ;;  %v452_v19 = vld [vmem:[%s4137_s8 + $0x560] sm:$0xff] }
 0x1c6   : > { %v1236_v54 = vsel %vm536_vm1, %v513_v41, 0.0 }
 0x1c7   : > { %v2964_v28 = vrot.slane %v1500_v21, %v4302_v32  ;;  %v2895_v29 = vrot.slane %v1486_v24, %v4315_v44  ;;  %1144 = vadd.xlane.f32.xlu1 %v1143_v37  ;;  %1102 = vadd.xlane.f32.xlu0 %v1101_v57  ;;  %v438_v37 = vld [vmem:[%s4137_s8 + $0x4f0] sm:$0xff] }
 0x1c8   : > { %v1217_v51 = vpop.xlane.xlu1 %1216  ;;  %v1175_v9 = vpop.xlane.xlu0 %1174  ;;  %v1011_v25 = vsel %vm536_vm1, %v438_v37, 0.0 }
 0x1c9   : > { %v5018_v35 = vsel %vm1992_vm4, %v2964_v28, %v4957_v6  ;;  %v5022_v30 = vsel %vm2006_vm6, %v2895_v29, %v4939_v50  ;;  %v1531_v0 = vmul.f32 0.015625, %v1217_v51  ;;  %v1517_v40 = vmul.f32 0.015625, %v1175_v9  ;;  %v483_v9 = vld [vmem:[%s4137_s8 + $0x658] sm:$0xff] }
 0x1ca   : > { %v867_v6 = vsel %vm536_vm1, %v390_v15, 0.0 }
 0x1cb   : > { %v3117_v8 = vrot.slane %v1531_v0, %v4308_v34  ;;  %v3048_v27 = vrot.slane %v1517_v40, %v4318_v45  ;;  %1237 = vadd.xlane.f32.xlu1 %v1236_v54  ;;  %1195 = vadd.xlane.f32.xlu0 %v1194_v33  ;;  %v469_v54 = vld [vmem:[%s4137_s8 + $0x5e8] sm:$0xff] }
 0x1cc   : > { %v848_v4 = vpop.xlane.xlu1 %847  ;;  %v1268_v53 = vpop.xlane.xlu0 %1267  ;;  %v1104_v39 = vsel %vm536_vm1, %v469_v54, 0.0 }
 0x1cd   : > { %v5032_v50 = vsel %vm1985_vm3, %v3117_v8, %v4966_v43  ;;  %v5036_v36 = vsel %vm1999_vm5, %v3048_v27, %v4953_v26  ;;  %v1408_v59 = vmul.f32 0.015625, %v848_v4  ;;  %v1548_v34 = vmul.f32 0.015625, %v1268_v53  ;;  %v514_v53 = vld [vmem:[%s4137_s8 + $0x750] sm:$0xff]  ;;  %vm6162_vm3 = vmmov %vm6161_vm2 }
 0x1ce   : > { %v960_v43 = vsel %vm536_vm1, %v421_v61, 0.0 }
 0x1cf   : > { %v2510_v1 = vrot.slane %v1408_v59, %v4333_v62  ;;  %v3201_v46 = vrot.slane %v1548_v34, %v4302_v32  ;;  %868 = vadd.xlane.f32.xlu1 %v867_v6  ;;  %1288 = vadd.xlane.f32.xlu0 %v1287_v58  ;;  %v500_v6 = vld [vmem:[%s4137_s8 + $0x6e0] sm:$0xff] }
 0x1d0   : > { %v941_v3 = vpop.xlane.xlu1 %940  ;;  %v899_v20 = vpop.xlane.xlu0 %898  ;;  %v1197_v16 = vsel %vm536_vm1, %v500_v6, 0.0  ;;  %v1620_v6 = vld [vmem:[%s6147_s1 + $0x1d8] sm:$0xff] }
 0x1d1   : > { %v5046_v26 = vsel %vm2020_vm8, %v2510_v1, %v4976_v48  ;;  %v5050_v7 = vsel %vm1992_vm4, %v3201_v46, %v4980_v49  ;;  %v1439_v47 = vmul.f32 0.015625, %v941_v3  ;;  %v1425_v12 = vmul.f32 0.015625, %v899_v20  ;;  %v391_v20 = vld [vmem:[%s4137_s8 + $0x378] sm:$0xff] }
 0x1d2   : > { %v1053_v48 = vsel %vm536_vm1, %v452_v19, 0.0 }
 0x1d3   : > { %v2663_v57 = vrot.slane %v1439_v47, %v4336_v63  ;;  %v2594_v21 = vrot.slane %v1425_v12, %v4356_v22  ;;  %961 = vadd.xlane.f32.xlu1 %v960_v43  ;;  %919 = vadd.xlane.f32.xlu0 %v918_v5  ;;  %v531_v43 = vld [vmem:[%s4137_s8 + $0x7d8] sm:$0xff] }
 0x1d4   : > { %v1034_v24 = vpop.xlane.xlu1 %1033  ;;  %v992_v41 = vpop.xlane.xlu0 %991  ;;  %v1290_v37 = vsel %vm536_vm1, %v531_v43, 0.0  ;;  %v1613_v43 = vld [vmem:[%s6147_s1 + $0x1a0] sm:$0xff] }
 0x1d5   : > { %v5060_v49 = vsel %vm2013_vm7, %v2663_v57, %v4990_v55  ;;  %v5064_v28 = vsel %vm2027_vm9, %v2594_v21, %v4994_v2  ;;  %v1470_v29 = vmul.f32 0.015625, %v1034_v24  ;;  %v1456_v51 = vmul.f32 0.015625, %v992_v41  ;;  %v439_v24 = vld [vmem:[%s4137_s8 + $0x4f8] sm:$0xff]  ;;  %v422_v41 = vld [vmem:[%s4137_s8 + $0x470] sm:$0xff] }
 0x1d6   : > { %v1146_v55 = vsel %vm536_vm1, %v483_v9, 0.0  ;;  %v1014_v9 = vsel %vm536_vm1, %v439_v24, 0.0  ;;  %v963_v54 = vsel %vm536_vm1, %v422_v41, 0.0 }
 0x1d7   : > { %v2816_v33 = vrot.slane %v1470_v29, %v4315_v44  ;;  %v2747_v0 = vrot.slane %v1456_v51, %v4333_v62  ;;  %1054 = vadd.xlane.f32.xlu1 %v1053_v48  ;;  %1012 = vadd.xlane.f32.xlu0 %v1011_v25 }
 0x1d8   : > { %v1127_v40 = vpop.xlane.xlu1 %1126  ;;  %v1085_v15 = vpop.xlane.xlu0 %1084 }
 0x1d9   : > { %v5074_v2 = vsel %vm2006_vm6, %v2816_v33, %v5004_v14  ;;  %v5078_v8 = vsel %vm2020_vm8, %v2747_v0, %v5008_v23  ;;  %v1501_v27 = vmul.f32 0.015625, %v1127_v40  ;;  %v1487_v4 = vmul.f32 0.015625, %v1085_v15  ;;  %v470_v33 = vld [vmem:[%s4137_s8 + $0x5f0] sm:$0xff]  ;;  %v1621_v0 = vld [vmem:[%s6147_s1 + $0x1e0] sm:$0xff] }
 0x1da   : > { %v1239_v14 = vsel %vm536_vm1, %v514_v53, 0.0  ;;  %v1623_v40 = vld [vmem:[%s6147_s1 + $0x1f0] sm:$0xff]  ;;  %v1618_v53 = vld [vmem:[%s6147_s1 + $0x1c8] sm:$0xff] }
 0x1db   : > { %v2969_v58 = vrot.slane %v1501_v27, %v4318_v45  ;;  %v2900_v59 = vrot.slane %v1487_v4, %v4336_v63  ;;  %1147 = vadd.xlane.f32.xlu1 %v1146_v55  ;;  %1105 = vadd.xlane.f32.xlu0 %v1104_v39  ;;  %v453_v4 = vld [vmem:[%s4137_s8 + $0x568] sm:$0xff] }
 0x1dc   : > { %v1220_v34 = vpop.xlane.xlu1 %1219  ;;  %v1178_v61 = vpop.xlane.xlu0 %1177 }
 0x1dd   : > { %v5088_v23 = vsel %vm1999_vm5, %v2969_v58, %v5018_v35  ;;  %v5092_v1 = vsel %vm2013_vm7, %v2900_v59, %v5022_v30  ;;  %v1532_v46 = vmul.f32 0.015625, %v1220_v34  ;;  %v1518_v3 = vmul.f32 0.015625, %v1178_v61  ;;  %v1614_v34 = vld [vmem:[%s6147_s1 + $0x1a8] sm:$0xff]  ;;  %v1616_v61 = vld [vmem:[%s6147_s1 + $0x1b8] sm:$0xff] }
 0x1de   : > { %v870_v35 = vsel %vm536_vm1, %v391_v20, 0.0  ;;  %v501_v20 = vld [vmem:[%s4137_s8 + $0x6e8] sm:$0xff] }
 0x1df   : > { %v3122_v5 = vrot.slane %v1532_v46, %v4302_v32  ;;  %v3053_v47 = vrot.slane %v1518_v3, %v4315_v44  ;;  %1240 = vadd.xlane.f32.xlu1 %v1239_v14  ;;  %1198 = vadd.xlane.f32.xlu0 %v1197_v16  ;;  %v1107_v46 = vsel %vm536_vm1, %v470_v33, 0.0  ;;  %v1056_v3 = vsel %vm536_vm1, %v453_v4, 0.0  ;;  %v1607_v4 = vld [vmem:[%s6147_s1 + $0x170] sm:$0xff] }
 0x1e0   : > { %v851_v12 = vpop.xlane.xlu1 %850  ;;  %v1271_v19 = vpop.xlane.xlu0 %1270 }
 0x1e1   : > { %v5102_v30 = vsel %vm1992_vm4, %v3122_v5, %v5032_v50  ;;  %v5106_v57 = vsel %vm2006_vm6, %v3053_v47, %v5036_v36  ;;  %v1409_v32 = vmul.f32 0.015625, %v851_v12  ;;  %v1549_v21 = vmul.f32 0.015625, %v1271_v19  ;;  %v1622_v50 = vld [vmem:[%s6147_s1 + $0x1e8] sm:$0xff]  ;;  %v1624_v36 = vld [vmem:[%s6147_s1 + $0x1f8] sm:$0xff]  ;;  %v1615_v5 = vld [vmem:[%s6147_s1 + $0x1b0] sm:$0xff] }
 0x1e2   : > { %3286 = vmatprep.subr.mxu0 %v1622_v50  ;;  %3357 = vmatprep.subr.mxu1 %v1624_v36  ;;  %vm6163_vm4 = vmmov %vm6161_vm2 }
 0x1e3   : > { %v2515_v48 = vrot.slane %v1409_v32, %v4356_v22  ;;  %v3206_v25 = vrot.slane %v1549_v21, %v4318_v45  ;;  %871 = vadd.xlane.f32.xlu1 %v870_v35  ;;  %1291 = vadd.xlane.f32.xlu0 %v1290_v37  ;;  %v484_v37 = vld [vmem:[%s4137_s8 + $0x660] sm:$0xff]  ;;  %v1610_v32 = vld [vmem:[%s6147_s1 + $0x188] sm:$0xff]  ;;  %v1612_v21 = vld [vmem:[%s6147_s1 + $0x198] sm:$0xff] }
 0x1e4   : > { %v944_v29 = vpop.xlane.xlu1 %943  ;;  %v902_v51 = vpop.xlane.xlu0 %901  ;;  %3287 = vmatpush1.msra.mxu0 %v1621_v0  ;;  %3358 = vmatpush1.msra.mxu1 %v1623_v40 }
 0x1e5   : > { %v5129_v15 = vsel %vm2027_vm9, %v2515_v48, %v5046_v26  ;;  %v5133_v55 = vsel %vm1999_vm5, %v3206_v25, %v5050_v7  ;;  %v1440_v39 = vmul.f32 0.015625, %v944_v29  ;;  %v1426_v27 = vmul.f32 0.015625, %v902_v51  ;;  %3288 = vmatprep.subr.mxu0 %v1618_v53  ;;  %3359 = vmatprep.subr.mxu1 %v1620_v6  ;;  %v1617_v26 = vld [vmem:[%s6147_s1 + $0x1c0] sm:$0xff]  ;;  %v1619_v7 = vld [vmem:[%s6147_s1 + $0x1d0] sm:$0xff]  ;;  %v1606_v48 = vld [vmem:[%s6147_s1 + $0x168] sm:$0xff] }
 0x1e6   : > { %3289 = vmatpush1.msra.mxu0 %v1617_v26  ;;  %3360 = vmatpush1.msra.mxu1 %v1619_v7  ;;  %v1608_v25 = vld [vmem:[%s6147_s1 + $0x178] sm:$0xff]  ;;  %v1200_v29 = vsel %vm536_vm1, %v501_v20, 0.0  ;;  %v1149_v51 = vsel %vm536_vm1, %v484_v37, 0.0  ;;  %v1601_v26 = vld [vmem:[%s6147_s1 + $0x140] sm:$0xff]  ;;  %v1603_v7 = vld [vmem:[%s6147_s1 + $0x150] sm:$0xff] }
 0x1e7   : > { %v2668_v58 = vrot.slane %v1440_v39, %v4333_v62  ;;  %v2599_v59 = vrot.slane %v1426_v27, %v4350_v17  ;;  %1015 = vadd.xlane.f32.xlu1 %v1014_v9  ;;  %964 = vadd.xlane.f32.xlu0 %v963_v54  ;;  %v532_v9 = vld [vmem:[%s4137_s8 + $0x7e0] sm:$0xff]  ;;  %v515_v39 = vld [vmem:[%s4137_s8 + $0x758] sm:$0xff] }
 0x1e8   : > { %v1037_v14 = vpop.xlane.xlu1 %1036  ;;  %v995_v16 = vpop.xlane.xlu0 %994  ;;  %3290 = vmatprep.subr.mxu0 %v1614_v34  ;;  %3361 = vmatprep.subr.mxu1 %v1616_v61  ;;  %v1605_v27 = vld [vmem:[%s6147_s1 + $0x160] sm:$0xff]  ;;  %v1293_v34 = vsel %vm536_vm1, %v532_v9, 0.0  ;;  %v1242_v61 = vsel %vm536_vm1, %v515_v39, 0.0  ;;  %v1595_v9 = vld [vmem:[%s6147_s1 + $0x110] sm:$0xff] }
 0x1e9   : > { %v5167_v47 = vsel %vm2020_vm8, %v2668_v58, %v5060_v49  ;;  %v5171_v12 = vsel %vm6161_vm2, %v2599_v59, %v5064_v28  ;;  %v1471_v19 = vmul.f32 0.015625, %v1037_v14  ;;  %v1457_v35 = vmul.f32 0.015625, %v995_v16  ;;  %3291 = vmatpush1.msra.mxu0 %v1613_v43  ;;  %3362 = vmatpush1.msra.mxu1 %v1615_v5  ;;  %v1609_v49 = vld [vmem:[%s6147_s1 + $0x180] sm:$0xff]  ;;  %v1611_v28 = vld [vmem:[%s6147_s1 + $0x190] sm:$0xff]  ;;  %v423_v43 = vld [vmem:[%s4137_s8 + $0x478] sm:$0xff] }
 0x1ea   : > { %3292 = vmatprep.subr.mxu0 %v1610_v32  ;;  %3363 = vmatprep.subr.mxu1 %v1612_v21  ;;  %v454_v14 = vld [vmem:[%s4137_s8 + $0x570] sm:$0xff]  ;;  %v1598_v5 = vld [vmem:[%s6147_s1 + $0x128] sm:$0xff]  ;;  %v1596_v21 = vld [vmem:[%s6147_s1 + $0x118] sm:$0xff] }
 0x1eb   : > { %v2821_v24 = vrot.slane %v1471_v19, %v4336_v63  ;;  %v2752_v41 = vrot.slane %v1457_v35, %v4356_v22  ;;  %1108 = vadd.xlane.f32.xlu1 %v1107_v46  ;;  %1057 = vadd.xlane.f32.xlu0 %v1056_v3  ;;  %v1600_v19 = vld [vmem:[%s6147_s1 + $0x138] sm:$0xff]  ;;  %v1594_v32 = vld [vmem:[%s6147_s1 + $0x108] sm:$0xff]  ;;  %v1589_v39 = vld [vmem:[%s6147_s1 + $0xe0] sm:$0xff] }
 0x1ec   : > { %v1130_v50 = vpop.xlane.xlu1 %1129  ;;  %v1088_v36 = vpop.xlane.xlu0 %1087  ;;  %3293 = vmatpush1.msra.mxu0 %v1609_v49  ;;  %3364 = vmatpush1.msra.mxu1 %v1611_v28 }
 0x1ed   : > { %v5199_v54 = vsel %vm2013_vm7, %v2821_v24, %v5074_v2  ;;  %v5203_v33 = vsel %vm2027_vm9, %v2752_v41, %v5078_v8  ;;  %v1502_v0 = vmul.f32 0.015625, %v1130_v50  ;;  %v1488_v40 = vmul.f32 0.015625, %v1088_v36  ;;  %3294 = vmatprep.subr.mxu0 %v1606_v48  ;;  %3365 = vmatprep.subr.mxu1 %v1608_v25  ;;  %v1602_v2 = vld [vmem:[%s6147_s1 + $0x148] sm:$0xff]  ;;  %v1604_v8 = vld [vmem:[%s6147_s1 + $0x158] sm:$0xff] }
 0x1ee   : > { %3295 = vmatpush1.msra.mxu0 %v1605_v27  ;;  %3366 = vmatpush1.msra.mxu1 %v1607_v4  ;;  %v1059_v24 = vsel %vm536_vm1, %v454_v14, 0.0  ;;  %v966_v41 = vsel %vm536_vm1, %v423_v43, 0.0  ;;  %v1591_v27 = vld [vmem:[%s6147_s1 + $0xf0] sm:$0xff]  ;;  %v1588_v14 = vld [vmem:[%s6147_s1 + $0xd8] sm:$0xff]  ;;  %v1582_v43 = vld [vmem:[%s6147_s1 + $0xa8] sm:$0xff] }
 0x1ef   : > { %v2974_v53 = vrot.slane %v1502_v0, %v4315_v44  ;;  %v2905_v6 = vrot.slane %v1488_v40, %v4333_v62  ;;  %1201 = vadd.xlane.f32.xlu1 %v1200_v29  ;;  %1150 = vadd.xlane.f32.xlu0 %v1149_v51  ;;  %v471_v29 = vld [vmem:[%s4137_s8 + $0x5f8] sm:$0xff]  ;;  %v1593_v51 = vld [vmem:[%s6147_s1 + $0x100] sm:$0xff] }
 0x1f0   : > { %v1223_v58 = vpop.xlane.xlu1 %1222  ;;  %v1181_v59 = vpop.xlane.xlu0 %1180  ;;  %3296 = vmatprep.subr.mxu0 %v1602_v2  ;;  %3367 = vmatprep.subr.mxu1 %v1604_v8 }
 0x1f1   : > { %v5231_v16 = vsel %vm2006_vm6, %v2974_v53, %v5088_v23  ;;  %v5235_v46 = vsel %vm2020_vm8, %v2905_v6, %v5092_v1  ;;  %v1533_v3 = vmul.f32 0.015625, %v1223_v58  ;;  %v1519_v20 = vmul.f32 0.015625, %v1181_v59  ;;  %3297 = vmatpush1.msra.mxu0 %v1601_v26  ;;  %3368 = vmatpush1.msra.mxu1 %v1603_v7  ;;  %v1597_v23 = vld [vmem:[%s6147_s1 + $0x120] sm:$0xff]  ;;  %v1599_v1 = vld [vmem:[%s6147_s1 + $0x130] sm:$0xff] }
 0x1f2   : > { %3298 = vmatprep.subr.mxu0 %v1598_v5  ;;  %3369 = vmatprep.subr.mxu1 %v1600_v19  ;;  %v1110_v53 = vsel %vm536_vm1, %v471_v29, 0.0  ;;  %v516_v6 = vld [vmem:[%s4137_s8 + $0x760] sm:$0xff]  ;;  %v1584_v5 = vld [vmem:[%s6147_s1 + $0xb8] sm:$0xff] }
 0x1f3   : > { %v3127_v35 = vrot.slane %v1533_v3, %v4318_v45  ;;  %v3058_v37 = vrot.slane %v1519_v20, %v4336_v63  ;;  %1294 = vadd.xlane.f32.xlu1 %v1293_v34  ;;  %1243 = vadd.xlane.f32.xlu0 %v1242_v61  ;;  %v485_v45 = vld [vmem:[%s4137_s8 + $0x668] sm:$0xff]  ;;  %v502_v34 = vld [vmem:[%s4137_s8 + $0x6f0] sm:$0xff]  ;;  %v1577_v29 = vld [vmem:[%s6147_s1 + $0x80] sm:$0xff] }
 0x1f4   : > { %v854_v49 = vpop.xlane.xlu1 %853  ;;  %v1274_v28 = vpop.xlane.xlu0 %1273  ;;  %3299 = vmatpush1.msra.mxu0 %v1597_v23  ;;  %3370 = vmatpush1.msra.mxu1 %v1599_v1  ;;  %v1152_v8 = vsel %vm536_vm1, %v485_v45, 0.0  ;;  %v1586_v61 = vld [vmem:[%s6147_s1 + $0xc8] sm:$0xff]  ;;  %v1245_v1 = vsel %vm536_vm1, %v516_v6, 0.0  ;;  %v1583_v45 = vld [vmem:[%s6147_s1 + $0xb0] sm:$0xff]  ;;  %v1576_v6 = vld [vmem:[%s6147_s1 + $0x78] sm:$0xff] }
 0x1f5   : > { %v5263_v48 = vsel %vm1999_vm5, %v3127_v35, %v5102_v30  ;;  %v5267_v25 = vsel %vm2013_vm7, %v3058_v37, %v5106_v57  ;;  %v1410_v50 = vmul.f32 0.015625, %v854_v49  ;;  %v1550_v36 = vmul.f32 0.015625, %v1274_v28  ;;  %3300 = vmatprep.subr.mxu0 %v1594_v32  ;;  %3371 = vmatprep.subr.mxu1 %v1596_v21  ;;  %v1590_v30 = vld [vmem:[%s6147_s1 + $0xe8] sm:$0xff]  ;;  %v1592_v57 = vld [vmem:[%s6147_s1 + $0xf8] sm:$0xff]  ;;  %vm6164_vm5 = vmmov %vm6161_vm2 }
 0x1f6   : > { %3301 = vmatpush1.msra.mxu0 %v1593_v51  ;;  %3372 = vmatpush1.msra.mxu1 %v1595_v9  ;;  %v1203_v35 = vsel %vm536_vm1, %v502_v34, 0.0  ;;  %v455_v37 = vld [vmem:[%s4137_s8 + $0x578] sm:$0xff]  ;;  %v1579_v51 = vld [vmem:[%s6147_s1 + $0x90] sm:$0xff]  ;;  %v1570_v34 = vld [vmem:[%s6147_s1 + $0x48] sm:$0xff] }
 0x1f7   : > { %v2520_v0 = vrot.slane %v1410_v50, %v4350_v17  ;;  %v3211_v40 = vrot.slane %v1550_v36, %v4315_v44  ;;  %1060 = vadd.xlane.f32.xlu1 %v1059_v24  ;;  %967 = vadd.xlane.f32.xlu0 %v966_v41  ;;  %v533_v24 = vld [vmem:[%s4137_s8 + $0x7e8] sm:$0xff]  ;;  %v1581_v41 = vld [vmem:[%s6147_s1 + $0xa0] sm:$0xff] }
 0x1f8   : > { %v947_v4 = vpop.xlane.xlu1 %946  ;;  %v905_v2 = vpop.xlane.xlu0 %904  ;;  %3302 = vmatprep.subr.mxu0 %v1590_v30  ;;  %3373 = vmatprep.subr.mxu1 %v1592_v57  ;;  %v1062_v57 = vsel %vm536_vm1, %v455_v37, 0.0  ;;  %v1571_v37 = vld [vmem:[%s6147_s1 + $0x50] sm:$0xff] }
 0x1f9   : > { %v5295_v26 = vsel %vm6162_vm3, %v2520_v0, %v5129_v15  ;;  %v5299_v7 = vsel %vm2006_vm6, %v3211_v40, %v5133_v55  ;;  %v1441_v58 = vmul.f32 0.015625, %v947_v4  ;;  %v1427_v59 = vmul.f32 0.015625, %v905_v2  ;;  %3303 = vmatpush1.msra.mxu0 %v1589_v39  ;;  %3374 = vmatpush1.msra.mxu1 %v1591_v27  ;;  %v1585_v15 = vld [vmem:[%s6147_s1 + $0xc0] sm:$0xff]  ;;  %v1587_v55 = vld [vmem:[%s6147_s1 + $0xd0] sm:$0xff]  ;;  %v503_v40 = vld [vmem:[%s4137_s8 + $0x6f8] sm:$0xff] }
 0x1fa   : > { %3304 = vmatprep.subr.mxu0 %v1586_v61  ;;  %3375 = vmatprep.subr.mxu1 %v1588_v14  ;;  %v1296_v0 = vsel %vm536_vm1, %v533_v24, 0.0  ;;  %v1572_v61 = vld [vmem:[%s6147_s1 + $0x58] sm:$0xff]  ;;  %v1565_v24 = vld [vmem:[%s6147_s1 + $0x20] sm:$0xff] }
 0x1fb   : > { %v2673_v3 = vrot.slane %v1441_v58, %v4356_v22  ;;  %v2604_v20 = vrot.slane %v1427_v59, %v4372_v42  ;;  %1153 = vadd.xlane.f32.xlu1 %v1152_v8  ;;  %1111 = vadd.xlane.f32.xlu0 %v1110_v53  ;;  %v486_v8 = vld [vmem:[%s4137_s8 + $0x670] sm:$0xff]  ;;  %v1574_v53 = vld [vmem:[%s6147_s1 + $0x68] sm:$0xff] }
 0x1fc   : > { %v1040_v19 = vpop.xlane.xlu1 %1039  ;;  %v998_v23 = vpop.xlane.xlu0 %997  ;;  %3305 = vmatpush1.msra.mxu0 %v1585_v15  ;;  %3376 = vmatpush1.msra.mxu1 %v1587_v55  ;;  %v1206_v55 = vsel %vm536_vm1, %v503_v40, 0.0 }
 0x1fd   : > { %v5327_v32 = vsel %vm2027_vm9, %v2673_v3, %v5167_v47  ;;  %v5331_v21 = vsel %vm2041_vm11, %v2604_v20, %v5171_v12  ;;  %v1472_v49 = vmul.f32 0.015625, %v1040_v19  ;;  %v1458_v28 = vmul.f32 0.015625, %v998_v23  ;;  %3306 = vmatprep.subr.mxu0 %v1582_v43  ;;  %3377 = vmatprep.subr.mxu1 %v1584_v5  ;;  %v1578_v47 = vld [vmem:[%s6147_s1 + $0x88] sm:$0xff]  ;;  %v1580_v12 = vld [vmem:[%s6147_s1 + $0x98] sm:$0xff]  ;;  %v534_v20 = vld [vmem:[%s4137_s8 + $0x7f0] sm:$0xff] }
 0x1fe   : > { %3307 = vmatpush1.msra.mxu0 %v1581_v41  ;;  %3378 = vmatpush1.msra.mxu1 %v1583_v45  ;;  %v1155_v3 = vsel %vm536_vm1, %v486_v8, 0.0  ;;  %v1567_v41 = vld [vmem:[%s6147_s1 + $0x30] sm:$0xff]  ;;  %v1688_v8 = vld [vmem:[%s6147_s1 + $0x3f8] sm:$0xff] }
 0x1ff   : > { %v2826_v50 = vrot.slane %v1472_v49, %v4333_v62  ;;  %v2757_v36 = vrot.slane %v1458_v28, %v4350_v17  ;;  %1246 = vadd.xlane.f32.xlu1 %v1245_v1  ;;  %1204 = vadd.xlane.f32.xlu0 %v1203_v35  ;;  %v517_v1 = vld [vmem:[%s4137_s8 + $0x768] sm:$0xff]  ;;  %v1569_v35 = vld [vmem:[%s6147_s1 + $0x40] sm:$0xff] }
 0x200   : > { %v1133_v9 = vpop.xlane.xlu1 %1132  ;;  %v1091_v30 = vpop.xlane.xlu0 %1090  ;;  %3308 = vmatprep.subr.mxu0 %v1578_v47  ;;  %3379 = vmatprep.subr.mxu1 %v1580_v12  ;;  %v1299_v12 = vsel %vm536_vm1, %v534_v20, 0.0 }
 0x201   : > { %v5359_v39 = vsel %vm2020_vm8, %v2826_v50, %v5199_v54  ;;  %v5363_v27 = vsel %vm6163_vm4, %v2757_v36, %v5203_v33  ;;  %v1503_v4 = vmul.f32 0.015625, %v1133_v9  ;;  %v1489_v2 = vmul.f32 0.015625, %v1091_v30  ;;  %3309 = vmatpush1.msra.mxu0 %v1577_v29  ;;  %3380 = vmatpush1.msra.mxu1 %v1579_v51  ;;  %v1573_v54 = vld [vmem:[%s6147_s1 + $0x60] sm:$0xff]  ;;  %v1575_v33 = vld [vmem:[%s6147_s1 + $0x70] sm:$0xff]  ;;  %v487_v30 = vld [vmem:[%s4137_s8 + $0x678] sm:$0xff] }
 0x202   : > { %3310 = vmatprep.subr.mxu0 %v1574_v53  ;;  %3381 = vmatprep.subr.mxu1 %v1576_v6  ;;  %v1248_v50 = vsel %vm536_vm1, %v517_v1, 0.0  ;;  %v1683_v1 = vld [vmem:[%s6147_s1 + $0x3d0] sm:$0xff] }
 0x203   : > { %v2979_v58 = vrot.slane %v1503_v4, %v4336_v63  ;;  %v2910_v59 = vrot.slane %v1489_v2, %v4356_v22  ;;  %1063 = vadd.xlane.f32.xlu1 %v1062_v57  ;;  %1297 = vadd.xlane.f32.xlu0 %v1296_v0  ;;  %v1562_v57 = vld [vmem:[%s6147_s1 + $0x8] sm:$0xff]  ;;  %v1564_v0 = vld [vmem:[%s6147_s1 + $0x18] sm:$0xff] }
 0x204   : > { %v1226_v14 = vpop.xlane.xlu1 %1225  ;;  %v1184_v15 = vpop.xlane.xlu0 %1183  ;;  %3311 = vmatpush1.msra.mxu0 %v1573_v54  ;;  %3382 = vmatpush1.msra.mxu1 %v1575_v33  ;;  %v1686_v2 = vld [vmem:[%s6147_s1 + $0x3e8] sm:$0xff]  ;;  %v1158_v33 = vsel %vm536_vm1, %v487_v30, 0.0 }
 0x205   : > { %v5391_v43 = vsel %vm2013_vm7, %v2979_v58, %v5231_v16  ;;  %v5395_v5 = vsel %vm2027_vm9, %v2910_v59, %v5235_v46  ;;  %v1534_v19 = vmul.f32 0.015625, %v1226_v14  ;;  %v1520_v23 = vmul.f32 0.015625, %v1184_v15  ;;  %3312 = vmatprep.subr.mxu0 %v1570_v34  ;;  %3383 = vmatprep.subr.mxu1 %v1572_v61  ;;  %v1566_v16 = vld [vmem:[%s6147_s1 + $0x28] sm:$0xff]  ;;  %v1568_v46 = vld [vmem:[%s6147_s1 + $0x38] sm:$0xff] }
 0x206   : > { %3313 = vmatpush1.msra.mxu0 %v1569_v35  ;;  %3384 = vmatpush1.msra.mxu1 %v1571_v37  ;;  %v519_v58 = vld [vmem:[%s4137_s8 + $0x778] sm:$0xff] }
 0x207   : > { %v3132_v49 = vrot.slane %v1534_v19, %v4315_v44  ;;  %v3063_v28 = vrot.slane %v1520_v23, %v4333_v62  ;;  %1207 = vadd.xlane.f32.xlu1 %v1206_v55  ;;  %1156 = vadd.xlane.f32.xlu0 %v1155_v3  ;;  %v518_v44 = vld [vmem:[%s4137_s8 + $0x770] sm:$0xff]  ;;  %v535_v15 = vld [vmem:[%s4137_s8 + $0x7f8] sm:$0xff]  ;;  %v1685_v55 = vld [vmem:[%s6147_s1 + $0x3e0] sm:$0xff] }
 0x208   : > { %v857_v45 = vpop.xlane.xlu1 %856  ;;  %v1277_v47 = vpop.xlane.xlu0 %1276  ;;  %3314 = vmatprep.subr.mxu0 %v1566_v16  ;;  %3385 = vmatprep.subr.mxu1 %v1568_v46  ;;  %v1251_v54 = vsel %vm536_vm1, %v518_v44, 0.0  ;;  %v1687_v3 = vld [vmem:[%s6147_s1 + $0x3f0] sm:$0xff]  ;;  %v1681_v23 = vld [vmem:[%s6147_s1 + $0x3c0] sm:$0xff]  ;;  %v1254_v16 = vsel %vm536_vm1, %v519_v58, 0.0  ;;  %v1302_v46 = vsel %vm536_vm1, %v535_v15, 0.0  ;;  %v1674_v44 = vld [vmem:[%s6147_s1 + $0x388] sm:$0xff] }
 0x209   : > { %v5423_v36 = vsel %vm2006_vm6, %v3132_v49, %v5263_v48  ;;  %v5427_v29 = vsel %vm2020_vm8, %v3063_v28, %v5267_v25  ;;  %v1411_v51 = vmul.f32 0.015625, %v857_v45  ;;  %v1551_v9 = vmul.f32 0.015625, %v1277_v47  ;;  %3315 = vmatpush1.msra.mxu0 %v1565_v24  ;;  %3386 = vmatpush1.msra.mxu1 %v1567_v41  ;;  %v1561_v48 = vld [vmem:[%s6147_s1] sm:$0xff]  ;;  %v1563_v25 = vld [vmem:[%s6147_s1 + $0x10] sm:$0xff]  ;;  %vm6165_vm6 = vmmov %vm6160_vm12 }
 0x20a   : > { %3316 = vmatprep.subr.mxu0 %v1562_v57  ;;  %3387 = vmatprep.subr.mxu1 %v1564_v0  ;;  %v1678_v45 = vld [vmem:[%s6147_s1 + $0x3a8] sm:$0xff]  ;;  %v1680_v47 = vld [vmem:[%s6147_s1 + $0x3b8] sm:$0xff]  ;;  %v1673_v57 = vld [vmem:[%s6147_s1 + $0x380] sm:$0xff] }
 0x20b   : > { %v2525_v40 = vrot.slane %v1411_v51, %v4372_v42  ;;  %v3216_v4 = vrot.slane %v1551_v9, %v4336_v63  ;;  %1300 = vadd.xlane.f32.xlu1 %v1299_v12  ;;  %1249 = vadd.xlane.f32.xlu0 %v1248_v50  ;;  %v1676_v51 = vld [vmem:[%s6147_s1 + $0x398] sm:$0xff]  ;;  %v1675_v0 = vld [vmem:[%s6147_s1 + $0x390] sm:$0xff]  ;;  %vm6166_vm1 = vmmov %vm6161_vm2 }
 0x20c   : > { %v950_v53 = vpop.xlane.xlu1 %949  ;;  %v908_v6 = vpop.xlane.xlu0 %907  ;;  %3317 = vmatpush1.msra.mxu0 %v1561_v48  ;;  %3388 = vmatpush1.msra.mxu1 %v1563_v25  ;;  %v1667_v15 = vld [vmem:[%s6147_s1 + $0x350] sm:$0xff]  ;;  %vm6168_vm10 = vmmov %vm6166_vm1 }
 0x20d   : > { %v5455_v59 = vsel %vm2041_vm11, %v2525_v40, %v5295_v26  ;;  %v5459_v34 = vsel %vm2013_vm7, %v3216_v4, %v5299_v7  ;;  %v1442_v61 = vmul.f32 0.015625, %v950_v53  ;;  %v1428_v14 = vmul.f32 0.015625, %v908_v6  ;;  %3318 = vmatprep.subr.mxu0 %v1686_v2  ;;  %3389 = vmatprep.subr.mxu1 %v1688_v8  ;;  %v1682_v26 = vld [vmem:[%s6147_s1 + $0x3c8] sm:$0xff]  ;;  %v1684_v7 = vld [vmem:[%s6147_s1 + $0x3d8] sm:$0xff]  ;;  %vm6169_vm12 = vmmov %vm6165_vm6 }
 0x20e   : > { %3319 = vmatpush2.msra.mxu0 %v1685_v55  ;;  %3390 = vmatpush2.msra.mxu1 %v1687_v3  ;;  %v1670_v2 = vld [vmem:[%s6147_s1 + $0x368] sm:$0xff]  ;;  %v1672_v8 = vld [vmem:[%s6147_s1 + $0x378] sm:$0xff]  ;;  %vm6170_vm2 = vmmov %vm6166_vm1 }
 0x20f   : > { %v2678_v20 = vrot.slane %v1442_v61, %v4350_v17  ;;  %v2609_v19 = vrot.slane %v1428_v14, %v4366_v38  ;;  %1252 = vadd.xlane.f32.xlu1 %v1251_v54  ;;  %1159 = vadd.xlane.f32.xlu0 %v1158_v33  ;;  %v1666_v54 = vld [vmem:[%s6147_s1 + $0x348] sm:$0xff]  ;;  %v1668_v33 = vld [vmem:[%s6147_s1 + $0x358] sm:$0xff]  ;;  %v1665_v14 = vld [vmem:[%s6147_s1 + $0x340] sm:$0xff] }
 0x210   : > { %v1043_v35 = vpop.xlane.xlu1 %1042  ;;  %v1001_v37 = vpop.xlane.xlu0 %1000  ;;  %3320 = vmatprep.subr.mxu0 %v1682_v26  ;;  %3391 = vmatprep.subr.mxu1 %v1684_v7  ;;  %vm6172_vm3 = vmmov %vm6166_vm1 }
 0x211   : > { %v5486_v49 = vsel %vm6164_vm5, %v2678_v20, %v5327_v32  ;;  %v5490_v28 = vsel %vm6165_vm6, %v2609_v19, %v5331_v21  ;;  %v1473_v24 = vmul.f32 0.015625, %v1043_v35  ;;  %v1459_v41 = vmul.f32 0.015625, %v1001_v37  ;;  %3321 = vmatpush2.msra.mxu0 %v1681_v23  ;;  %3392 = vmatpush2.msra.mxu1 %v1683_v1  ;;  %v1677_v32 = vld [vmem:[%s6147_s1 + $0x3a0] sm:$0xff]  ;;  %v1679_v21 = vld [vmem:[%s6147_s1 + $0x3b0] sm:$0xff]  ;;  %v1662_v20 = vld [vmem:[%s6147_s1 + $0x328] sm:$0xff] }
 0x212   : > { %3322 = vmatprep.subr.mxu0 %v1678_v45  ;;  %3393 = vmatprep.subr.mxu1 %v1680_v47  ;;  %v1664_v19 = vld [vmem:[%s6147_s1 + $0x338] sm:$0xff]  ;;  %v1658_v35 = vld [vmem:[%s6147_s1 + $0x308] sm:$0xff]  ;;  %vm6173_vm4 = vmmov %vm6165_vm6 }
 0x213   : > { %v2831_v12 = vrot.slane %v1473_v24, %v4356_v22  ;;  %v2762_v50 = vrot.slane %v1459_v41, %v4372_v42  ;;  %1255 = vadd.xlane.f32.xlu1 %v1254_v16  ;;  %1303 = vadd.xlane.f32.xlu0 %v1302_v46  ;;  %v1660_v37 = vld [vmem:[%s6147_s1 + $0x318] sm:$0xff]  ;;  %v1659_v24 = vld [vmem:[%s6147_s1 + $0x310] sm:$0xff]  ;;  %vm6174_vm5 = vmmov %vm6166_vm1 }
 0x214   : > { %v1136_v9 = vpop.xlane.xlu1 %1135  ;;  %v1094_v30 = vpop.xlane.xlu0 %1093  ;;  %3323 = vmatpush2.msra.mxu0 %v1677_v32  ;;  %3394 = vmatpush2.msra.mxu1 %v1679_v21  ;;  %v1654_v21 = vld [vmem:[%s6147_s1 + $0x2e8] sm:$0xff] }
 0x215   : > { %v5520_v48 = vsel %vm2027_vm9, %v2831_v12, %v5359_v39  ;;  %v5524_v25 = vsel %vm2041_vm11, %v2762_v50, %v5363_v27  ;;  %v1504_v40 = vmul.f32 0.015625, %v1136_v9  ;;  %v1490_v4 = vmul.f32 0.015625, %v1094_v30  ;;  %3324 = vmatprep.subr.mxu0 %v1674_v44  ;;  %3395 = vmatprep.subr.mxu1 %v1676_v51  ;;  %v1669_v39 = vld [vmem:[%s6147_s1 + $0x360] sm:$0xff]  ;;  %v1671_v27 = vld [vmem:[%s6147_s1 + $0x370] sm:$0xff]  ;;  %v1656_v12 = vld [vmem:[%s6147_s1 + $0x2f8] sm:$0xff] }
 0x216   : > { %3325 = vmatpush2.msra.mxu0 %v1673_v57  ;;  %3396 = vmatpush2.msra.mxu1 %v1675_v0  ;;  %v1650_v51 = vld [vmem:[%s6147_s1 + $0x2c8] sm:$0xff]  ;;  %v1652_v9 = vld [vmem:[%s6147_s1 + $0x2d8] sm:$0xff]  ;;  %v1649_v0 = vld [vmem:[%s6147_s1 + $0x2c0] sm:$0xff] }
 0x217   : > { %v2984_v53 = vrot.slane %v1504_v40, %v4333_v62  ;;  %v2915_v6 = vrot.slane %v1490_v4, %v4350_v17  ;;  %3326 = vmatprep.subr.mxu0 %v1670_v2  ;;  %3397 = vmatprep.subr.mxu1 %v1672_v8  ;;  %v1651_v40 = vld [vmem:[%s6147_s1 + $0x2d0] sm:$0xff] }
 0x218   : > { %v1229_v58 = vpop.xlane.xlu1 %1228  ;;  %v1187_v61 = vpop.xlane.xlu0 %1186  ;;  %3327 = vmatpush2.msra.mxu0 %v1669_v39  ;;  %3398 = vmatpush2.msra.mxu1 %v1671_v27  ;;  %v1646_v27 = vld [vmem:[%s6147_s1 + $0x2a8] sm:$0xff] }
 0x219   : > { %v5554_v55 = vsel %vm2020_vm8, %v2984_v53, %v5391_v43  ;;  %v5558_v3 = vsel %vm6166_vm1, %v2915_v6, %v5395_v5  ;;  %v1535_v26 = vmul.f32 0.015625, %v1229_v58  ;;  %v1521_v7 = vmul.f32 0.015625, %v1187_v61  ;;  %3328 = vmatprep.subr.mxu0 %v1666_v54  ;;  %3399 = vmatprep.subr.mxu1 %v1668_v33  ;;  %v1661_v43 = vld [vmem:[%s6147_s1 + $0x320] sm:$0xff]  ;;  %v1663_v5 = vld [vmem:[%s6147_s1 + $0x330] sm:$0xff]  ;;  %v1648_v53 = vld [vmem:[%s6147_s1 + $0x2b8] sm:$0xff] }
 0x21a   : > { %3329 = vmatpush2.msra.mxu0 %v1665_v14  ;;  %3400 = vmatpush2.msra.mxu1 %v1667_v15  ;;  %v1642_v33 = vld [vmem:[%s6147_s1 + $0x288] sm:$0xff]  ;;  %v1644_v58 = vld [vmem:[%s6147_s1 + $0x298] sm:$0xff]  ;;  %v1641_v15 = vld [vmem:[%s6147_s1 + $0x280] sm:$0xff] }
 0x21b   : > { %v3137_v23 = vrot.slane %v1535_v26, %v4336_v63  ;;  %v3068_v1 = vrot.slane %v1521_v7, %v4356_v22  ;;  %3330 = vmatprep.subr.mxu0 %v1662_v20  ;;  %3401 = vmatprep.subr.mxu1 %v1664_v19  ;;  %v1657_v63 = vld [vmem:[%s6147_s1 + $0x300] sm:$0xff]  ;;  %v1643_v26 = vld [vmem:[%s6147_s1 + $0x290] sm:$0xff] }
 0x21c   : > { %v860_v16 = vpop.xlane.xlu1 %859  ;;  %v1280_v46 = vpop.xlane.xlu0 %1279  ;;  %3331 = vmatpush2.msra.mxu0 %v1661_v43  ;;  %3402 = vmatpush2.msra.mxu1 %v1663_v5  ;;  %v1638_v5 = vld [vmem:[%s6147_s1 + $0x268] sm:$0xff] }
 0x21d   : > { %v5588_v41 = vsel %vm2013_vm7, %v3137_v23, %v5423_v36  ;;  %v5592_v45 = vsel %vm2027_vm9, %v3068_v1, %v5427_v29  ;;  %v1412_v47 = vmul.f32 0.015625, %v860_v16  ;;  %v1552_v32 = vmul.f32 0.015625, %v1280_v46  ;;  %3332 = vmatprep.subr.mxu0 %v1658_v35  ;;  %3403 = vmatprep.subr.mxu1 %v1660_v37  ;;  %v1653_v36 = vld [vmem:[%s6147_s1 + $0x2e0] sm:$0xff]  ;;  %v1655_v29 = vld [vmem:[%s6147_s1 + $0x2f0] sm:$0xff]  ;;  %vm6167_vm7 = vmmov %vm6165_vm6 }
 0x21e   : > { %3333 = vmatpush2.msra.mxu0 %v1657_v63  ;;  %3404 = vmatpush2.msra.mxu1 %v1659_v24  ;;  %v1640_v23 = vld [vmem:[%s6147_s1 + $0x278] sm:$0xff]  ;;  %v1634_v37 = vld [vmem:[%s6147_s1 + $0x248] sm:$0xff]  ;;  %v1633_v24 = vld [vmem:[%s6147_s1 + $0x240] sm:$0xff] }
 0x21f   : > { %v2530_v50 = vrot.slane %v1412_v47, %v4366_v38  ;;  %v3221_v44 = vrot.slane %v1552_v32, %v4333_v62  ;;  %3334 = vmatprep.subr.mxu0 %v1654_v21  ;;  %3405 = vmatprep.subr.mxu1 %v1656_v12  ;;  %v1636_v16 = vld [vmem:[%s6147_s1 + $0x258] sm:$0xff]  ;;  %v1635_v47 = vld [vmem:[%s6147_s1 + $0x250] sm:$0xff] }
 0x220   : > { %v953_v30 = vpop.xlane.xlu1 %952  ;;  %v911_v57 = vpop.xlane.xlu0 %910  ;;  %3335 = vmatpush2.msra.mxu0 %v1653_v36  ;;  %3406 = vmatpush2.msra.mxu1 %v1655_v29  ;;  %v1630_v29 = vld [vmem:[%s6147_s1 + $0x228] sm:$0xff] }
 0x221   : > { %v5622_v4 = vsel %vm6167_vm7, %v2530_v50, %v5455_v59  ;;  %v5626_v2 = vsel %vm2020_vm8, %v3221_v44, %v5459_v34  ;;  %v1443_v8 = vmul.f32 0.015625, %v953_v30  ;;  %v1429_v39 = vmul.f32 0.015625, %v911_v57  ;;  %3336 = vmatprep.subr.mxu0 %v1650_v51  ;;  %3407 = vmatprep.subr.mxu1 %v1652_v9  ;;  %v1645_v59 = vld [vmem:[%s6147_s1 + $0x2a0] sm:$0xff]  ;;  %v1647_v34 = vld [vmem:[%s6147_s1 + $0x2b0] sm:$0xff]  ;;  %v1632_v50 = vld [vmem:[%s6147_s1 + $0x238] sm:$0xff] }
 0x222   : > { %3337 = vmatpush2.msra.mxu0 %v1649_v0  ;;  %3408 = vmatpush2.msra.mxu1 %v1651_v40  ;;  %v1626_v9 = vld [vmem:[%s6147_s1 + $0x208] sm:$0xff]  ;;  %v1628_v30 = vld [vmem:[%s6147_s1 + $0x218] sm:$0xff]  ;;  %v1625_v40 = vld [vmem:[%s6147_s1 + $0x200] sm:$0xff]  ;;  %vm3267_vm7 = vcmask 1043459  }
 0x223   : > { %v2683_v6 = vrot.slane %v1443_v8, %v4372_v42  ;;  %v2614_v54 = vrot.slane %v1429_v39, %v4388_v60  ;;  %3338 = vmatprep.subr.mxu0 %v1646_v27  ;;  %3409 = vmatprep.subr.mxu1 %v1648_v53  ;;  %v1627_v8 = vld [vmem:[%s6147_s1 + $0x210] sm:$0xff] }
 0x224   : > { %v1046_v61 = vpop.xlane.xlu1 %1045  ;;  %v1004_v14 = vpop.xlane.xlu0 %1003  ;;  %3339 = vmatpush2.msra.mxu0 %v1645_v59  ;;  %3410 = vmatpush2.msra.mxu1 %v1647_v34 }
 0x225   : > { %v5656_v7 = vsel %vm2041_vm11, %v2683_v6, %v5486_v49  ;;  %v5660_v20 = vsel %vm2055_vm13, %v2614_v54, %v5490_v28  ;;  %v1474_v19 = vmul.f32 0.015625, %v1046_v61  ;;  %v1460_v43 = vmul.f32 0.015625, %v1004_v14  ;;  %3340 = vmatprep.subr.mxu0 %v1642_v33  ;;  %3411 = vmatprep.subr.mxu1 %v1644_v58  ;;  %v1637_v49 = vld [vmem:[%s6147_s1 + $0x260] sm:$0xff]  ;;  %v1639_v28 = vld [vmem:[%s6147_s1 + $0x270] sm:$0xff] }
 0x226   : > { %3341 = vmatpush2.msra.mxu0 %v1641_v15  ;;  %3412 = vmatpush2.msra.mxu1 %v1643_v26 }
 0x227   : > { %v2836_v1 = vrot.slane %v1474_v19, %v4350_v17  ;;  %v2767_v35 = vrot.slane %v1460_v43, %v4366_v38  ;;  %3342 = vmatprep.subr.mxu0 %v1638_v5  ;;  %3413 = vmatprep.subr.mxu1 %v1640_v23 }
 0x228   : > { %v1139_v46 = vpop.xlane.xlu1 %1138  ;;  %v1097_v63 = vpop.xlane.xlu0 %1096  ;;  %3343 = vmatpush2.msra.mxu0 %v1637_v49  ;;  %3414 = vmatpush2.msra.mxu1 %v1639_v28 }
 0x229   : > { %v5690_v32 = vsel %vm6168_vm10, %v2836_v1, %v5520_v48  ;;  %v5694_v21 = vsel %vm6169_vm12, %v2767_v35, %v5524_v25  ;;  %v1505_v12 = vmul.f32 0.015625, %v1139_v46  ;;  %v1491_v36 = vmul.f32 0.015625, %v1097_v63  ;;  %3344 = vmatprep.subr.mxu0 %v1634_v37  ;;  %3415 = vmatprep.subr.mxu1 %v1636_v16  ;;  %v1629_v48 = vld [vmem:[%s6147_s1 + $0x220] sm:$0xff]  ;;  %v1631_v25 = vld [vmem:[%s6147_s1 + $0x230] sm:$0xff] }
 0x22a   : > { %3345 = vmatpush2.msra.mxu0 %v1633_v24  ;;  %3416 = vmatpush2.msra.mxu1 %v1635_v47  ;;  %vm3269_vm10 = vcmask 1044484   ;;  %vm3271_vm12 = vcmask 1045509  }
 0x22b   : > { %v2989_v44 = vrot.slane %v1505_v12, %v4356_v22  ;;  %v2920_v51 = vrot.slane %v1491_v36, %v4372_v42  ;;  %3346 = vmatprep.subr.mxu0 %v1630_v29  ;;  %3417 = vmatprep.subr.mxu1 %v1632_v50 }
 0x22c   : > { %v1232_v57 = vpop.xlane.xlu1 %1231  ;;  %v1190_v0 = vpop.xlane.xlu0 %1189  ;;  %3347 = vmatpush2.msra.mxu0 %v1629_v48  ;;  %3418 = vmatpush2.msra.mxu1 %v1631_v25 }
 0x22d   : > { %v2990_v39 = vsel %vm2027_vm9, %v2989_v44, %v5554_v55  ;;  %v2921_v27 = vsel %vm2041_vm11, %v2920_v51, %v5558_v3  ;;  %v1536_v53 = vmul.f32 0.015625, %v1232_v57  ;;  %v1522_v59 = vmul.f32 0.015625, %v1190_v0  ;;  %3348 = vmatprep.subr.mxu0 %v1626_v9  ;;  %3419 = vmatprep.subr.mxu1 %v1628_v30 }
 0x22e   : > { %3349 = vmatpush2.msra.mxu0 %v1625_v40  ;;  %3420 = vmatpush2.msra.mxu1 %v1627_v8 }
 0x22f   : > { %v3142_v34 = vrot.slane %v1536_v53, %v4333_v62  ;;  %v3073_v6 = vrot.slane %v1522_v59, %v4350_v17 }
 0x230   : > { %v863_v54 = vpop.xlane.xlu1 %862  ;;  %v1283_v33 = vpop.xlane.xlu0 %1282 }
 0x231   : > { %v3143_v55 = vsel %vm2020_vm8, %v3142_v34, %v5588_v41  ;;  %v3074_v3 = vsel %vm6170_vm2, %v3073_v6, %v5592_v45  ;;  %v1413_v58 = vmul.f32 0.015625, %v863_v54  ;;  %v1553_v61 = vmul.f32 0.015625, %v1283_v33  ;;  %vm6171_vm8 = vmmov %vm6165_vm6 }
 0x232   : > { %vm6176_vm6 = vmmov %vm6166_vm1  ;;  %vm3273_vm2 = vcmask 1046534  }
 0x233   : > { %v2535_v14 = vrot.slane %v1413_v58, %v4388_v60  ;;  %v3226_v15 = vrot.slane %v1553_v61, %v4356_v22  ;;  %vm6177_vm1 = vmmov %vm6173_vm4 }
 0x234   : > { %v956_v26 = vpop.xlane.xlu1 %955  ;;  %v914_v62 = vpop.xlane.xlu0 %913 }
 0x235   : > { %v2536_v19 = vsel %vm2055_vm13, %v2535_v14, %v5622_v4  ;;  %v3227_v43 = vsel %vm2027_vm9, %v3226_v15, %v5626_v2  ;;  %v1444_v5 = vmul.f32 0.015625, %v956_v26  ;;  %v1430_v23 = vmul.f32 0.015625, %v914_v62 }
 0x237   : > { %v2688_v41 = vrot.slane %v1444_v5, %v4366_v38  ;;  %v2619_v45 = vrot.slane %v1430_v23, %v4382_v56 }
 0x238   : > { %v1049_v49 = vpop.xlane.xlu1 %1048  ;;  %v1007_v28 = vpop.xlane.xlu0 %1006 }
 0x239   : > { %v2689_v1 = vsel %vm6171_vm8, %v2688_v41, %v5656_v7  ;;  %v2620_v35 = vsel %vm2062_vm14, %v2619_v45, %v5660_v20  ;;  %v1475_v37 = vmul.f32 0.015625, %v1049_v49  ;;  %v1461_v16 = vmul.f32 0.015625, %v1007_v28  ;;  %vm6178_vm8 = vmmov %vm6177_vm1 }
 0x23b   : > { %v2841_v4 = vrot.slane %v1475_v37, %v4372_v42  ;;  %v2772_v2 = vrot.slane %v1461_v16, %v4388_v60 }
 0x23c   : > { %v1142_v46 = vpop.xlane.xlu1 %1141  ;;  %v1100_v63 = vpop.xlane.xlu0 %1099 }
 0x23d   : > { %v2842_v24 = vsel %vm2041_vm11, %v2841_v4, %v5690_v32  ;;  %v2773_v47 = vsel %vm2055_vm13, %v2772_v2, %v5694_v21  ;;  %v1506_v12 = vmul.f32 0.015625, %v1142_v46  ;;  %v1492_v36 = vmul.f32 0.015625, %v1100_v63 }
 0x23f   : > { %v2994_v7 = vrot.slane %v1506_v12, %v4350_v17  ;;  %v2925_v20 = vrot.slane %v1492_v36, %v4366_v38 }
 0x240   : > { %v1235_v29 = vpop.xlane.xlu1 %1234  ;;  %v1193_v50 = vpop.xlane.xlu0 %1192 }
 0x241   : > { %v2995_v48 = vsel %vm6172_vm3, %v2994_v7, %v2990_v39  ;;  %v2926_v25 = vsel %vm6173_vm4, %v2925_v20, %v2921_v27  ;;  %v1537_v44 = vmul.f32 0.015625, %v1235_v29  ;;  %v1523_v51 = vmul.f32 0.015625, %v1193_v50  ;;  %vm6179_vm3 = vmmov %vm6177_vm1 }
 0x243   : > { %v3147_v9 = vrot.slane %v1537_v44, %v4356_v22  ;;  %v3078_v32 = vrot.slane %v1523_v51, %v4372_v42 }
 0x244   : > { %v866_v30 = vpop.xlane.xlu1 %865  ;;  %v1286_v21 = vpop.xlane.xlu0 %1285 }
 0x245   : > { %v3148_v57 = vsel %vm2027_vm9, %v3147_v9, %v3143_v55  ;;  %v3079_v0 = vsel %vm2041_vm11, %v3078_v32, %v3074_v3  ;;  %v1414_v40 = vmul.f32 0.015625, %v866_v30  ;;  %v1554_v8 = vmul.f32 0.015625, %v1286_v21  ;;  %vm6175_vm9 = vmmov %vm6173_vm4 }
 0x246   : > { %vm3275_vm4 = vcmask 1047559  }
 0x247   : > { %v2540_v53 = vrot.slane %v1414_v40, %v4382_v56  ;;  %v3231_v39 = vrot.slane %v1554_v8, %v4350_v17 }
 0x248   : > { %v959_v59 = vpop.xlane.xlu1 %958  ;;  %v917_v27 = vpop.xlane.xlu0 %916 }
 0x249   : > { %v2541_v34 = vsel %vm2062_vm14, %v2540_v53, %v2536_v19  ;;  %v5762_v22 = vsel %vm6174_vm5, %v3231_v39, %v3227_v43  ;;  %v1445_v6 = vmul.f32 0.015625, %v959_v59  ;;  %v1431_v54 = vmul.f32 0.015625, %v917_v27 }
 0x24b   : > { %v2693_v33 = vrot.slane %v1445_v6, %v4388_v60  ;;  %v2624_v55 = vrot.slane %v1431_v54, %v4398_v11 }
 0x24c   : > { %v1052_v3 = vpop.xlane.xlu1 %1051  ;;  %v1010_v58 = vpop.xlane.xlu0 %1009 }
 0x24d   : > { %v5767_v61 = vsel %vm2055_vm13, %v2693_v33, %v2689_v1  ;;  %v2625_v14 = vsel %vm2069_vm15, %v2624_v55, %v2620_v35  ;;  %v1476_v15 = vmul.f32 0.015625, %v1052_v3  ;;  %v1462_v26 = vmul.f32 0.015625, %v1010_v58 }
 0x24f   : > { %v2846_v62 = vrot.slane %v1476_v15, %v4366_v38  ;;  %v2777_v19 = vrot.slane %v1462_v26, %v4382_v56 }
 0x250   : > { %v1145_v43 = vpop.xlane.xlu1 %1144  ;;  %v1103_v5 = vpop.xlane.xlu0 %1102 }
 0x251   : > { %v5773_v23 = vsel %vm6175_vm9, %v2846_v62, %v2842_v24  ;;  %v2778_v41 = vsel %vm2062_vm14, %v2777_v19, %v2773_v47  ;;  %v1507_v45 = vmul.f32 0.015625, %v1145_v43  ;;  %v1493_v49 = vmul.f32 0.015625, %v1103_v5 }
 0x253   : > { %v2999_v28 = vrot.slane %v1507_v45, %v4372_v42  ;;  %v2930_v1 = vrot.slane %v1493_v49, %v4388_v60 }
 0x254   : > { %v1238_v35 = vpop.xlane.xlu1 %1237  ;;  %v1196_v37 = vpop.xlane.xlu0 %1195 }
 0x255   : > { %v5779_v16 = vsel %vm2041_vm11, %v2999_v28, %v2995_v48  ;;  %v5782_v4 = vsel %vm2055_vm13, %v2930_v1, %v2926_v25  ;;  %v1538_v2 = vmul.f32 0.015625, %v1238_v35  ;;  %v1524_v46 = vmul.f32 0.015625, %v1196_v37 }
 0x257   : > { %v3152_v63 = vrot.slane %v1538_v2, %v4350_v17  ;;  %v3083_v24 = vrot.slane %v1524_v46, %v4366_v38 }
 0x258   : > { %v869_v47 = vpop.xlane.xlu1 %868  ;;  %v5786_v12 = vpop.xlane.xlu0 %1288 }
 0x259   : > { %v5789_v36 = vsel %vm6176_vm6, %v3152_v63, %v3148_v57  ;;  %v5792_v7 = vsel %vm6177_vm1, %v3083_v24, %v3079_v0  ;;  %v1415_v30 = vmul.f32 0.015625, %v869_v47 }
 0x25b   : > { %v2545_v0 = vrot.slane %v1415_v30, %v4398_v11 }
 0x25c   : > { %v962_v20 = vpop.xlane.xlu1 %961  ;;  %v920_v29 = vpop.xlane.xlu0 %919 }
 0x25d   : > { %v1432_v50 = vmul.f32 0.015625, %v920_v29  ;;  %v2546_v27 = vsel %vm2069_vm15, %v2545_v0, %v2541_v34  ;;  %v1446_v5 = vmul.f32 0.015625, %v962_v20 }
 0x25f   : > { %v2629_v48 = vrot.slane %v1432_v50, %v4403_v13 }
 0x260   : > { %v1055_v25 = vpop.xlane.xlu1 %1054  ;;  %v1013_v44 = vpop.xlane.xlu0 %1012 }
 0x261   : > { %v2630_v17 = vsel %vm2076_vm0, %v2629_v48, %v2625_v14  ;;  %v1463_v40 = vmul.f32 0.015625, %v1013_v44 }
 0x262   : > { %v3279_v51 = vsel %vm3267_vm7, %v2630_v17, %v4754_v31 }
 0x263   : > { %v2782_v31 = vrot.slane %v1463_v40, %v4398_v11 }
 0x264   : > { %v5798_v9 = vpop.xlane.xlu1 %1147  ;;  %v1106_v32 = vpop.xlane.xlu0 %1105 }
 0x265   : > { %v2783_v14 = vsel %vm2069_vm15, %v2782_v31, %v2778_v41  ;;  %v1494_v1 = vmul.f32 0.015625, %v1106_v32 }
 0x267   : > { %v2935_v24 = vrot.slane %v1494_v1, %v4382_v56 }
 0x268   : > { %v5800_v21 = vpop.xlane.xlu1 %1240  ;;  %v1199_v57 = vpop.xlane.xlu0 %1198 }
 0x269   : > { %v2936_v30 = vsel %vm2062_vm14, %v2935_v24, %v5782_v4 }
 0x26c   : > { %v872_v8 = vpop.xlane.xlu1 %871  ;;  %v5803_v53 = vpop.xlane.xlu0 %1291 }
 0x26d   : > { %v1416_v39 = vmul.f32 0.015625, %v872_v8 }
 0x26f   : > { %v2550_v59 = vrot.slane %v1416_v39, %v4403_v13 }
 0x270   : > { %v1016_v6 = vpop.xlane.xlu1 %1015  ;;  %v965_v54 = vpop.xlane.xlu0 %964 }
 0x271   : > { %v2551_v33 = vsel %vm2076_vm0, %v2550_v59, %v2546_v27  ;;  %v1464_v55 = vmul.f32 0.015625, %v1016_v6  ;;  %v1447_v45 = vmul.f32 0.015625, %v965_v54  ;;  %v1525_v6 = vmul.f32 0.015625, %v1199_v57 }
 0x272   : > { %v3268_v3 = vsel %vm3267_vm7, %v2551_v33, %v4687_v52  ;;  %v2698_v52 = vrot.slane %v1446_v5, %v4382_v56  ;;  %v1555_v5 = vmul.f32 0.015625, %v5786_v12 }
 0x273   : > { %v2787_v58 = vrot.slane %v1464_v55, %v4403_v13  ;;  %v2703_v35 = vrot.slane %v1447_v45, %v4398_v11 }
 0x274   : > { %v1109_v15 = vpop.xlane.xlu1 %1108  ;;  %v1058_v26 = vpop.xlane.xlu0 %1057  ;;  %v2699_v63 = vsel %vm2062_vm14, %v2698_v52, %v5767_v61 }
 0x275   : > { %v2788_v62 = vsel %vm2076_vm0, %v2787_v58, %v2783_v14  ;;  %v1495_v41 = vmul.f32 0.015625, %v1109_v15  ;;  %v2704_v20 = vsel %vm2069_vm15, %v2703_v35, %v2699_v63  ;;  %v1478_v61 = vmul.f32 0.015625, %v1058_v26 }
 0x276   : > { %v3280_v34 = vsel %vm3269_vm10, %v2788_v62, %v3279_v51  ;;  %v1477_v51 = vmul.f32 0.015625, %v1055_v25  ;;  %v3088_v26 = vrot.slane %v1525_v6, %v4388_v60  ;;  %v1508_v35 = vmul.f32 0.015625, %v5798_v9 }
 0x277   : > { %v2940_v29 = vrot.slane %v1495_v41, %v4398_v11  ;;  %v2856_v54 = vrot.slane %v1478_v61, %v4382_v56  ;;  %v1556_v9 = vmul.f32 0.015625, %v5803_v53 }
 0x278   : > { %v1202_v19 = vpop.xlane.xlu1 %1201  ;;  %v1151_v43 = vpop.xlane.xlu0 %1150  ;;  %v2851_v31 = vrot.slane %v1477_v51, %v4388_v60 }
 0x279   : > { %v2941_v40 = vsel %vm2069_vm15, %v2940_v29, %v2936_v30  ;;  %v1526_v33 = vmul.f32 0.015625, %v1202_v19 }
 0x27a   : > { %v2852_v15 = vsel %vm2055_vm13, %v2851_v31, %v5773_v23  ;;  %v1539_v23 = vmul.f32 0.015625, %v5800_v21 }
 0x27b   : > { %v2857_v62 = vsel %vm2062_vm14, %v2856_v54, %v2852_v15  ;;  %v3093_v57 = vrot.slane %v1526_v33, %v4382_v56 }
 0x27c   : > { %v5815_v49 = vpop.xlane.xlu1 %1294  ;;  %v5817_v28 = vpop.xlane.xlu0 %1243 }
 0x280   : > { %v1061_v37 = vpop.xlane.xlu1 %1060  ;;  %v968_v2 = vpop.xlane.xlu0 %967 }
 0x281   : > { %v1448_v46 = vmul.f32 0.015625, %v968_v2  ;;  %v1479_v8 = vmul.f32 0.015625, %v1061_v37  ;;  %v3089_v2 = vsel %vm2055_vm13, %v3088_v26, %v5792_v7  ;;  %v3004_v7 = vrot.slane %v1508_v35, %v4366_v38 }
 0x282   : > { %v3094_v12 = vsel %vm2062_vm14, %v3093_v57, %v3089_v2 }
 0x283   : > { %v2708_v47 = vrot.slane %v1448_v46, %v4403_v13  ;;  %v2861_v4 = vrot.slane %v1479_v8, %v4398_v11  ;;  %v1509_v46 = vmul.f32 0.015625, %v1151_v43  ;;  %v3157_v43 = vrot.slane %v1539_v23, %v4372_v42 }
 0x284   : > { %v1154_v50 = vpop.xlane.xlu1 %1153  ;;  %v1112_v48 = vpop.xlane.xlu0 %1111 }
 0x285   : > { %v2709_v44 = vsel %vm2076_vm0, %v2708_v47, %v2704_v20  ;;  %v1496_v17 = vmul.f32 0.015625, %v1112_v48  ;;  %v2862_v19 = vsel %vm2069_vm15, %v2861_v4, %v2857_v62  ;;  %v1510_v24 = vmul.f32 0.015625, %v1154_v50 }
 0x286   : > { %v3270_v32 = vsel %vm3269_vm10, %v2709_v44, %v3268_v3  ;;  %v3236_v20 = vrot.slane %v1555_v5, %v4372_v42  ;;  %v3009_v51 = vrot.slane %v1509_v46, %v4388_v60  ;;  %v3241_v42 = vrot.slane %v1556_v9, %v4366_v38 }
 0x287   : > { %v2945_v0 = vrot.slane %v1496_v17, %v4403_v13  ;;  %v1540_v17 = vmul.f32 0.015625, %v5817_v28  ;;  %v3014_v61 = vrot.slane %v1510_v24, %v4382_v56  ;;  %v3158_v54 = vsel %vm2041_vm11, %v3157_v43, %v5789_v36 }
 0x288   : > { %v1247_v39 = vpop.xlane.xlu1 %1246  ;;  %v1205_v59 = vpop.xlane.xlu0 %1204  ;;  %v3237_v8 = vsel %vm2041_vm11, %v3236_v20, %v5762_v22  ;;  %vm6180_vm11 = vmmov %vm6177_vm1  ;;  %v5903_v24 = vsub.s32 2, %v4286_v18  ;;  %v5913_v20 = vsub.s32 3, %v4286_v18 }
 0x289   : > { %v2946_v27 = vsel %vm2076_vm0, %v2945_v0, %v2941_v40  ;;  %v1527_v55 = vmul.f32 0.015625, %v1205_v59  ;;  %v1541_v30 = vmul.f32 0.015625, %v1247_v39  ;;  %v3162_v39 = vrot.slane %v1540_v17, %v4366_v38 }
 0x28a   : > { %v3281_v25 = vsel %vm3271_vm12, %v2946_v27, %v3280_v34  ;;  %v3242_v38 = vsel %vm6179_vm3, %v3241_v42, %v3237_v8 }
 0x28b   : > { %v3098_v45 = vrot.slane %v1527_v55, %v4398_v11  ;;  %v3167_v4 = vrot.slane %v1541_v30, %v4388_v60 }
 0x28c   : > { %v1064_v3 = vpop.xlane.xlu1 %1063  ;;  %v1298_v58 = vpop.xlane.xlu0 %1297 }
 0x28d   : > { %v1480_v14 = vmul.f32 0.015625, %v1064_v3  ;;  %v3099_v21 = vsel %vm2069_vm15, %v3098_v45, %v3094_v12  ;;  %v1558_v0 = vmul.f32 0.015625, %v1298_v58 }
 0x28f   : > { %v2866_v34 = vrot.slane %v1480_v14, %v4403_v13  ;;  %v3251_v3 = vrot.slane %v1558_v0, %v4382_v56 }
 0x290   : > { %v1208_v52 = vpop.xlane.xlu1 %1207  ;;  %v1157_v1 = vpop.xlane.xlu0 %1156 }
 0x291   : > { %v2867_v41 = vsel %vm2076_vm0, %v2866_v34, %v2862_v19  ;;  %v1528_v37 = vmul.f32 0.015625, %v1208_v52  ;;  %v1511_v29 = vmul.f32 0.015625, %v1157_v1 }
 0x292   : > { %v3272_v63 = vsel %vm3271_vm12, %v2867_v41, %v3270_v32  ;;  %v1557_v32 = vmul.f32 0.015625, %v5815_v49  ;;  %v3005_v49 = vsel %vm6178_vm8, %v3004_v7, %v5779_v16  ;;  %v4075_v7 = vmov 1966171168  }
 0x293   : > { %v3103_v47 = vrot.slane %v1528_v37, %v4403_v13  ;;  %v3019_v28 = vrot.slane %v1511_v29, %v4398_v11  ;;  %v3010_v33 = vsel %vm2055_vm13, %v3009_v51, %v3005_v49  ;;  %v3470_v43 = vunpack.c.l.s4 %v4075_v7 }
 0x294   : > { %v1301_v48 = vpop.xlane.xlu1 %1300  ;;  %v1250_v44 = vpop.xlane.xlu0 %1249  ;;  %v3246_v22 = vrot.slane %v1557_v32, %v4388_v60  ;;  %v3015_v55 = vsel %vm2062_vm14, %v3014_v61, %v3010_v33  ;;  %v3163_v60 = vsel %vm6180_vm11, %v3162_v39, %v3158_v54 }
 0x295   : > { %v3104_v50 = vsel %vm2076_vm0, %v3103_v47, %v3099_v21  ;;  %v1542_v40 = vmul.f32 0.015625, %v1250_v44  ;;  %v1559_v59 = vmul.f32 0.015625, %v1301_v48  ;;  %v3020_v14 = vsel %vm2069_vm15, %v3019_v28, %v3015_v55 }
 0x296   : > { %v3282_v53 = vsel %vm3273_vm2, %v3104_v50, %v3281_v25  ;;  %v3168_v19 = vsel %vm2055_vm13, %v3167_v4, %v3163_v60  ;;  %v5910_v47 = vsub.s32 1, %v4286_v18  ;;  %v3471_v42 = vunpack.c.0.s8 %v3470_v43 }
 0x297   : > { %v3172_v58 = vrot.slane %v1542_v40, %v4382_v56  ;;  %v3256_v36 = vrot.slane %v1559_v59, %v4398_v11  ;;  %v3247_v56 = vsel %vm2055_vm13, %v3246_v22, %v3242_v38  ;;  %vm3495_vm13 = vcmp.lt.s32.totalorder %v1691_v10, 512 }
 0x298   : > { %v1253_v27 = vpop.xlane.xlu1 %1252  ;;  %v1160_v31 = vpop.xlane.xlu0 %1159  ;;  %v3252_v52 = vsel %vm2062_vm14, %v3251_v3, %v3247_v56 }
 0x299   : > { %v1543_v6 = vmul.f32 0.015625, %v1253_v27  ;;  %v1512_v25 = vmul.f32 0.015625, %v1160_v31  ;;  %v3173_v1 = vsel %vm2062_vm14, %v3172_v58, %v3168_v19  ;;  %v3257_v23 = vsel %vm2069_vm15, %v3256_v36, %v3252_v52 }
 0x29b   : > { %v3024_v16 = vrot.slane %v1512_v25, %v4403_v13  ;;  %v3177_v15 = vrot.slane %v1543_v6, %v4398_v11 }
 0x29c   : > { %v1256_v26 = vpop.xlane.xlu1 %1255  ;;  %v1304_v62 = vpop.xlane.xlu0 %1303 }
 0x29d   : > { %v1544_v57 = vmul.f32 0.015625, %v1256_v26  ;;  %v1560_v34 = vmul.f32 0.015625, %v1304_v62  ;;  %v3025_v5 = vsel %vm2076_vm0, %v3024_v16, %v3020_v14  ;;  %v3178_v41 = vsel %vm2069_vm15, %v3177_v15, %v3173_v1 }
 0x29e   : > { %v3274_v45 = vsel %vm3273_vm2, %v3025_v5, %v3272_v63  ;;  %v5900_v63 = vsub.s32 0, %v4286_v18 }
 0x29f   : > { %v3182_v11 = vrot.slane %v1544_v57, %v4403_v13  ;;  %v3261_v35 = vrot.slane %v1560_v34, %v4403_v13  ;;  %v1689_v13 = vld [vmem:[%s6148_s2] sm:$0xf] }
 0x2a0   : > { %v1694_v9 = vrot.slane %v1689_v13, %v5900_v63  ;;  %v1702_v21 = vrot.slane %v1689_v13, %v5903_v24  ;;  %v1698_v44 = vrot.slane %v1689_v13, %v5910_v47  ;;  %v1706_v17 = vrot.slane %v1689_v13, %v5913_v20 }
 0x2a1   : > { %v3262_v37 = vsel %vm2076_vm0, %v3261_v35, %v3257_v23  ;;  %v3183_v2 = vsel %vm2076_vm0, %v3182_v11, %v3178_v41 }
 0x2a2   : > { %v3283_v46 = vsel %vm3275_vm4, %v3262_v37, %v3282_v53  ;;  %v3276_v12 = vsel %vm3275_vm4, %v3183_v2, %v3274_v45 }
 0x2a3   : > { %3350 = vmatprep.mubr.f32.mxu0 %v3283_v46  ;;  %3421 = vmatprep.mubr.f32.mxu1 %v3283_v46 }
 0x2a4   : > { %3351 = vmatmul.mubr.f32.vlgmr.msra.gmra.mxu0 %v3276_v12  ;;  %3422 = vmatmul.mubr.f32.vlgmr.msra.gmra.mxu1 %v3276_v12 }
 0x364   : > { %v3352_v29 = vpop.f32.mrf.mxu0  ;;  %v3423_v48 = vpop.f32.mrf.mxu1 }
 0x365   : > { %v3353_v50 = vadd.f32 %v3352_v29, %v1694_v9  ;;  %v3424_v51 = vadd.f32 %v3423_v48, %v1702_v21  ;;  %v3474_v21 = vsub.s32 %v3471_v42, %v4286_v18  ;;  %v3498_v42 = vld [vmem:[#allocation4] sm:$0xf] }
 0x366   : > { %v3354_v32 = vpop.f32.mrf.mxu0  ;;  %v3425_v30 = vpop.f32.mrf.mxu1 }
 0x367   : > { %3434 = vst [vmem:[%s3433_s26] sm:$0xff] %v3353_v50  ;;  %v3439_v53 = vrot.slane %v3353_v50, 4  ;;  %v3499_v61 = vmul.f32 %v3353_v50, %v3353_v50  ;;  %3436 = vst [vmem:[%s3433_s26 + $0x10] sm:$0xff] %v3424_v51  ;;  %v3451_v0 = vrot.slane %v3424_v51, 4  ;;  %v3501_v40 = vmul.f32 %v3424_v51, %v3424_v51 }
 0x368   : > { %v3355_v8 = vadd.f32 %v3354_v32, %v1698_v44  ;;  %v3426_v28 = vadd.f32 %v3425_v30, %v1706_v17 }
 0x369   : > { %v3440_v59 = vadd.f32 %v3439_v53, %v3353_v50  ;;  %v3503_v27 = vrot.slane %v3499_v61, 4  ;;  %v3452_v31 = vadd.f32 %v3451_v0, %v3424_v51  ;;  %v3515_v49 = vrot.slane %v3501_v40, 4 }
 0x36a   : > { %3435 = vst [vmem:[%s3433_s26 + $0x8] sm:$0xff] %v3355_v8  ;;  %v3445_v39 = vrot.slane %v3355_v8, 4  ;;  %v3500_v6 = vmul.f32 %v3355_v8, %v3355_v8  ;;  %3437 = vst [vmem:[%s3433_s26 + $0x18] sm:$0xff] %v3426_v28  ;;  %v3457_v25 = vrot.slane %v3426_v28, 4  ;;  %v3502_v54 = vmul.f32 %v3426_v28, %v3426_v28 }
 0x36b   : > { %v3441_v33 = vrot.slane %v3440_v59, 2  ;;  %v3504_v22 = vadd.f32 %v3503_v27, %v3499_v61  ;;  %v3453_v4 = vrot.slane %v3452_v31, 2  ;;  %v3516_v55 = vadd.f32 %v3515_v49, %v3501_v40  ;;  %v3438_v27 = vld [vmem:[#allocation3] sm:$0xf] }
 0x36c   : > { %v3446_v3 = vadd.f32 %v3445_v39, %v3355_v8  ;;  %v3509_v58 = vrot.slane %v3500_v6, 4  ;;  %v3458_v16 = vadd.f32 %v3457_v25, %v3426_v28  ;;  %v3521_v38 = vrot.slane %v3502_v54, 4 }
 0x36d   : > { %v3442_v14 = vadd.f32 %v3441_v33, %v3440_v59  ;;  %v3505_v36 = vrot.slane %v3504_v22, 2  ;;  %v3454_v15 = vadd.f32 %v3453_v4, %v3452_v31  ;;  %v3517_v26 = vrot.slane %v3516_v55, 2 }
 0x36e   : > { %v3447_v62 = vrot.slane %v3446_v3, 2  ;;  %v3510_v60 = vadd.f32 %v3509_v58, %v3500_v6  ;;  %v3459_v57 = vrot.slane %v3458_v16, 2  ;;  %v3522_v34 = vadd.f32 %v3521_v38, %v3502_v54 }
 0x36f   : > { %v3443_v5 = vrot.slane %v3442_v14, 1  ;;  %v3506_v56 = vadd.f32 %v3505_v36, %v3504_v22  ;;  %v3455_v19 = vrot.slane %v3454_v15, 1  ;;  %v3518_v45 = vadd.f32 %v3517_v26, %v3516_v55 }
 0x370   : > { %v3448_v52 = vadd.f32 %v3447_v62, %v3446_v3  ;;  %v3511_v1 = vrot.slane %v3510_v60, 2  ;;  %v3460_v11 = vadd.f32 %v3459_v57, %v3458_v16  ;;  %v3523_v35 = vrot.slane %v3522_v34, 2 }
 0x371   : > { %v3507_v23 = vrot.slane %v3506_v56, 1  ;;  %v3519_v41 = vrot.slane %v3518_v45, 1  ;;  %v3444_v13 = vadd.f32 %v3443_v5, %v3442_v14  ;;  %v3456_v9 = vadd.f32 %v3455_v19, %v3454_v15 }
 0x372   : > { %v3449_v37 = vrot.slane %v3448_v52, 1  ;;  %v3512_v2 = vadd.f32 %v3511_v1, %v3510_v60  ;;  %v3461_v46 = vrot.slane %v3460_v11, 1  ;;  %v3524_v12 = vadd.f32 %v3523_v35, %v3522_v34 }
 0x373   : > { %v3508_v43 = vadd.f32 %v3507_v23, %v3506_v56  ;;  %v3520_v17 = vadd.f32 %v3519_v41, %v3518_v45 }
 0x374   : > { %v3450_v29 = vadd.f32 %v3449_v37, %v3448_v52  ;;  %v3513_v48 = vrot.slane %v3512_v2, 1  ;;  %v3462_v44 = vadd.f32 %v3461_v46, %v3460_v11  ;;  %v3525_v7 = vrot.slane %v3524_v12, 1 }
 0x376   : > { %v3467_v50 = vcombine.low %v3444_v13, %v3450_v29  ;;  %v3514_v51 = vadd.f32 %v3513_v48, %v3512_v2  ;;  %v3468_v32 = vcombine.low %v3456_v9, %v3462_v44  ;;  %v3526_v30 = vadd.f32 %v3525_v7, %v3524_v12 }
 0x378   : > { %v3475_v53 = vrot.slane %v3467_v50, %v3474_v21  ;;  %v3531_v61 = vcombine.low %v3508_v43, %v3514_v51  ;;  %v3482_v0 = vrot.slane %v3468_v32, %v3474_v21  ;;  %v3532_v40 = vcombine.low %v3520_v17, %v3526_v30 }
 0x37a   : > { %v3539_v8 = vrot.slane %v3531_v61, %v3474_v21  ;;  %v3483_v28 = vcombine.low %v3475_v53, %v3482_v0  ;;  %v3546_v59 = vrot.slane %v3532_v40, %v3474_v21 }
 0x37c   : > { %v3490_v31 = vrot.slane %v3483_v28, %v3474_v21  ;;  %v3547_v18 = vcombine.low %v3539_v8, %v3546_v59 }
 0x37e   : > { %v3492_v49 = vadd.f32 %v3490_v31, %v3438_v27  ;;  %v3554_v39 = vrot.slane %v3547_v18, %v3474_v21  ;;  %3561 = sbr.rel (%p3933_p5) target bundleno = 1157 (0x485), region = 56 }
 0x380   : > { %3497 = vst.msk [vmem:[#allocation3] sm:$0xf] %vm3495_vm13, %v3492_v49  ;;  %v3556_v6 = vadd.f32 %v3554_v39, %v3498_v42 }
 0x382   : > { %3557 = vst.msk [vmem:[#allocation4] sm:$0xf] %vm3495_vm13, %v3556_v6 }
 0x383   : > { %v3680_v25 = vld [vmem:[%s6151_s5 + $0xf8] sm:$0xff]  ;;  %v3679_v22 = vld [vmem:[%s6151_s5 + $0xf0] sm:$0xff]  ;;  %v3678_v58 = vld [vmem:[%s6151_s5 + $0xe8] sm:$0xff] }
 0x384   : > { %v3712_v54 = vld [vmem:[%s6151_s5 + $0x1f8] sm:$0xff]  ;;  %3941 = vmatprep.subr.mxu0 %v3680_v25  ;;  %v3711_v4 = vld [vmem:[%s6151_s5 + $0x1f0] sm:$0xff]  ;;  %v3710_v16 = vld [vmem:[%s6151_s5 + $0x1e8] sm:$0xff] }
 0x385   : > { %v3664_v10 = vld [vmem:[%s6151_s5 + $0x78] sm:$0xff]  ;;  %3979 = vmatprep.subr.mxu1 %v3712_v54  ;;  %v3663_v55 = vld [vmem:[%s6151_s5 + $0x70] sm:$0xff]  ;;  %v3662_v38 = vld [vmem:[%s6151_s5 + $0x68] sm:$0xff] }
 0x386   : > { %v3696_v33 = vld [vmem:[%s6151_s5 + $0x178] sm:$0xff]  ;;  %3942 = vmatpush3.msra.mxu0 %v3664_v10  ;;  %v3695_v3 = vld [vmem:[%s6151_s5 + $0x170] sm:$0xff]  ;;  %v3694_v14 = vld [vmem:[%s6151_s5 + $0x168] sm:$0xff] }
 0x387   : > { %3980 = vmatpush3.msra.mxu1 %v3696_v33  ;;  %3943 = vmatprep.subr.mxu0 %v3679_v22  ;;  %v3677_v36 = vld [vmem:[%s6151_s5 + $0xe0] sm:$0xff]  ;;  %v3676_v60 = vld [vmem:[%s6151_s5 + $0xd8] sm:$0xff]  ;;  %v3675_v56 = vld [vmem:[%s6151_s5 + $0xd0] sm:$0xff] }
 0x388   : > { %3981 = vmatprep.subr.mxu1 %v3711_v4  ;;  %3944 = vmatpush3.msra.mxu0 %v3663_v55  ;;  %v3709_v15 = vld [vmem:[%s6151_s5 + $0x1e0] sm:$0xff]  ;;  %v3708_v57 = vld [vmem:[%s6151_s5 + $0x1d8] sm:$0xff]  ;;  %v3707_v19 = vld [vmem:[%s6151_s5 + $0x1d0] sm:$0xff] }
 0x389   : > { %3982 = vmatpush3.msra.mxu1 %v3695_v3  ;;  %3945 = vmatprep.subr.mxu0 %v3678_v58  ;;  %v3661_v26 = vld [vmem:[%s6151_s5 + $0x60] sm:$0xff]  ;;  %v3660_v34 = vld [vmem:[%s6151_s5 + $0x58] sm:$0xff]  ;;  %v3659_v45 = vld [vmem:[%s6151_s5 + $0x50] sm:$0xff] }
 0x38a   : > { %3983 = vmatprep.subr.mxu1 %v3710_v16  ;;  %v3693_v62 = vld [vmem:[%s6151_s5 + $0x160] sm:$0xff]  ;;  %3946 = vmatpush3.msra.mxu0 %v3662_v38  ;;  %v3692_v5 = vld [vmem:[%s6151_s5 + $0x158] sm:$0xff]  ;;  %v3691_v52 = vld [vmem:[%s6151_s5 + $0x150] sm:$0xff] }
 0x38b   : > { %3984 = vmatpush3.msra.mxu1 %v3694_v14  ;;  %3947 = vmatprep.subr.mxu0 %v3677_v36  ;;  %v3674_v1 = vld [vmem:[%s6151_s5 + $0xc8] sm:$0xff]  ;;  %v3673_v41 = vld [vmem:[%s6151_s5 + $0xc0] sm:$0xff]  ;;  %v3672_v12 = vld [vmem:[%s6151_s5 + $0xb8] sm:$0xff] }
 0x38c   : > { %3985 = vmatprep.subr.mxu1 %v3709_v15  ;;  %3948 = vmatpush3.msra.mxu0 %v3661_v26  ;;  %v3706_v11 = vld [vmem:[%s6151_s5 + $0x1c8] sm:$0xff]  ;;  %v3705_v37 = vld [vmem:[%s6151_s5 + $0x1c0] sm:$0xff]  ;;  %v3704_v13 = vld [vmem:[%s6151_s5 + $0x1b8] sm:$0xff] }
 0x38d   : > { %3986 = vmatpush3.msra.mxu1 %v3693_v62  ;;  %3949 = vmatprep.subr.mxu0 %v3676_v60  ;;  %v3658_v35 = vld [vmem:[%s6151_s5 + $0x48] sm:$0xff]  ;;  %v3657_v2 = vld [vmem:[%s6151_s5 + $0x40] sm:$0xff]  ;;  %v3656_v9 = vld [vmem:[%s6151_s5 + $0x38] sm:$0xff] }
 0x38e   : > { %3987 = vmatprep.subr.mxu1 %v3708_v57  ;;  %3950 = vmatpush3.msra.mxu0 %v3660_v34  ;;  %v3690_v23 = vld [vmem:[%s6151_s5 + $0x148] sm:$0xff]  ;;  %v3689_v46 = vld [vmem:[%s6151_s5 + $0x140] sm:$0xff]  ;;  %v3688_v21 = vld [vmem:[%s6151_s5 + $0x138] sm:$0xff] }
 0x38f   : > { %3988 = vmatpush3.msra.mxu1 %v3692_v5  ;;  %3951 = vmatprep.subr.mxu0 %v3675_v56  ;;  %v3671_v29 = vld [vmem:[%s6151_s5 + $0xb0] sm:$0xff]  ;;  %v3670_v43 = vld [vmem:[%s6151_s5 + $0xa8] sm:$0xff]  ;;  %v3669_v32 = vld [vmem:[%s6151_s5 + $0xa0] sm:$0xff] }
 0x390   : > { %3989 = vmatprep.subr.mxu1 %v3707_v19  ;;  %3952 = vmatpush3.msra.mxu0 %v3659_v45  ;;  %v3703_v48 = vld [vmem:[%s6151_s5 + $0x1b0] sm:$0xff]  ;;  %v3702_v17 = vld [vmem:[%s6151_s5 + $0x1a8] sm:$0xff]  ;;  %v3701_v30 = vld [vmem:[%s6151_s5 + $0x1a0] sm:$0xff] }
 0x391   : > { %3990 = vmatpush3.msra.mxu1 %v3691_v52  ;;  %3953 = vmatprep.subr.mxu0 %v3674_v1  ;;  %v3655_v44 = vld [vmem:[%s6151_s5 + $0x30] sm:$0xff]  ;;  %v3654_v50 = vld [vmem:[%s6151_s5 + $0x28] sm:$0xff]  ;;  %v3653_v53 = vld [vmem:[%s6151_s5 + $0x20] sm:$0xff] }
 0x392   : > { %3991 = vmatprep.subr.mxu1 %v3706_v11  ;;  %3954 = vmatpush3.msra.mxu0 %v3658_v35  ;;  %v3687_v7 = vld [vmem:[%s6151_s5 + $0x130] sm:$0xff]  ;;  %v3686_v51 = vld [vmem:[%s6151_s5 + $0x128] sm:$0xff]  ;;  %v3685_v61 = vld [vmem:[%s6151_s5 + $0x120] sm:$0xff] }
 0x393   : > { %3992 = vmatpush3.msra.mxu1 %v3690_v23  ;;  %3955 = vmatprep.subr.mxu0 %v3673_v41  ;;  %v3562_v0 = vld [vmem:[#allocation3] sm:$0xf]  ;;  %v3564_v40 = vld [vmem:[#allocation4] sm:$0xf]  ;;  %v3668_v8 = vld [vmem:[%s6151_s5 + $0x98] sm:$0xff] }
 0x394   : > { %3993 = vmatprep.subr.mxu1 %v3705_v37  ;;  %3956 = vmatpush3.msra.mxu0 %v3657_v2  ;;  %v3700_v28 = vld [vmem:[%s6151_s5 + $0x198] sm:$0xff]  ;;  %v3563_v59 = vmul.f32 0.0625, %v3562_v0  ;;  %v3565_v27 = vmul.f32 0.0625, %v3564_v40  ;;  %v3667_v42 = vld [vmem:[%s6151_s5 + $0x90] sm:$0xff]  ;;  %v3666_v54 = vld [vmem:[%s6151_s5 + $0x88] sm:$0xff] }
 0x395   : > { %3994 = vmatpush3.msra.mxu1 %v3689_v46  ;;  %3957 = vmatprep.subr.mxu0 %v3672_v12  ;;  %v3652_v31 = vld [vmem:[%s6151_s5 + $0x18] sm:$0xff]  ;;  %v3699_v49 = vld [vmem:[%s6151_s5 + $0x190] sm:$0xff]  ;;  %v3698_v10 = vld [vmem:[%s6151_s5 + $0x188] sm:$0xff] }
 0x396   : > { %3995 = vmatprep.subr.mxu1 %v3704_v13  ;;  %3958 = vmatpush3.msra.mxu0 %v3656_v9  ;;  %v3684_v18 = vld [vmem:[%s6151_s5 + $0x118] sm:$0xff]  ;;  %v3566_v39 = vmul.f32 %v3563_v59, %v3563_v59  ;;  %v3651_v6 = vld [vmem:[%s6151_s5 + $0x10] sm:$0xff]  ;;  %v3650_v22 = vld [vmem:[%s6151_s5 + $0x8] sm:$0xff] }
 0x397   : > { %3996 = vmatpush3.msra.mxu1 %v3688_v21  ;;  %3959 = vmatprep.subr.mxu0 %v3671_v29  ;;  %v3683_v25 = vld [vmem:[%s6151_s5 + $0x110] sm:$0xff]  ;;  %v3682_v4 = vld [vmem:[%s6151_s5 + $0x108] sm:$0xff]  ;;  %v3665_v55 = vld [vmem:[%s6151_s5 + $0x80] sm:$0xff] }
 0x398   : > { %3997 = vmatprep.subr.mxu1 %v3703_v48  ;;  %3960 = vmatpush3.msra.mxu0 %v3655_v44  ;;  %v3567_v33 = vsub.f32 %v3565_v27, %v3566_v39  ;;  %v3697_v3 = vld [vmem:[%s6151_s5 + $0x180] sm:$0xff]  ;;  %v3576_v62 = vld [vmem:[#allocation2 + $0x8] sm:$0xff]  ;;  %v3578_v60 = vld [vmem:[#allocation2 + $0x18] sm:$0xff] }
 0x399   : > { %3998 = vmatpush3.msra.mxu1 %v3687_v7  ;;  %3961 = vmatprep.subr.mxu0 %v3670_v43  ;;  %v3649_v16 = vld [vmem:[%s6151_s5] sm:$0xff]  ;;  %v3577_v34 = vld [vmem:[#allocation2 + $0x10] sm:$0xff]  ;;  %v3580_v52 = vld [vmem:[#allocation2 + $0x28] sm:$0xff] }
 0x39a   : > { %3999 = vmatprep.subr.mxu1 %v3702_v17  ;;  %3962 = vmatpush3.msra.mxu0 %v3654_v50  ;;  %v3569_v58 = vadd.f32 1e-05, %v3567_v33  ;;  %v3681_v38 = vld [vmem:[%s6151_s5 + $0x100] sm:$0xff]  ;;  %v3582_v1 = vld [vmem:[#allocation2 + $0x38] sm:$0xff]  ;;  %v3581_v46 = vld [vmem:[#allocation2 + $0x30] sm:$0xff] }
 0x39b   : > { %4000 = vmatpush3.msra.mxu1 %v3686_v51  ;;  %3963 = vmatprep.subr.mxu0 %v3669_v32  ;;  %v3568_v14 = vld [vmem:[%s6149_s3] sm:$0xf] }
 0x39c   : > { %4001 = vmatprep.subr.mxu1 %v3701_v30  ;;  %3964 = vmatpush3.msra.mxu0 %v3653_v53  ;;  %4036 = vrsqrt.f32 %v3569_v58  ;;  %v3572_v26 = vld [vmem:[%s6150_s4] sm:$0xf] }
 0x39d   : > { %4002 = vmatpush3.msra.mxu1 %v3685_v61  ;;  %3965 = vmatprep.subr.mxu0 %v3668_v8  ;;  %v3575_v57 = vld [vmem:[#allocation2] sm:$0xff] }
 0x39e   : > { %4003 = vmatprep.subr.mxu1 %v3700_v28  ;;  %3966 = vmatpush3.msra.mxu0 %v3652_v31  ;;  %v3579_v11 = vld [vmem:[#allocation2 + $0x20] sm:$0xff] }
 0x39f   : > { %4004 = vmatpush3.msra.mxu1 %v3684_v18  ;;  %3967 = vmatprep.subr.mxu0 %v3667_v42  ;;  %v3934_v18 = vld [vmem:[%s6152_s6] ss:$0 sm:$0xff] }
 0x3a0   : > { %4005 = vmatprep.subr.mxu1 %v3699_v49  ;;  %3968 = vmatpush3.msra.mxu0 %v3651_v6 }
 0x3a1   : > { %4006 = vmatpush3.msra.mxu1 %v3683_v25  ;;  %3969 = vmatprep.subr.mxu0 %v3666_v54 }
 0x3a2   : > { %4007 = vmatprep.subr.mxu1 %v3698_v10  ;;  %3970 = vmatpush3.msra.mxu0 %v3650_v22 }
 0x3a3   : > { %4008 = vmatpush3.msra.mxu1 %v3682_v4  ;;  %3971 = vmatprep.subr.mxu0 %v3665_v55 }
 0x3a4   : > { %4009 = vmatprep.subr.mxu1 %v3697_v3  ;;  %3972 = vmatpush3.msra.mxu0 %v3649_v16 }
 0x3a5   : > { %4010 = vmatpush3.msra.mxu1 %v3681_v38 }
 0x3a9   : > { %v4037_v36 = vpop.eup %4036 }
 0x3aa   : > { %v3571_v15 = vmul.f32 %v4037_v36, %v3568_v14 }
 0x3ac   : > { %v3573_v5 = vmul.f32 %v3571_v15, %v3563_v59  ;;  %v3591_v56 = vrot.slane %v3571_v15, %v5910_v47  ;;  %v3599_v19 = vrot.slane %v3571_v15, %v5913_v20  ;;  %v3587_v45 = vrot.slane %v3571_v15, %v5900_v63 }
 0x3ad   : > { %v3595_v35 = vrot.slane %v3571_v15, %v5903_v24 }
 0x3ae   : > { %v3574_v23 = vsub.f32 %v3572_v26, %v3573_v5  ;;  %v3605_v41 = vmul.f32 %v3591_v56, %v3576_v62  ;;  %v3607_v37 = vmul.f32 %v3599_v19, %v3578_v60  ;;  %v3604_v2 = vmul.f32 %v3587_v45, %v3575_v57 }
 0x3af   : > { %v3606_v12 = vmul.f32 %v3595_v35, %v3577_v34  ;;  %v3609_v13 = vmul.f32 %v3591_v56, %v3580_v52  ;;  %v3611_v9 = vmul.f32 %v3599_v19, %v3582_v1  ;;  %v3608_v21 = vmul.f32 %v3587_v45, %v3579_v11 }
 0x3b0   : > { %v3620_v29 = vrot.slane %v3574_v23, %v5910_v47  ;;  %v3628_v48 = vrot.slane %v3574_v23, %v5913_v20  ;;  %v3616_v44 = vrot.slane %v3574_v23, %v5900_v63  ;;  %v3624_v7 = vrot.slane %v3574_v23, %v5903_v24 }
 0x3b1   : > { %v3610_v43 = vmul.f32 %v3595_v35, %v3581_v46 }
 0x3b2   : > { %v3634_v17 = vadd.f32 %v3620_v29, %v3605_v41  ;;  %v3636_v50 = vadd.f32 %v3628_v48, %v3607_v37  ;;  %v3633_v51 = vadd.f32 %v3616_v44, %v3604_v2  ;;  %v3635_v32 = vadd.f32 %v3624_v7, %v3606_v12 }
 0x3b3   : > { %v3638_v30 = vadd.f32 %v3620_v29, %v3609_v13  ;;  %v3640_v53 = vadd.f32 %v3628_v48, %v3611_v9  ;;  %v3637_v61 = vadd.f32 %v3616_v44, %v3608_v21  ;;  %v3639_v0 = vadd.f32 %v3624_v7, %v3610_v43 }
 0x3b4   : > { %v3642_v40 = vmax.f32 %v3634_v17, 0.0  ;;  %v3644_v8 = vmax.f32 %v3636_v50, 0.0  ;;  %v3641_v28 = vmax.f32 %v3633_v51, 0.0  ;;  %v3643_v59 = vmax.f32 %v3635_v32, 0.0 }
 0x3b5   : > { %v3646_v47 = vmax.f32 %v3638_v30, 0.0  ;;  %v3648_v27 = vmax.f32 %v3640_v53, 0.0  ;;  %v3645_v63 = vmax.f32 %v3637_v61, 0.0  ;;  %v3647_v24 = vmax.f32 %v3639_v0, 0.0 }
 0x3b6   : > { %3784 = vmatprep.mubr.f32.mxu0 %v3642_v40  ;;  %3859 = vmatprep.mubr.f32.mxu1 %v3644_v8 }
 0x3b7   : > { %3785 = vmatmul.mubr.f32.vlgmr.msra.gmra.mxu0 %v3641_v28  ;;  %3860 = vmatmul.mubr.f32.vlgmr.msra.gmra.mxu1 %v3643_v59 }
 0x3b8   : > { %3789 = vmatprep.mubr.f32.mxu0 %v3646_v47  ;;  %3864 = vmatprep.mubr.f32.mxu1 %v3648_v27 }
 0x3bb   : > { %3790 = vmatmul.mubr.f32.gmra.mxu0 %v3645_v63  ;;  %3865 = vmatmul.mubr.f32.gmra.mxu1 %v3647_v24 }
 0x477   : > { %v3973_v20 = vpop.f32.mrf.mxu0  ;;  %v4011_v31 = vpop.f32.mrf.mxu1 }
 0x479   : > { %v3974_v42 = vpop.f32.mrf.mxu0  ;;  %v4012_v49 = vpop.f32.mrf.mxu1 }
 0x47a   : > { %v3975_v39 = vadd.f32 %v3974_v42, %v3973_v20  ;;  %v4013_v10 = vadd.f32 %v4012_v49, %v4011_v31 }
 0x47b   : > { %v3976_v6 = vpop.f32.mrf.mxu0  ;;  %v4014_v25 = vpop.f32.mrf.mxu1 }
 0x47c   : > { %v3787_v54 = vadd.f32 %v3975_v39, %v3934_v18 }
 0x47d   : > { %v3977_v33 = vpop.f32.mrf.mxu0  ;;  %v4015_v22 = vpop.f32.mrf.mxu1 }
 0x47e   : > { %v3862_v4 = vadd.f32 %v4013_v10, %v3787_v54  ;;  %v3978_v55 = vadd.f32 %v3977_v33, %v3976_v6  ;;  %v4016_v58 = vadd.f32 %v4015_v22, %v4014_v25 }
 0x480   : > { %3870 = vst [vmem:[#allocation5] sm:$0xff] %v3862_v4  ;;  %v3792_v3 = vadd.f32 %v3978_v55, %v3934_v18 }
 0x482   : > { %v3867_v16 = vadd.f32 %v4016_v58, %v3792_v3 }
 0x484   : > { %3871 = vst [vmem:[#allocation5 + $0x8] sm:$0xff] %v3867_v16 }
 0x485 PF: > { %p4021_p6 = scmp.eq.s32.totalorder %s4125_s25, 1  ;;  %s4076_s23 = smov [#allocation5]  }
 0x486   : > { %s3878_s27 = sshll.u32 %s4076_s23, 4  ;;  %s3879_s27 = int_to_ptr.vmem [resolvable:$true] %s3878_s27 }
 0x487   : > { %s4038_s28 = scalar_lea.vmem %s3879_s27, 256  ;;  %p4045_p10 = scmp.lt.s32.totalorder %s3879_s27, %s3879_s27 }
 0x488   : > { %p4039_p7 = scmp.ne.s32.totalorder %s3879_s27, %s4038_s28  ;;  %p4046_p11 = scmp.lt.s32.totalorder %s4038_s28, %s4038_s28 }
 0x48a   : > { %p4040_p8 = pnand %p4039_p7, %p4021_p6  ;;  %p4047_p12 = por %p4046_p11, %p4045_p10 }
 0x48c   : > { %p4041_p9 = pneg %p4040_p8 }
 0x48e   : > { %p4048_p13 = pnand %p4047_p12, %p4041_p9 }
 0x490   : > { %4051 = shalt.err (!%p4048_p13)
}
 0x491   : > { %s4077_s29 = smov 128   ;;  %s4078_s30 = smov 8  }
 0x492   : > { %4018 = dma.vmem_to_hbm [thread:$0]  (%p4021_p6), %s3879_s27, 256, %s6153_s7, [#allocation6], %s4077_s29, %s4077_s29, %s4078_s30  }
 0x493   : > { %4067 = dma.done.wait (%p4021_p6), [#allocation6], 256  }
 0x494   : > { %4069 = vsyncadd (%p4021_p6), [#allocation6], 4294967040 }
 0x495 PF: > { %s18_s24 = sadd.s32 1, %s4072_s24  }
 0x496   : > { %p15_p0 = scmp.ge.s32.totalorder %s18_s24, 4  }
 0x498   :  { %17 = sbr.rel (!%p15_p0) target bundleno = 1 (0x1), region = 84 }
 0x49d   :  { %3894 = vsyncpa [#allocation6], 1 }
 0x49e   :  { %3896 = vsyncpa [#allocation6 + $0x1], 1 }

</bundles_post_ra>
